<compile_context>
chip_gen: v6e
topology: v6e:2x2x1
jax: 0.10.0
libtpu: 0.0.40
codegen_flags: <defaults>
</compile_context>

<pallas_src>
import functools
import math

import jax
import jax.numpy as jnp
import numpy as np
from jax.experimental import pallas as pl
from jax.experimental.pallas import tpu as pltpu

HIDDEN_DIM = 32
OUT_DIM = 32
N_HEADS = 4
HEAD_DIM = HIDDEN_DIM // N_HEADS
N_LAYERS = 2
NUM_ATOM_TYPE = 28
NUM_BOND_TYPE = 4
NUM_CLASSES = 1
FFN_DIM = 2 * HIDDEN_DIM
GRAPHS_PER_BLOCK = 4
W_PER_LAYER = 17  # weight refs per transformer layer (see pack_params order)


# ------------------------------ fused kernel -------------------------------

def _fused_net_kernel(h_ref, e_ref, dg_ref, sg_ref, ds_ref, bsum_ref, rmean_ref,
                      *refs, n_layers):
    """Whole GraphTransformerNet forward for one block of stacked graphs.

    refs = [per-layer weights (17 per layer), MLPReadout (6), out_ref].
    Shapes (per block): h (GN,HD), e (GE,HD), dg/sg (GE,GN), ds (GN,GE),
    bsum (HD,HD) per-head block-of-ones, rmean (G,GN) per-graph mean readout.
    """
    out_ref = refs[-1]
    wrefs = refs[:-1]

    h = h_ref[...]            # (GN, HD)
    e = e_ref[...]            # (GE, HD)
    dg = dg_ref[0]            # (GE, GN)  gather node rows by edge destination
    sg = sg_ref[0]            # (GE, GN)  gather node rows by edge source
    ds = ds_ref[0]            # (GN, GE)  scatter-add edges per destination node
    bsum = bsum_ref[...]      # (HD, HD)  block-diag-of-ones: per-head sum+broadcast
    rmean = rmean_ref[...]    # (G, GN)   per-graph mean readout

    def mm(a, b):
        return jnp.dot(a, b, preferred_element_type=jnp.float32)

    def layernorm(x, g, b):
        mean = jnp.mean(x, axis=-1, keepdims=True)
        var = jnp.mean((x - mean) ** 2, axis=-1, keepdims=True)
        return (x - mean) * jax.lax.rsqrt(var + 1e-5) * g + b

    for layer in range(n_layers):
        (wq, wk, wv, we,
         wo_h, bo_h, wo_e, bo_e,
         lnp,
         fh1w, fh1b, fh2w, fh2b,
         fe1w, fe1b, fe2w, fe2b) = [
             r[...] for r in wrefs[layer * W_PER_LAYER:(layer + 1) * W_PER_LAYER]]

        h_in1, e_in1 = h, e

        # ---- per-stream Q/K/V/E projections (use_bias=False); scale folded in wq ----
        qn = mm(h, wq)                      # (GN, HD)
        kn = mm(h, wk)                      # (GN, HD)
        vn = mm(h, wv)                      # (GN, HD)
        ep = mm(e, we)                      # (GE, HD)

        # ---- per-edge gathers via block-diagonal one-hot matmuls ----
        qd = mm(dg, qn)                     # (GE, HD)  Q at destination
        ks = mm(sg, kn)                     # (GE, HD)  K at source
        vs = mm(sg, vn)                     # (GE, HD)  V at source

        # ---- edge-featured multi-head attention ----
        score = ks * qd * ep                # (GE, HD)  (K.Q/sqrt(d))*E per dim
        e_attn = score
        # per-head sum over head_dim + broadcast back, in one matmul; exp on EUP
        w_full = jnp.exp(jnp.clip(mm(score, bsum), -5.0, 5.0))     # (GE, HD)
        num = mm(ds, w_full * vs)                                  # (GN, HD)
        z_full = mm(ds, w_full)                                    # (GN, HD)
        h_attn = num * pl.reciprocal(z_full + 1e-6, approx=True)   # (GN, HD)

        # ---- O projections (Linear, bias=True) + residual + LayerNorm ----
        h = h_in1 + mm(h_attn, wo_h) + bo_h
        e = e_in1 + mm(e_attn, wo_e) + bo_e
        h = layernorm(h, lnp[0:1, :], lnp[1:2, :])
        e = layernorm(e, lnp[2:3, :], lnp[3:4, :])

        # ---- FFN (per stream, no concat / lane slice) + residual + LayerNorm ----
        h_in2, e_in2 = h, e
        h = h_in2 + mm(jnp.maximum(mm(h_in2, fh1w) + fh1b, 0.0), fh2w) + fh2b
        e = e_in2 + mm(jnp.maximum(mm(e_in2, fe1w) + fe1b, 0.0), fe2w) + fe2b
        h = layernorm(h, lnp[4:5, :], lnp[5:6, :])
        e = layernorm(e, lnp[6:7, :], lnp[7:8, :])

    # ---- per-graph mean readout + MLPReadout (L=2) fused into the epilogue ----
    mbase = n_layers * W_PER_LAYER
    w0 = wrefs[mbase + 0][...]; b0 = wrefs[mbase + 1][...]
    w1 = wrefs[mbase + 2][...]; b1 = wrefs[mbase + 3][...]
    w2 = wrefs[mbase + 4][...]; b2 = wrefs[mbase + 5][...]
    hg = mm(rmean, h)                                              # (G, HD)
    y = jnp.maximum(mm(hg, w0) + b0, 0.0)
    y = jnp.maximum(mm(y, w1) + b1, 0.0)
    y = mm(y, w2) + b2                                             # (G, 1)
    out_ref[0] = y.astype(out_ref.dtype)


# ---------------------------- parameters / glue -----------------------------

def init_params(key):
    def normal(k, shape, scale=0.1):
        return scale * jax.random.normal(k, shape, dtype=jnp.float32)

    keys = iter(jax.random.split(key, 256))
    params = {
        "emb_h": normal(next(keys), (NUM_ATOM_TYPE, HIDDEN_DIM)),
        "emb_e": normal(next(keys), (NUM_BOND_TYPE, HIDDEN_DIM)),
        "layers": [],
    }
    d = HIDDEN_DIM
    for _ in range(N_LAYERS):
        lp = {
            "Wq": normal(next(keys), (d, d)),
            "Wk": normal(next(keys), (d, d)),
            "Wv": normal(next(keys), (d, d)),
            "We": normal(next(keys), (d, d)),
            "Wo_h": normal(next(keys), (d, d)), "bo_h": normal(next(keys), (d,)),
            "Wo_e": normal(next(keys), (d, d)), "bo_e": normal(next(keys), (d,)),
            "ln1_h_g": jnp.ones((d,), jnp.float32), "ln1_h_b": jnp.zeros((d,), jnp.float32),
            "ln1_e_g": jnp.ones((d,), jnp.float32), "ln1_e_b": jnp.zeros((d,), jnp.float32),
            "ffn_h1_w": normal(next(keys), (d, FFN_DIM)), "ffn_h1_b": normal(next(keys), (FFN_DIM,)),
            "ffn_h2_w": normal(next(keys), (FFN_DIM, d)), "ffn_h2_b": normal(next(keys), (d,)),
            "ffn_e1_w": normal(next(keys), (d, FFN_DIM)), "ffn_e1_b": normal(next(keys), (FFN_DIM,)),
            "ffn_e2_w": normal(next(keys), (FFN_DIM, d)), "ffn_e2_b": normal(next(keys), (d,)),
            "ln2_h_g": jnp.ones((d,), jnp.float32), "ln2_h_b": jnp.zeros((d,), jnp.float32),
            "ln2_e_g": jnp.ones((d,), jnp.float32), "ln2_e_b": jnp.zeros((d,), jnp.float32),
        }
        params["layers"].append(lp)
    params["mlp"] = {  # MLPReadout(out_dim, num_classes), L=2
        "w0": normal(next(keys), (OUT_DIM, OUT_DIM // 2)), "b0": normal(next(keys), (OUT_DIM // 2,)),
        "w1": normal(next(keys), (OUT_DIM // 2, OUT_DIM // 4)), "b1": normal(next(keys), (OUT_DIM // 4,)),
        "w2": normal(next(keys), (OUT_DIM // 4, NUM_CLASSES)), "b2": normal(next(keys), (NUM_CLASSES,)),
    }
    return params


def pack_params(params):
    """Flatten weights into the kernel's per-layer order (done once, eagerly).

    The 1/sqrt(head_dim) attention scale is folded into Wq; Bsum is the per-head
    block-of-ones matrix fusing the softmax head-sum + broadcast into one matmul.
    """
    scale = 1.0 / math.sqrt(HEAD_DIM)
    flat = []
    for lp in params["layers"]:
        flat += [
            lp["Wq"] * scale, lp["Wk"], lp["Wv"], lp["We"],
            lp["Wo_h"], lp["bo_h"].reshape(1, -1),
            lp["Wo_e"], lp["bo_e"].reshape(1, -1),
            jnp.stack([lp["ln1_h_g"], lp["ln1_h_b"], lp["ln1_e_g"], lp["ln1_e_b"],
                       lp["ln2_h_g"], lp["ln2_h_b"], lp["ln2_e_g"], lp["ln2_e_b"]], axis=0),
            lp["ffn_h1_w"], lp["ffn_h1_b"].reshape(1, -1),
            lp["ffn_h2_w"], lp["ffn_h2_b"].reshape(1, -1),
            lp["ffn_e1_w"], lp["ffn_e1_b"].reshape(1, -1),
            lp["ffn_e2_w"], lp["ffn_e2_b"].reshape(1, -1),
        ]
    m = params["mlp"]
    flat += [m["w0"], m["b0"].reshape(1, -1),
             m["w1"], m["b1"].reshape(1, -1),
             m["w2"], m["b2"].reshape(1, -1)]
    di = np.arange(HIDDEN_DIM)[:, None] // HEAD_DIM
    dj = np.arange(HIDDEN_DIM)[None, :] // HEAD_DIM
    bsum = jnp.asarray((di == dj).astype(np.float32))              # (HD, HD)
    return {"emb_h": params["emb_h"], "emb_e": params["emb_e"],
            "bsum": bsum, "flat": flat}


def graph_transformer_forward(packed, h_idx, e_idx, dg_blocks, sg_blocks, ds_blocks,
                              rmean, *, nodes_per_graph, edges_per_graph):
    # Embedding lookups are glue; in_feat_dropout / dropout are identity (eval).
    h0 = jnp.take(packed["emb_h"], h_idx, axis=0)    # (num_graphs*N, HD)
    e0 = jnp.take(packed["emb_e"], e_idx, axis=0)    # (num_graphs*E, HD)
    # TODO(synk): batch_norm / training-mode dropout / lap & wl positional-encoding
    # branches not implemented (eval semantics of the given config only).

    flat = packed["flat"]
    num_blocks = dg_blocks.shape[0]
    gpb = GRAPHS_PER_BLOCK
    gn = gpb * nodes_per_graph
    ge = gpb * edges_per_graph

    def const_spec(a):  # full array, constant block index -> stays resident in VMEM
        return pl.BlockSpec(a.shape, lambda g: (0, 0))

    in_specs = [
        pl.BlockSpec((gn, HIDDEN_DIM), lambda g: (g, 0)),          # h block
        pl.BlockSpec((ge, HIDDEN_DIM), lambda g: (g, 0)),          # e block
        pl.BlockSpec((1, ge, gn), lambda g: (g, 0, 0)),            # dst gather
        pl.BlockSpec((1, ge, gn), lambda g: (g, 0, 0)),            # src gather
        pl.BlockSpec((1, gn, ge), lambda g: (g, 0, 0)),            # dst scatter
        const_spec(packed["bsum"]),
        const_spec(rmean),
    ] + [const_spec(w) for w in flat]

    out_specs = pl.BlockSpec((1, gpb, NUM_CLASSES), lambda g: (g, 0, 0))
    out_shape = jax.ShapeDtypeStruct((num_blocks, gpb, NUM_CLASSES), jnp.float32)

    # Advisory cost estimate (rough, per review suggestion).
    hd, ff = HIDDEN_DIM, FFN_DIM
    per_layer = (2 * gn * hd * hd * 4 + 2 * ge * hd * hd * 3
                 + 2 * ge * gn * hd * 3 + 2 * gn * ge * hd * 2
                 + 2 * (gn + ge) * (hd * ff + ff * hd))
    per_block = N_LAYERS * per_layer + 2 * gpb * gn * hd + 2 * gpb * hd * hd
    cost = pl.CostEstimate(
        flops=int(num_blocks * per_block),
        transcendentals=int(num_blocks * N_LAYERS * ((ge + gn) * hd + 2 * (gn + ge))),
        bytes_accessed=int(4 * (h0.size + e0.size + dg_blocks.size + sg_blocks.size
                                + ds_blocks.size + rmean.size + packed["bsum"].size
                                + sum(int(w.size) for w in flat)
                                + num_blocks * gpb * NUM_CLASSES)))

    kernel = functools.partial(_fused_net_kernel, n_layers=N_LAYERS)
    out = pl.pallas_call(
        kernel,
        grid=(num_blocks,),
        out_shape=out_shape,
        in_specs=in_specs,
        out_specs=out_specs,
        compiler_params=pltpu.CompilerParams(
            dimension_semantics=("parallel",),     # v7x: split batch over both TCs
            vmem_limit_bytes=32 * 1024 * 1024),
        cost_estimate=cost,
    )(h0, e0, dg_blocks, sg_blocks, ds_blocks, packed["bsum"], rmean, *flat)
    return out.reshape(num_blocks * gpb, NUM_CLASSES)


if __name__ == "__main__":
    key = jax.random.PRNGKey(0)
    pkey, hkey, ekey = jax.random.split(key, 3)
    params = init_params(pkey)
    packed = pack_params(params)

    # Batch of small synthetic molecule-like graphs: bidirectional rings.
    # N=16 nodes / E=32 edges per graph (8-sublane aligned); 8 graphs,
    # 4 graphs stacked per grid block -> matmul M of 64 node / 128 edge rows.
    N, NUM_GRAPHS = 16, 8
    assert NUM_GRAPHS % GRAPHS_PER_BLOCK == 0
    fwd_src = np.arange(N, dtype=np.int32)
    fwd_dst = (fwd_src + 1) % N
    src = np.concatenate([fwd_src, fwd_dst])
    dst = np.concatenate([fwd_dst, fwd_src])
    E = int(src.shape[0])

    # Same topology per graph, different atom / bond types.
    h_idx = jax.random.randint(hkey, (NUM_GRAPHS * N,), 0, NUM_ATOM_TYPE, dtype=jnp.int32)
    e_idx = jax.random.randint(ekey, (NUM_GRAPHS * E,), 0, NUM_BOND_TYPE, dtype=jnp.int32)

    gpb = GRAPHS_PER_BLOCK
    num_blocks = NUM_GRAPHS // gpb

    # Block-diagonal one-hot gather / scatter matrices for each graph block.
    dg_blk = np.zeros((gpb * E, gpb * N), np.float32)
    sg_blk = np.zeros((gpb * E, gpb * N), np.float32)
    for k in range(gpb):
        dg_blk[k * E + np.arange(E), k * N + dst] = 1.0
        sg_blk[k * E + np.arange(E), k * N + src] = 1.0
    dg_blocks = jnp.asarray(np.broadcast_to(dg_blk, (num_blocks, gpb * E, gpb * N)).copy())
    sg_blocks = jnp.asarray(np.broadcast_to(sg_blk, (num_blocks, gpb * E, gpb * N)).copy())
    ds_blocks = jnp.asarray(np.broadcast_to(dg_blk.T, (num_blocks, gpb * N, gpb * E)).copy())

    # Per-graph segmented mean-readout matrix (constant across blocks).
    rmean_np = np.zeros((gpb, gpb * N), np.float32)
    for k in range(gpb):
        rmean_np[k, k * N:(k + 1) * N] = 1.0 / N
    rmean = jnp.asarray(rmean_np)

    fwd = jax.jit(functools.partial(graph_transformer_forward,
                                    nodes_per_graph=N, edges_per_graph=E))
    out = fwd(packed, h_idx, e_idx, dg_blocks, sg_blocks, ds_blocks, rmean)
    jax.block_until_ready(out)
    assert out.shape == (NUM_GRAPHS, NUM_CLASSES) and out.dtype == jnp.float32
    print("KERNEL_OK")
</pallas_src>

<mosaic_0001>
module attributes {stable_mosaic.version = 11 : i64} {
  func.func @_fused_net_kernel(%arg0: i32, %arg1: memref<64x32xf32, #tpu.memory_space<vmem>>, %arg2: memref<128x32xf32, #tpu.memory_space<vmem>>, %arg3: memref<1x128x64xf32, #tpu.memory_space<vmem>>, %arg4: memref<1x128x64xf32, #tpu.memory_space<vmem>>, %arg5: memref<1x64x128xf32, #tpu.memory_space<vmem>>, %arg6: memref<32x32xf32, #tpu.memory_space<vmem>>, %arg7: memref<4x64xf32, #tpu.memory_space<vmem>>, %arg8: memref<32x32xf32, #tpu.memory_space<vmem>>, %arg9: memref<32x32xf32, #tpu.memory_space<vmem>>, %arg10: memref<32x32xf32, #tpu.memory_space<vmem>>, %arg11: memref<32x32xf32, #tpu.memory_space<vmem>>, %arg12: memref<32x32xf32, #tpu.memory_space<vmem>>, %arg13: memref<1x32xf32, #tpu.memory_space<vmem>>, %arg14: memref<32x32xf32, #tpu.memory_space<vmem>>, %arg15: memref<1x32xf32, #tpu.memory_space<vmem>>, %arg16: memref<8x32xf32, #tpu.memory_space<vmem>>, %arg17: memref<32x64xf32, #tpu.memory_space<vmem>>, %arg18: memref<1x64xf32, #tpu.memory_space<vmem>>, %arg19: memref<64x32xf32, #tpu.memory_space<vmem>>, %arg20: memref<1x32xf32, #tpu.memory_space<vmem>>, %arg21: memref<32x64xf32, #tpu.memory_space<vmem>>, %arg22: memref<1x64xf32, #tpu.memory_space<vmem>>, %arg23: memref<64x32xf32, #tpu.memory_space<vmem>>, %arg24: memref<1x32xf32, #tpu.memory_space<vmem>>, %arg25: memref<32x32xf32, #tpu.memory_space<vmem>>, %arg26: memref<32x32xf32, #tpu.memory_space<vmem>>, %arg27: memref<32x32xf32, #tpu.memory_space<vmem>>, %arg28: memref<32x32xf32, #tpu.memory_space<vmem>>, %arg29: memref<32x32xf32, #tpu.memory_space<vmem>>, %arg30: memref<1x32xf32, #tpu.memory_space<vmem>>, %arg31: memref<32x32xf32, #tpu.memory_space<vmem>>, %arg32: memref<1x32xf32, #tpu.memory_space<vmem>>, %arg33: memref<8x32xf32, #tpu.memory_space<vmem>>, %arg34: memref<32x64xf32, #tpu.memory_space<vmem>>, %arg35: memref<1x64xf32, #tpu.memory_space<vmem>>, %arg36: memref<64x32xf32, #tpu.memory_space<vmem>>, %arg37: memref<1x32xf32, #tpu.memory_space<vmem>>, %arg38: memref<32x64xf32, #tpu.memory_space<vmem>>, %arg39: memref<1x64xf32, #tpu.memory_space<vmem>>, %arg40: memref<64x32xf32, #tpu.memory_space<vmem>>, %arg41: memref<1x32xf32, #tpu.memory_space<vmem>>, %arg42: memref<32x16xf32, #tpu.memory_space<vmem>>, %arg43: memref<1x16xf32, #tpu.memory_space<vmem>>, %arg44: memref<16x8xf32, #tpu.memory_space<vmem>>, %arg45: memref<1x8xf32, #tpu.memory_space<vmem>>, %arg46: memref<8x1xf32, #tpu.memory_space<vmem>>, %arg47: memref<1x1xf32, #tpu.memory_space<vmem>>, %arg48: memref<1x4x1xf32, #tpu.memory_space<vmem>>) attributes {dimension_semantics = [#tpu.dimension_semantics<parallel>], iteration_bounds = array<i64: 2>, scalar_prefetch = 0 : i64, scratch_operands = 0 : i64, tpu.core_type = #tpu.core_type<tc>, window_params = [{transform_indices = @transform_0, window_bounds = array<i64: 64, 32>}, {transform_indices = @transform_1, window_bounds = array<i64: 128, 32>}, {transform_indices = @transform_2, window_bounds = array<i64: 1, 128, 64>}, {transform_indices = @transform_3, window_bounds = array<i64: 1, 128, 64>}, {transform_indices = @transform_4, window_bounds = array<i64: 1, 64, 128>}, {pipeline_mode = #tpu.pipeline_mode<synchronous>, transform_indices = @transform_5, window_bounds = array<i64: 32, 32>}, {pipeline_mode = #tpu.pipeline_mode<synchronous>, transform_indices = @transform_6, window_bounds = array<i64: 4, 64>}, {pipeline_mode = #tpu.pipeline_mode<synchronous>, transform_indices = @transform_7, window_bounds = array<i64: 32, 32>}, {pipeline_mode = #tpu.pipeline_mode<synchronous>, transform_indices = @transform_8, window_bounds = array<i64: 32, 32>}, {pipeline_mode = #tpu.pipeline_mode<synchronous>, transform_indices = @transform_9, window_bounds = array<i64: 32, 32>}, {pipeline_mode = #tpu.pipeline_mode<synchronous>, transform_indices = @transform_10, window_bounds = array<i64: 32, 32>}, {pipeline_mode = #tpu.pipeline_mode<synchronous>, transform_indices = @transform_11, window_bounds = array<i64: 32, 32>}, {pipeline_mode = #tpu.pipeline_mode<synchronous>, transform_indices = @transform_12, window_bounds = array<i64: 1, 32>}, {pipeline_mode = #tpu.pipeline_mode<synchronous>, transform_indices = @transform_13, window_bounds = array<i64: 32, 32>}, {pipeline_mode = #tpu.pipeline_mode<synchronous>, transform_indices = @transform_14, window_bounds = array<i64: 1, 32>}, {pipeline_mode = #tpu.pipeline_mode<synchronous>, transform_indices = @transform_15, window_bounds = array<i64: 8, 32>}, {pipeline_mode = #tpu.pipeline_mode<synchronous>, transform_indices = @transform_16, window_bounds = array<i64: 32, 64>}, {pipeline_mode = #tpu.pipeline_mode<synchronous>, transform_indices = @transform_17, window_bounds = array<i64: 1, 64>}, {pipeline_mode = #tpu.pipeline_mode<synchronous>, transform_indices = @transform_18, window_bounds = array<i64: 64, 32>}, {pipeline_mode = #tpu.pipeline_mode<synchronous>, transform_indices = @transform_19, window_bounds = array<i64: 1, 32>}, {pipeline_mode = #tpu.pipeline_mode<synchronous>, transform_indices = @transform_20, window_bounds = array<i64: 32, 64>}, {pipeline_mode = #tpu.pipeline_mode<synchronous>, transform_indices = @transform_21, window_bounds = array<i64: 1, 64>}, {pipeline_mode = #tpu.pipeline_mode<synchronous>, transform_indices = @transform_22, window_bounds = array<i64: 64, 32>}, {pipeline_mode = #tpu.pipeline_mode<synchronous>, transform_indices = @transform_23, window_bounds = array<i64: 1, 32>}, {pipeline_mode = #tpu.pipeline_mode<synchronous>, transform_indices = @transform_24, window_bounds = array<i64: 32, 32>}, {pipeline_mode = #tpu.pipeline_mode<synchronous>, transform_indices = @transform_25, window_bounds = array<i64: 32, 32>}, {pipeline_mode = #tpu.pipeline_mode<synchronous>, transform_indices = @transform_26, window_bounds = array<i64: 32, 32>}, {pipeline_mode = #tpu.pipeline_mode<synchronous>, transform_indices = @transform_27, window_bounds = array<i64: 32, 32>}, {pipeline_mode = #tpu.pipeline_mode<synchronous>, transform_indices = @transform_28, window_bounds = array<i64: 32, 32>}, {pipeline_mode = #tpu.pipeline_mode<synchronous>, transform_indices = @transform_29, window_bounds = array<i64: 1, 32>}, {pipeline_mode = #tpu.pipeline_mode<synchronous>, transform_indices = @transform_30, window_bounds = array<i64: 32, 32>}, {pipeline_mode = #tpu.pipeline_mode<synchronous>, transform_indices = @transform_31, window_bounds = array<i64: 1, 32>}, {pipeline_mode = #tpu.pipeline_mode<synchronous>, transform_indices = @transform_32, window_bounds = array<i64: 8, 32>}, {pipeline_mode = #tpu.pipeline_mode<synchronous>, transform_indices = @transform_33, window_bounds = array<i64: 32, 64>}, {pipeline_mode = #tpu.pipeline_mode<synchronous>, transform_indices = @transform_34, window_bounds = array<i64: 1, 64>}, {pipeline_mode = #tpu.pipeline_mode<synchronous>, transform_indices = @transform_35, window_bounds = array<i64: 64, 32>}, {pipeline_mode = #tpu.pipeline_mode<synchronous>, transform_indices = @transform_36, window_bounds = array<i64: 1, 32>}, {pipeline_mode = #tpu.pipeline_mode<synchronous>, transform_indices = @transform_37, window_bounds = array<i64: 32, 64>}, {pipeline_mode = #tpu.pipeline_mode<synchronous>, transform_indices = @transform_38, window_bounds = array<i64: 1, 64>}, {pipeline_mode = #tpu.pipeline_mode<synchronous>, transform_indices = @transform_39, window_bounds = array<i64: 64, 32>}, {pipeline_mode = #tpu.pipeline_mode<synchronous>, transform_indices = @transform_40, window_bounds = array<i64: 1, 32>}, {pipeline_mode = #tpu.pipeline_mode<synchronous>, transform_indices = @transform_41, window_bounds = array<i64: 32, 16>}, {pipeline_mode = #tpu.pipeline_mode<synchronous>, transform_indices = @transform_42, window_bounds = array<i64: 1, 16>}, {pipeline_mode = #tpu.pipeline_mode<synchronous>, transform_indices = @transform_43, window_bounds = array<i64: 16, 8>}, {pipeline_mode = #tpu.pipeline_mode<synchronous>, transform_indices = @transform_44, window_bounds = array<i64: 1, 8>}, {pipeline_mode = #tpu.pipeline_mode<synchronous>, transform_indices = @transform_45, window_bounds = array<i64: 8, 1>}, {pipeline_mode = #tpu.pipeline_mode<synchronous>, transform_indices = @transform_46, window_bounds = array<i64: 1, 1>}, {transform_indices = @transform_47, window_bounds = array<i64: 1, 4, 1>}]} {
    %c0 = arith.constant 0 : index
    %c0_0 = arith.constant 0 : index
    %0 = vector.load %arg1[%c0, %c0_0] : memref<64x32xf32, #tpu.memory_space<vmem>>, vector<64x32xf32>
    %c0_1 = arith.constant 0 : index
    %c0_2 = arith.constant 0 : index
    %1 = vector.load %arg2[%c0_1, %c0_2] : memref<128x32xf32, #tpu.memory_space<vmem>>, vector<128x32xf32>
    %c0_3 = arith.constant 0 : index
    %c0_4 = arith.constant 0 : index
    %c0_5 = arith.constant 0 : index
    %2 = vector.load %arg3[%c0_3, %c0_4, %c0_5] : memref<1x128x64xf32, #tpu.memory_space<vmem>>, vector<1x128x64xf32>
    %3 = vector.shape_cast %2 : vector<1x128x64xf32> to vector<128x64xf32>
    %c0_6 = arith.constant 0 : index
    %c0_7 = arith.constant 0 : index
    %c0_8 = arith.constant 0 : index
    %4 = vector.load %arg4[%c0_6, %c0_7, %c0_8] : memref<1x128x64xf32, #tpu.memory_space<vmem>>, vector<1x128x64xf32>
    %5 = vector.shape_cast %4 : vector<1x128x64xf32> to vector<128x64xf32>
    %c0_9 = arith.constant 0 : index
    %c0_10 = arith.constant 0 : index
    %c0_11 = arith.constant 0 : index
    %6 = vector.load %arg5[%c0_9, %c0_10, %c0_11] : memref<1x64x128xf32, #tpu.memory_space<vmem>>, vector<1x64x128xf32>
    %7 = vector.shape_cast %6 : vector<1x64x128xf32> to vector<64x128xf32>
    %c0_12 = arith.constant 0 : index
    %c0_13 = arith.constant 0 : index
    %8 = vector.load %arg6[%c0_12, %c0_13] : memref<32x32xf32, #tpu.memory_space<vmem>>, vector<32x32xf32>
    %c0_14 = arith.constant 0 : index
    %c0_15 = arith.constant 0 : index
    %9 = vector.load %arg7[%c0_14, %c0_15] : memref<4x64xf32, #tpu.memory_space<vmem>>, vector<4x64xf32>
    %c0_16 = arith.constant 0 : index
    %c0_17 = arith.constant 0 : index
    %10 = vector.load %arg8[%c0_16, %c0_17] : memref<32x32xf32, #tpu.memory_space<vmem>>, vector<32x32xf32>
    %c0_18 = arith.constant 0 : index
    %c0_19 = arith.constant 0 : index
    %11 = vector.load %arg9[%c0_18, %c0_19] : memref<32x32xf32, #tpu.memory_space<vmem>>, vector<32x32xf32>
    %c0_20 = arith.constant 0 : index
    %c0_21 = arith.constant 0 : index
    %12 = vector.load %arg10[%c0_20, %c0_21] : memref<32x32xf32, #tpu.memory_space<vmem>>, vector<32x32xf32>
    %c0_22 = arith.constant 0 : index
    %c0_23 = arith.constant 0 : index
    %13 = vector.load %arg11[%c0_22, %c0_23] : memref<32x32xf32, #tpu.memory_space<vmem>>, vector<32x32xf32>
    %c0_24 = arith.constant 0 : index
    %c0_25 = arith.constant 0 : index
    %14 = vector.load %arg12[%c0_24, %c0_25] : memref<32x32xf32, #tpu.memory_space<vmem>>, vector<32x32xf32>
    %c0_26 = arith.constant 0 : index
    %c0_27 = arith.constant 0 : index
    %15 = vector.load %arg13[%c0_26, %c0_27] : memref<1x32xf32, #tpu.memory_space<vmem>>, vector<1x32xf32>
    %c0_28 = arith.constant 0 : index
    %c0_29 = arith.constant 0 : index
    %16 = vector.load %arg14[%c0_28, %c0_29] : memref<32x32xf32, #tpu.memory_space<vmem>>, vector<32x32xf32>
    %c0_30 = arith.constant 0 : index
    %c0_31 = arith.constant 0 : index
    %17 = vector.load %arg15[%c0_30, %c0_31] : memref<1x32xf32, #tpu.memory_space<vmem>>, vector<1x32xf32>
    %c0_32 = arith.constant 0 : index
    %c0_33 = arith.constant 0 : index
    %18 = vector.load %arg16[%c0_32, %c0_33] : memref<8x32xf32, #tpu.memory_space<vmem>>, vector<8x32xf32>
    %c0_34 = arith.constant 0 : index
    %c0_35 = arith.constant 0 : index
    %19 = vector.load %arg17[%c0_34, %c0_35] : memref<32x64xf32, #tpu.memory_space<vmem>>, vector<32x64xf32>
    %c0_36 = arith.constant 0 : index
    %c0_37 = arith.constant 0 : index
    %20 = vector.load %arg18[%c0_36, %c0_37] : memref<1x64xf32, #tpu.memory_space<vmem>>, vector<1x64xf32>
    %c0_38 = arith.constant 0 : index
    %c0_39 = arith.constant 0 : index
    %21 = vector.load %arg19[%c0_38, %c0_39] : memref<64x32xf32, #tpu.memory_space<vmem>>, vector<64x32xf32>
    %c0_40 = arith.constant 0 : index
    %c0_41 = arith.constant 0 : index
    %22 = vector.load %arg20[%c0_40, %c0_41] : memref<1x32xf32, #tpu.memory_space<vmem>>, vector<1x32xf32>
    %c0_42 = arith.constant 0 : index
    %c0_43 = arith.constant 0 : index
    %23 = vector.load %arg21[%c0_42, %c0_43] : memref<32x64xf32, #tpu.memory_space<vmem>>, vector<32x64xf32>
    %c0_44 = arith.constant 0 : index
    %c0_45 = arith.constant 0 : index
    %24 = vector.load %arg22[%c0_44, %c0_45] : memref<1x64xf32, #tpu.memory_space<vmem>>, vector<1x64xf32>
    %c0_46 = arith.constant 0 : index
    %c0_47 = arith.constant 0 : index
    %25 = vector.load %arg23[%c0_46, %c0_47] : memref<64x32xf32, #tpu.memory_space<vmem>>, vector<64x32xf32>
    %c0_48 = arith.constant 0 : index
    %c0_49 = arith.constant 0 : index
    %26 = vector.load %arg24[%c0_48, %c0_49] : memref<1x32xf32, #tpu.memory_space<vmem>>, vector<1x32xf32>
    %cst = arith.constant dense<0.000000e+00> : vector<64x32xf32>
    %27 = tpu.matmul %0, %10, %cst {dimension_numbers = #tpu.dot_dimension_numbers<[1], [0], [0], [1], [0, 0, 1, 1], [], []>} : vector<64x32xf32>, vector<32x32xf32>, vector<64x32xf32> -> vector<64x32xf32>
    %cst_50 = arith.constant dense<0.000000e+00> : vector<64x32xf32>
    %28 = tpu.matmul %0, %11, %cst_50 {dimension_numbers = #tpu.dot_dimension_numbers<[1], [0], [0], [1], [0, 0, 1, 1], [], []>} : vector<64x32xf32>, vector<32x32xf32>, vector<64x32xf32> -> vector<64x32xf32>
    %cst_51 = arith.constant dense<0.000000e+00> : vector<64x32xf32>
    %29 = tpu.matmul %0, %12, %cst_51 {dimension_numbers = #tpu.dot_dimension_numbers<[1], [0], [0], [1], [0, 0, 1, 1], [], []>} : vector<64x32xf32>, vector<32x32xf32>, vector<64x32xf32> -> vector<64x32xf32>
    %cst_52 = arith.constant dense<0.000000e+00> : vector<128x32xf32>
    %30 = tpu.matmul %1, %13, %cst_52 {dimension_numbers = #tpu.dot_dimension_numbers<[1], [0], [0], [1], [0, 0, 1, 1], [], []>} : vector<128x32xf32>, vector<32x32xf32>, vector<128x32xf32> -> vector<128x32xf32>
    %cst_53 = arith.constant dense<0.000000e+00> : vector<128x32xf32>
    %31 = tpu.matmul %3, %27, %cst_53 {dimension_numbers = #tpu.dot_dimension_numbers<[1], [0], [0], [1], [0, 0, 1, 1], [], []>} : vector<128x64xf32>, vector<64x32xf32>, vector<128x32xf32> -> vector<128x32xf32>
    %cst_54 = arith.constant dense<0.000000e+00> : vector<128x32xf32>
    %32 = tpu.matmul %5, %28, %cst_54 {dimension_numbers = #tpu.dot_dimension_numbers<[1], [0], [0], [1], [0, 0, 1, 1], [], []>} : vector<128x64xf32>, vector<64x32xf32>, vector<128x32xf32> -> vector<128x32xf32>
    %cst_55 = arith.constant dense<0.000000e+00> : vector<128x32xf32>
    %33 = tpu.matmul %5, %29, %cst_55 {dimension_numbers = #tpu.dot_dimension_numbers<[1], [0], [0], [1], [0, 0, 1, 1], [], []>} : vector<128x64xf32>, vector<64x32xf32>, vector<128x32xf32> -> vector<128x32xf32>
    %34 = arith.mulf %32, %31 : vector<128x32xf32>
    %35 = arith.mulf %34, %30 : vector<128x32xf32>
    %cst_56 = arith.constant dense<0.000000e+00> : vector<128x32xf32>
    %36 = tpu.matmul %35, %8, %cst_56 {dimension_numbers = #tpu.dot_dimension_numbers<[1], [0], [0], [1], [0, 0, 1, 1], [], []>} : vector<128x32xf32>, vector<32x32xf32>, vector<128x32xf32> -> vector<128x32xf32>
    %cst_57 = arith.constant -5.000000e+00 : f32
    %cst_58 = arith.constant 5.000000e+00 : f32
    %37 = vector.broadcast %cst_57 : f32 to vector<128x32xf32>
    %38 = arith.maximumf %37, %36 : vector<128x32xf32>
    %39 = vector.broadcast %cst_58 : f32 to vector<128x32xf32>
    %40 = arith.minimumf %39, %38 : vector<128x32xf32>
    %41 = math.exp %40 : vector<128x32xf32>
    %42 = arith.mulf %41, %33 : vector<128x32xf32>
    %cst_59 = arith.constant dense<0.000000e+00> : vector<64x32xf32>
    %43 = tpu.matmul %7, %42, %cst_59 {dimension_numbers = #tpu.dot_dimension_numbers<[1], [0], [0], [1], [0, 0, 1, 1], [], []>} : vector<64x128xf32>, vector<128x32xf32>, vector<64x32xf32> -> vector<64x32xf32>
    %cst_60 = arith.constant dense<0.000000e+00> : vector<64x32xf32>
    %44 = tpu.matmul %7, %41, %cst_60 {dimension_numbers = #tpu.dot_dimension_numbers<[1], [0], [0], [1], [0, 0, 1, 1], [], []>} : vector<64x128xf32>, vector<128x32xf32>, vector<64x32xf32> -> vector<64x32xf32>
    %cst_61 = arith.constant 9.99999997E-7 : f32
    %45 = vector.broadcast %cst_61 : f32 to vector<64x32xf32>
    %46 = arith.addf %44, %45 : vector<64x32xf32>
    %47 = tpu.reciprocal %46 {approx = true} : vector<64x32xf32> -> vector<64x32xf32>
    %48 = arith.mulf %43, %47 : vector<64x32xf32>
    %cst_62 = arith.constant dense<0.000000e+00> : vector<64x32xf32>
    %49 = tpu.matmul %48, %14, %cst_62 {dimension_numbers = #tpu.dot_dimension_numbers<[1], [0], [0], [1], [0, 0, 1, 1], [], []>} : vector<64x32xf32>, vector<32x32xf32>, vector<64x32xf32> -> vector<64x32xf32>
    %50 = arith.addf %0, %49 : vector<64x32xf32>
    %51 = vector.broadcast %15 : vector<1x32xf32> to vector<64x32xf32>
    %52 = arith.addf %50, %51 : vector<64x32xf32>
    %cst_63 = arith.constant dense<0.000000e+00> : vector<128x32xf32>
    %53 = tpu.matmul %35, %16, %cst_63 {dimension_numbers = #tpu.dot_dimension_numbers<[1], [0], [0], [1], [0, 0, 1, 1], [], []>} : vector<128x32xf32>, vector<32x32xf32>, vector<128x32xf32> -> vector<128x32xf32>
    %54 = arith.addf %1, %53 : vector<128x32xf32>
    %55 = vector.broadcast %17 : vector<1x32xf32> to vector<128x32xf32>
    %56 = arith.addf %54, %55 : vector<128x32xf32>
    %57 = vector.extract_strided_slice %18 {offsets = [0, 0], sizes = [1, 32], strides = [1, 1]} : vector<8x32xf32> to vector<1x32xf32>
    %58 = vector.extract_strided_slice %18 {offsets = [1, 0], sizes = [1, 32], strides = [1, 1]} : vector<8x32xf32> to vector<1x32xf32>
    %cst_64 = arith.constant dense<0.000000e+00> : vector<64xf32>
    %59 = vector.multi_reduction <add>, %52, %cst_64 [1] : vector<64x32xf32> to vector<64xf32>
    %60 = vector.shape_cast %59 : vector<64xf32> to vector<64x1xf32>
    %cst_65 = arith.constant 3.200000e+01 : f32
    %61 = vector.broadcast %cst_65 : f32 to vector<64x1xf32>
    %62 = arith.divf %60, %61 : vector<64x1xf32>
    %63 = vector.broadcast %62 : vector<64x1xf32> to vector<64x32xf32>
    %64 = arith.subf %52, %63 : vector<64x32xf32>
    %65 = arith.mulf %64, %64 : vector<64x32xf32>
    %cst_66 = arith.constant dense<0.000000e+00> : vector<64xf32>
    %66 = vector.multi_reduction <add>, %65, %cst_66 [1] : vector<64x32xf32> to vector<64xf32>
    %67 = vector.shape_cast %66 : vector<64xf32> to vector<64x1xf32>
    %cst_67 = arith.constant 3.200000e+01 : f32
    %68 = vector.broadcast %cst_67 : f32 to vector<64x1xf32>
    %69 = arith.divf %67, %68 : vector<64x1xf32>
    %70 = vector.broadcast %62 : vector<64x1xf32> to vector<64x32xf32>
    %71 = arith.subf %52, %70 : vector<64x32xf32>
    %cst_68 = arith.constant 9.99999974E-6 : f32
    %72 = vector.broadcast %cst_68 : f32 to vector<64x1xf32>
    %73 = arith.addf %69, %72 : vector<64x1xf32>
    %74 = math.rsqrt %73 : vector<64x1xf32>
    %75 = vector.broadcast %74 : vector<64x1xf32> to vector<64x32xf32>
    %76 = arith.mulf %71, %75 : vector<64x32xf32>
    %77 = vector.broadcast %57 : vector<1x32xf32> to vector<64x32xf32>
    %78 = arith.mulf %76, %77 : vector<64x32xf32>
    %79 = vector.broadcast %58 : vector<1x32xf32> to vector<64x32xf32>
    %80 = arith.addf %78, %79 : vector<64x32xf32>
    %81 = vector.extract_strided_slice %18 {offsets = [2, 0], sizes = [1, 32], strides = [1, 1]} : vector<8x32xf32> to vector<1x32xf32>
    %82 = vector.extract_strided_slice %18 {offsets = [3, 0], sizes = [1, 32], strides = [1, 1]} : vector<8x32xf32> to vector<1x32xf32>
    %cst_69 = arith.constant dense<0.000000e+00> : vector<128xf32>
    %83 = vector.multi_reduction <add>, %56, %cst_69 [1] : vector<128x32xf32> to vector<128xf32>
    %84 = vector.shape_cast %83 : vector<128xf32> to vector<128x1xf32>
    %cst_70 = arith.constant 3.200000e+01 : f32
    %85 = vector.broadcast %cst_70 : f32 to vector<128x1xf32>
    %86 = arith.divf %84, %85 : vector<128x1xf32>
    %87 = vector.broadcast %86 : vector<128x1xf32> to vector<128x32xf32>
    %88 = arith.subf %56, %87 : vector<128x32xf32>
    %89 = arith.mulf %88, %88 : vector<128x32xf32>
    %cst_71 = arith.constant dense<0.000000e+00> : vector<128xf32>
    %90 = vector.multi_reduction <add>, %89, %cst_71 [1] : vector<128x32xf32> to vector<128xf32>
    %91 = vector.shape_cast %90 : vector<128xf32> to vector<128x1xf32>
    %cst_72 = arith.constant 3.200000e+01 : f32
    %92 = vector.broadcast %cst_72 : f32 to vector<128x1xf32>
    %93 = arith.divf %91, %92 : vector<128x1xf32>
    %94 = vector.broadcast %86 : vector<128x1xf32> to vector<128x32xf32>
    %95 = arith.subf %56, %94 : vector<128x32xf32>
    %cst_73 = arith.constant 9.99999974E-6 : f32
    %96 = vector.broadcast %cst_73 : f32 to vector<128x1xf32>
    %97 = arith.addf %93, %96 : vector<128x1xf32>
    %98 = math.rsqrt %97 : vector<128x1xf32>
    %99 = vector.broadcast %98 : vector<128x1xf32> to vector<128x32xf32>
    %100 = arith.mulf %95, %99 : vector<128x32xf32>
    %101 = vector.broadcast %81 : vector<1x32xf32> to vector<128x32xf32>
    %102 = arith.mulf %100, %101 : vector<128x32xf32>
    %103 = vector.broadcast %82 : vector<1x32xf32> to vector<128x32xf32>
    %104 = arith.addf %102, %103 : vector<128x32xf32>
    %cst_74 = arith.constant dense<0.000000e+00> : vector<64x64xf32>
    %105 = tpu.matmul %80, %19, %cst_74 {dimension_numbers = #tpu.dot_dimension_numbers<[1], [0], [0], [1], [0, 0, 1, 1], [], []>} : vector<64x32xf32>, vector<32x64xf32>, vector<64x64xf32> -> vector<64x64xf32>
    %106 = vector.broadcast %20 : vector<1x64xf32> to vector<64x64xf32>
    %107 = arith.addf %105, %106 : vector<64x64xf32>
    %cst_75 = arith.constant 0.000000e+00 : f32
    %108 = vector.broadcast %cst_75 : f32 to vector<64x64xf32>
    %109 = arith.maximumf %107, %108 : vector<64x64xf32>
    %cst_76 = arith.constant dense<0.000000e+00> : vector<64x32xf32>
    %110 = tpu.matmul %109, %21, %cst_76 {dimension_numbers = #tpu.dot_dimension_numbers<[1], [0], [0], [1], [0, 0, 1, 1], [], []>} : vector<64x64xf32>, vector<64x32xf32>, vector<64x32xf32> -> vector<64x32xf32>
    %111 = arith.addf %80, %110 : vector<64x32xf32>
    %112 = vector.broadcast %22 : vector<1x32xf32> to vector<64x32xf32>
    %113 = arith.addf %111, %112 : vector<64x32xf32>
    %cst_77 = arith.constant dense<0.000000e+00> : vector<128x64xf32>
    %114 = tpu.matmul %104, %23, %cst_77 {dimension_numbers = #tpu.dot_dimension_numbers<[1], [0], [0], [1], [0, 0, 1, 1], [], []>} : vector<128x32xf32>, vector<32x64xf32>, vector<128x64xf32> -> vector<128x64xf32>
    %115 = vector.broadcast %24 : vector<1x64xf32> to vector<128x64xf32>
    %116 = arith.addf %114, %115 : vector<128x64xf32>
    %cst_78 = arith.constant 0.000000e+00 : f32
    %117 = vector.broadcast %cst_78 : f32 to vector<128x64xf32>
    %118 = arith.maximumf %116, %117 : vector<128x64xf32>
    %cst_79 = arith.constant dense<0.000000e+00> : vector<128x32xf32>
    %119 = tpu.matmul %118, %25, %cst_79 {dimension_numbers = #tpu.dot_dimension_numbers<[1], [0], [0], [1], [0, 0, 1, 1], [], []>} : vector<128x64xf32>, vector<64x32xf32>, vector<128x32xf32> -> vector<128x32xf32>
    %120 = arith.addf %104, %119 : vector<128x32xf32>
    %121 = vector.broadcast %26 : vector<1x32xf32> to vector<128x32xf32>
    %122 = arith.addf %120, %121 : vector<128x32xf32>
    %123 = vector.extract_strided_slice %18 {offsets = [4, 0], sizes = [1, 32], strides = [1, 1]} : vector<8x32xf32> to vector<1x32xf32>
    %124 = vector.extract_strided_slice %18 {offsets = [5, 0], sizes = [1, 32], strides = [1, 1]} : vector<8x32xf32> to vector<1x32xf32>
    %cst_80 = arith.constant dense<0.000000e+00> : vector<64xf32>
    %125 = vector.multi_reduction <add>, %113, %cst_80 [1] : vector<64x32xf32> to vector<64xf32>
    %126 = vector.shape_cast %125 : vector<64xf32> to vector<64x1xf32>
    %cst_81 = arith.constant 3.200000e+01 : f32
    %127 = vector.broadcast %cst_81 : f32 to vector<64x1xf32>
    %128 = arith.divf %126, %127 : vector<64x1xf32>
    %129 = vector.broadcast %128 : vector<64x1xf32> to vector<64x32xf32>
    %130 = arith.subf %113, %129 : vector<64x32xf32>
    %131 = arith.mulf %130, %130 : vector<64x32xf32>
    %cst_82 = arith.constant dense<0.000000e+00> : vector<64xf32>
    %132 = vector.multi_reduction <add>, %131, %cst_82 [1] : vector<64x32xf32> to vector<64xf32>
    %133 = vector.shape_cast %132 : vector<64xf32> to vector<64x1xf32>
    %cst_83 = arith.constant 3.200000e+01 : f32
    %134 = vector.broadcast %cst_83 : f32 to vector<64x1xf32>
    %135 = arith.divf %133, %134 : vector<64x1xf32>
    %136 = vector.broadcast %128 : vector<64x1xf32> to vector<64x32xf32>
    %137 = arith.subf %113, %136 : vector<64x32xf32>
    %cst_84 = arith.constant 9.99999974E-6 : f32
    %138 = vector.broadcast %cst_84 : f32 to vector<64x1xf32>
    %139 = arith.addf %135, %138 : vector<64x1xf32>
    %140 = math.rsqrt %139 : vector<64x1xf32>
    %141 = vector.broadcast %140 : vector<64x1xf32> to vector<64x32xf32>
    %142 = arith.mulf %137, %141 : vector<64x32xf32>
    %143 = vector.broadcast %123 : vector<1x32xf32> to vector<64x32xf32>
    %144 = arith.mulf %142, %143 : vector<64x32xf32>
    %145 = vector.broadcast %124 : vector<1x32xf32> to vector<64x32xf32>
    %146 = arith.addf %144, %145 : vector<64x32xf32>
    %147 = vector.extract_strided_slice %18 {offsets = [6, 0], sizes = [1, 32], strides = [1, 1]} : vector<8x32xf32> to vector<1x32xf32>
    %148 = vector.extract_strided_slice %18 {offsets = [7, 0], sizes = [1, 32], strides = [1, 1]} : vector<8x32xf32> to vector<1x32xf32>
    %cst_85 = arith.constant dense<0.000000e+00> : vector<128xf32>
    %149 = vector.multi_reduction <add>, %122, %cst_85 [1] : vector<128x32xf32> to vector<128xf32>
    %150 = vector.shape_cast %149 : vector<128xf32> to vector<128x1xf32>
    %cst_86 = arith.constant 3.200000e+01 : f32
    %151 = vector.broadcast %cst_86 : f32 to vector<128x1xf32>
    %152 = arith.divf %150, %151 : vector<128x1xf32>
    %153 = vector.broadcast %152 : vector<128x1xf32> to vector<128x32xf32>
    %154 = arith.subf %122, %153 : vector<128x32xf32>
    %155 = arith.mulf %154, %154 : vector<128x32xf32>
    %cst_87 = arith.constant dense<0.000000e+00> : vector<128xf32>
    %156 = vector.multi_reduction <add>, %155, %cst_87 [1] : vector<128x32xf32> to vector<128xf32>
    %157 = vector.shape_cast %156 : vector<128xf32> to vector<128x1xf32>
    %cst_88 = arith.constant 3.200000e+01 : f32
    %158 = vector.broadcast %cst_88 : f32 to vector<128x1xf32>
    %159 = arith.divf %157, %158 : vector<128x1xf32>
    %160 = vector.broadcast %152 : vector<128x1xf32> to vector<128x32xf32>
    %161 = arith.subf %122, %160 : vector<128x32xf32>
    %cst_89 = arith.constant 9.99999974E-6 : f32
    %162 = vector.broadcast %cst_89 : f32 to vector<128x1xf32>
    %163 = arith.addf %159, %162 : vector<128x1xf32>
    %164 = math.rsqrt %163 : vector<128x1xf32>
    %165 = vector.broadcast %164 : vector<128x1xf32> to vector<128x32xf32>
    %166 = arith.mulf %161, %165 : vector<128x32xf32>
    %167 = vector.broadcast %147 : vector<1x32xf32> to vector<128x32xf32>
    %168 = arith.mulf %166, %167 : vector<128x32xf32>
    %169 = vector.broadcast %148 : vector<1x32xf32> to vector<128x32xf32>
    %170 = arith.addf %168, %169 : vector<128x32xf32>
    %c0_90 = arith.constant 0 : index
    %c0_91 = arith.constant 0 : index
    %171 = vector.load %arg25[%c0_90, %c0_91] : memref<32x32xf32, #tpu.memory_space<vmem>>, vector<32x32xf32>
    %c0_92 = arith.constant 0 : index
    %c0_93 = arith.constant 0 : index
    %172 = vector.load %arg26[%c0_92, %c0_93] : memref<32x32xf32, #tpu.memory_space<vmem>>, vector<32x32xf32>
    %c0_94 = arith.constant 0 : index
    %c0_95 = arith.constant 0 : index
    %173 = vector.load %arg27[%c0_94, %c0_95] : memref<32x32xf32, #tpu.memory_space<vmem>>, vector<32x32xf32>
    %c0_96 = arith.constant 0 : index
    %c0_97 = arith.constant 0 : index
    %174 = vector.load %arg28[%c0_96, %c0_97] : memref<32x32xf32, #tpu.memory_space<vmem>>, vector<32x32xf32>
    %c0_98 = arith.constant 0 : index
    %c0_99 = arith.constant 0 : index
    %175 = vector.load %arg29[%c0_98, %c0_99] : memref<32x32xf32, #tpu.memory_space<vmem>>, vector<32x32xf32>
    %c0_100 = arith.constant 0 : index
    %c0_101 = arith.constant 0 : index
    %176 = vector.load %arg30[%c0_100, %c0_101] : memref<1x32xf32, #tpu.memory_space<vmem>>, vector<1x32xf32>
    %c0_102 = arith.constant 0 : index
    %c0_103 = arith.constant 0 : index
    %177 = vector.load %arg33[%c0_102, %c0_103] : memref<8x32xf32, #tpu.memory_space<vmem>>, vector<8x32xf32>
    %c0_104 = arith.constant 0 : index
    %c0_105 = arith.constant 0 : index
    %178 = vector.load %arg34[%c0_104, %c0_105] : memref<32x64xf32, #tpu.memory_space<vmem>>, vector<32x64xf32>
    %c0_106 = arith.constant 0 : index
    %c0_107 = arith.constant 0 : index
    %179 = vector.load %arg35[%c0_106, %c0_107] : memref<1x64xf32, #tpu.memory_space<vmem>>, vector<1x64xf32>
    %c0_108 = arith.constant 0 : index
    %c0_109 = arith.constant 0 : index
    %180 = vector.load %arg36[%c0_108, %c0_109] : memref<64x32xf32, #tpu.memory_space<vmem>>, vector<64x32xf32>
    %c0_110 = arith.constant 0 : index
    %c0_111 = arith.constant 0 : index
    %181 = vector.load %arg37[%c0_110, %c0_111] : memref<1x32xf32, #tpu.memory_space<vmem>>, vector<1x32xf32>
    %cst_112 = arith.constant dense<0.000000e+00> : vector<64x32xf32>
    %182 = tpu.matmul %146, %171, %cst_112 {dimension_numbers = #tpu.dot_dimension_numbers<[1], [0], [0], [1], [0, 0, 1, 1], [], []>} : vector<64x32xf32>, vector<32x32xf32>, vector<64x32xf32> -> vector<64x32xf32>
    %cst_113 = arith.constant dense<0.000000e+00> : vector<64x32xf32>
    %183 = tpu.matmul %146, %172, %cst_113 {dimension_numbers = #tpu.dot_dimension_numbers<[1], [0], [0], [1], [0, 0, 1, 1], [], []>} : vector<64x32xf32>, vector<32x32xf32>, vector<64x32xf32> -> vector<64x32xf32>
    %cst_114 = arith.constant dense<0.000000e+00> : vector<64x32xf32>
    %184 = tpu.matmul %146, %173, %cst_114 {dimension_numbers = #tpu.dot_dimension_numbers<[1], [0], [0], [1], [0, 0, 1, 1], [], []>} : vector<64x32xf32>, vector<32x32xf32>, vector<64x32xf32> -> vector<64x32xf32>
    %cst_115 = arith.constant dense<0.000000e+00> : vector<128x32xf32>
    %185 = tpu.matmul %170, %174, %cst_115 {dimension_numbers = #tpu.dot_dimension_numbers<[1], [0], [0], [1], [0, 0, 1, 1], [], []>} : vector<128x32xf32>, vector<32x32xf32>, vector<128x32xf32> -> vector<128x32xf32>
    %cst_116 = arith.constant dense<0.000000e+00> : vector<128x32xf32>
    %186 = tpu.matmul %3, %182, %cst_116 {dimension_numbers = #tpu.dot_dimension_numbers<[1], [0], [0], [1], [0, 0, 1, 1], [], []>} : vector<128x64xf32>, vector<64x32xf32>, vector<128x32xf32> -> vector<128x32xf32>
    %cst_117 = arith.constant dense<0.000000e+00> : vector<128x32xf32>
    %187 = tpu.matmul %5, %183, %cst_117 {dimension_numbers = #tpu.dot_dimension_numbers<[1], [0], [0], [1], [0, 0, 1, 1], [], []>} : vector<128x64xf32>, vector<64x32xf32>, vector<128x32xf32> -> vector<128x32xf32>
    %cst_118 = arith.constant dense<0.000000e+00> : vector<128x32xf32>
    %188 = tpu.matmul %5, %184, %cst_118 {dimension_numbers = #tpu.dot_dimension_numbers<[1], [0], [0], [1], [0, 0, 1, 1], [], []>} : vector<128x64xf32>, vector<64x32xf32>, vector<128x32xf32> -> vector<128x32xf32>
    %189 = arith.mulf %187, %186 : vector<128x32xf32>
    %190 = arith.mulf %189, %185 : vector<128x32xf32>
    %cst_119 = arith.constant dense<0.000000e+00> : vector<128x32xf32>
    %191 = tpu.matmul %190, %8, %cst_119 {dimension_numbers = #tpu.dot_dimension_numbers<[1], [0], [0], [1], [0, 0, 1, 1], [], []>} : vector<128x32xf32>, vector<32x32xf32>, vector<128x32xf32> -> vector<128x32xf32>
    %cst_120 = arith.constant -5.000000e+00 : f32
    %cst_121 = arith.constant 5.000000e+00 : f32
    %192 = vector.broadcast %cst_120 : f32 to vector<128x32xf32>
    %193 = arith.maximumf %192, %191 : vector<128x32xf32>
    %194 = vector.broadcast %cst_121 : f32 to vector<128x32xf32>
    %195 = arith.minimumf %194, %193 : vector<128x32xf32>
    %196 = math.exp %195 : vector<128x32xf32>
    %197 = arith.mulf %196, %188 : vector<128x32xf32>
    %cst_122 = arith.constant dense<0.000000e+00> : vector<64x32xf32>
    %198 = tpu.matmul %7, %197, %cst_122 {dimension_numbers = #tpu.dot_dimension_numbers<[1], [0], [0], [1], [0, 0, 1, 1], [], []>} : vector<64x128xf32>, vector<128x32xf32>, vector<64x32xf32> -> vector<64x32xf32>
    %cst_123 = arith.constant dense<0.000000e+00> : vector<64x32xf32>
    %199 = tpu.matmul %7, %196, %cst_123 {dimension_numbers = #tpu.dot_dimension_numbers<[1], [0], [0], [1], [0, 0, 1, 1], [], []>} : vector<64x128xf32>, vector<128x32xf32>, vector<64x32xf32> -> vector<64x32xf32>
    %cst_124 = arith.constant 9.99999997E-7 : f32
    %200 = vector.broadcast %cst_124 : f32 to vector<64x32xf32>
    %201 = arith.addf %199, %200 : vector<64x32xf32>
    %202 = tpu.reciprocal %201 {approx = true} : vector<64x32xf32> -> vector<64x32xf32>
    %203 = arith.mulf %198, %202 : vector<64x32xf32>
    %cst_125 = arith.constant dense<0.000000e+00> : vector<64x32xf32>
    %204 = tpu.matmul %203, %175, %cst_125 {dimension_numbers = #tpu.dot_dimension_numbers<[1], [0], [0], [1], [0, 0, 1, 1], [], []>} : vector<64x32xf32>, vector<32x32xf32>, vector<64x32xf32> -> vector<64x32xf32>
    %205 = arith.addf %146, %204 : vector<64x32xf32>
    %206 = vector.broadcast %176 : vector<1x32xf32> to vector<64x32xf32>
    %207 = arith.addf %205, %206 : vector<64x32xf32>
    %208 = vector.extract_strided_slice %177 {offsets = [0, 0], sizes = [1, 32], strides = [1, 1]} : vector<8x32xf32> to vector<1x32xf32>
    %209 = vector.extract_strided_slice %177 {offsets = [1, 0], sizes = [1, 32], strides = [1, 1]} : vector<8x32xf32> to vector<1x32xf32>
    %cst_126 = arith.constant dense<0.000000e+00> : vector<64xf32>
    %210 = vector.multi_reduction <add>, %207, %cst_126 [1] : vector<64x32xf32> to vector<64xf32>
    %211 = vector.shape_cast %210 : vector<64xf32> to vector<64x1xf32>
    %cst_127 = arith.constant 3.200000e+01 : f32
    %212 = vector.broadcast %cst_127 : f32 to vector<64x1xf32>
    %213 = arith.divf %211, %212 : vector<64x1xf32>
    %214 = vector.broadcast %213 : vector<64x1xf32> to vector<64x32xf32>
    %215 = arith.subf %207, %214 : vector<64x32xf32>
    %216 = arith.mulf %215, %215 : vector<64x32xf32>
    %cst_128 = arith.constant dense<0.000000e+00> : vector<64xf32>
    %217 = vector.multi_reduction <add>, %216, %cst_128 [1] : vector<64x32xf32> to vector<64xf32>
    %218 = vector.shape_cast %217 : vector<64xf32> to vector<64x1xf32>
    %cst_129 = arith.constant 3.200000e+01 : f32
    %219 = vector.broadcast %cst_129 : f32 to vector<64x1xf32>
    %220 = arith.divf %218, %219 : vector<64x1xf32>
    %221 = vector.broadcast %213 : vector<64x1xf32> to vector<64x32xf32>
    %222 = arith.subf %207, %221 : vector<64x32xf32>
    %cst_130 = arith.constant 9.99999974E-6 : f32
    %223 = vector.broadcast %cst_130 : f32 to vector<64x1xf32>
    %224 = arith.addf %220, %223 : vector<64x1xf32>
    %225 = math.rsqrt %224 : vector<64x1xf32>
    %226 = vector.broadcast %225 : vector<64x1xf32> to vector<64x32xf32>
    %227 = arith.mulf %222, %226 : vector<64x32xf32>
    %228 = vector.broadcast %208 : vector<1x32xf32> to vector<64x32xf32>
    %229 = arith.mulf %227, %228 : vector<64x32xf32>
    %230 = vector.broadcast %209 : vector<1x32xf32> to vector<64x32xf32>
    %231 = arith.addf %229, %230 : vector<64x32xf32>
    %cst_131 = arith.constant dense<0.000000e+00> : vector<64x64xf32>
    %232 = tpu.matmul %231, %178, %cst_131 {dimension_numbers = #tpu.dot_dimension_numbers<[1], [0], [0], [1], [0, 0, 1, 1], [], []>} : vector<64x32xf32>, vector<32x64xf32>, vector<64x64xf32> -> vector<64x64xf32>
    %233 = vector.broadcast %179 : vector<1x64xf32> to vector<64x64xf32>
    %234 = arith.addf %232, %233 : vector<64x64xf32>
    %cst_132 = arith.constant 0.000000e+00 : f32
    %235 = vector.broadcast %cst_132 : f32 to vector<64x64xf32>
    %236 = arith.maximumf %234, %235 : vector<64x64xf32>
    %cst_133 = arith.constant dense<0.000000e+00> : vector<64x32xf32>
    %237 = tpu.matmul %236, %180, %cst_133 {dimension_numbers = #tpu.dot_dimension_numbers<[1], [0], [0], [1], [0, 0, 1, 1], [], []>} : vector<64x64xf32>, vector<64x32xf32>, vector<64x32xf32> -> vector<64x32xf32>
    %238 = arith.addf %231, %237 : vector<64x32xf32>
    %239 = vector.broadcast %181 : vector<1x32xf32> to vector<64x32xf32>
    %240 = arith.addf %238, %239 : vector<64x32xf32>
    %241 = vector.extract_strided_slice %177 {offsets = [4, 0], sizes = [1, 32], strides = [1, 1]} : vector<8x32xf32> to vector<1x32xf32>
    %242 = vector.extract_strided_slice %177 {offsets = [5, 0], sizes = [1, 32], strides = [1, 1]} : vector<8x32xf32> to vector<1x32xf32>
    %cst_134 = arith.constant dense<0.000000e+00> : vector<64xf32>
    %243 = vector.multi_reduction <add>, %240, %cst_134 [1] : vector<64x32xf32> to vector<64xf32>
    %244 = vector.shape_cast %243 : vector<64xf32> to vector<64x1xf32>
    %cst_135 = arith.constant 3.200000e+01 : f32
    %245 = vector.broadcast %cst_135 : f32 to vector<64x1xf32>
    %246 = arith.divf %244, %245 : vector<64x1xf32>
    %247 = vector.broadcast %246 : vector<64x1xf32> to vector<64x32xf32>
    %248 = arith.subf %240, %247 : vector<64x32xf32>
    %249 = arith.mulf %248, %248 : vector<64x32xf32>
    %cst_136 = arith.constant dense<0.000000e+00> : vector<64xf32>
    %250 = vector.multi_reduction <add>, %249, %cst_136 [1] : vector<64x32xf32> to vector<64xf32>
    %251 = vector.shape_cast %250 : vector<64xf32> to vector<64x1xf32>
    %cst_137 = arith.constant 3.200000e+01 : f32
    %252 = vector.broadcast %cst_137 : f32 to vector<64x1xf32>
    %253 = arith.divf %251, %252 : vector<64x1xf32>
    %254 = vector.broadcast %246 : vector<64x1xf32> to vector<64x32xf32>
    %255 = arith.subf %240, %254 : vector<64x32xf32>
    %cst_138 = arith.constant 9.99999974E-6 : f32
    %256 = vector.broadcast %cst_138 : f32 to vector<64x1xf32>
    %257 = arith.addf %253, %256 : vector<64x1xf32>
    %258 = math.rsqrt %257 : vector<64x1xf32>
    %259 = vector.broadcast %258 : vector<64x1xf32> to vector<64x32xf32>
    %260 = arith.mulf %255, %259 : vector<64x32xf32>
    %261 = vector.broadcast %241 : vector<1x32xf32> to vector<64x32xf32>
    %262 = arith.mulf %260, %261 : vector<64x32xf32>
    %263 = vector.broadcast %242 : vector<1x32xf32> to vector<64x32xf32>
    %264 = arith.addf %262, %263 : vector<64x32xf32>
    %c0_139 = arith.constant 0 : index
    %c0_140 = arith.constant 0 : index
    %265 = vector.load %arg42[%c0_139, %c0_140] : memref<32x16xf32, #tpu.memory_space<vmem>>, vector<32x16xf32>
    %c0_141 = arith.constant 0 : index
    %c0_142 = arith.constant 0 : index
    %266 = vector.load %arg43[%c0_141, %c0_142] : memref<1x16xf32, #tpu.memory_space<vmem>>, vector<1x16xf32>
    %c0_143 = arith.constant 0 : index
    %c0_144 = arith.constant 0 : index
    %267 = vector.load %arg44[%c0_143, %c0_144] : memref<16x8xf32, #tpu.memory_space<vmem>>, vector<16x8xf32>
    %c0_145 = arith.constant 0 : index
    %c0_146 = arith.constant 0 : index
    %268 = vector.load %arg45[%c0_145, %c0_146] : memref<1x8xf32, #tpu.memory_space<vmem>>, vector<1x8xf32>
    %c0_147 = arith.constant 0 : index
    %c0_148 = arith.constant 0 : index
    %269 = vector.load %arg46[%c0_147, %c0_148] : memref<8x1xf32, #tpu.memory_space<vmem>>, vector<8x1xf32>
    %c0_149 = arith.constant 0 : index
    %c0_150 = arith.constant 0 : index
    %270 = vector.load %arg47[%c0_149, %c0_150] : memref<1x1xf32, #tpu.memory_space<vmem>>, vector<1x1xf32>
    %cst_151 = arith.constant dense<0.000000e+00> : vector<4x32xf32>
    %271 = tpu.matmul %9, %264, %cst_151 {dimension_numbers = #tpu.dot_dimension_numbers<[1], [0], [0], [1], [0, 0, 1, 1], [], []>} : vector<4x64xf32>, vector<64x32xf32>, vector<4x32xf32> -> vector<4x32xf32>
    %cst_152 = arith.constant dense<0.000000e+00> : vector<4x16xf32>
    %272 = tpu.matmul %271, %265, %cst_152 {dimension_numbers = #tpu.dot_dimension_numbers<[1], [0], [0], [1], [0, 0, 1, 1], [], []>} : vector<4x32xf32>, vector<32x16xf32>, vector<4x16xf32> -> vector<4x16xf32>
    %273 = vector.broadcast %266 : vector<1x16xf32> to vector<4x16xf32>
    %274 = arith.addf %272, %273 : vector<4x16xf32>
    %cst_153 = arith.constant 0.000000e+00 : f32
    %275 = vector.broadcast %cst_153 : f32 to vector<4x16xf32>
    %276 = arith.maximumf %274, %275 : vector<4x16xf32>
    %cst_154 = arith.constant dense<0.000000e+00> : vector<4x8xf32>
    %277 = tpu.matmul %276, %267, %cst_154 {dimension_numbers = #tpu.dot_dimension_numbers<[1], [0], [0], [1], [0, 0, 1, 1], [], []>} : vector<4x16xf32>, vector<16x8xf32>, vector<4x8xf32> -> vector<4x8xf32>
    %278 = vector.broadcast %268 : vector<1x8xf32> to vector<4x8xf32>
    %279 = arith.addf %277, %278 : vector<4x8xf32>
    %cst_155 = arith.constant 0.000000e+00 : f32
    %280 = vector.broadcast %cst_155 : f32 to vector<4x8xf32>
    %281 = arith.maximumf %279, %280 : vector<4x8xf32>
    %cst_156 = arith.constant dense<0.000000e+00> : vector<4x1xf32>
    %282 = tpu.matmul %281, %269, %cst_156 {dimension_numbers = #tpu.dot_dimension_numbers<[1], [0], [0], [1], [0, 0, 1, 1], [], []>} : vector<4x8xf32>, vector<8x1xf32>, vector<4x1xf32> -> vector<4x1xf32>
    %283 = vector.broadcast %270 : vector<1x1xf32> to vector<4x1xf32>
    %284 = arith.addf %282, %283 : vector<4x1xf32>
    %c0_157 = arith.constant 0 : index
    %c0_158 = arith.constant 0 : index
    %c0_159 = arith.constant 0 : index
    %285 = vector.load %arg48[%c0_157, %c0_158, %c0_159] : memref<1x4x1xf32, #tpu.memory_space<vmem>>, vector<1x4x1xf32>
    %286 = vector.shape_cast %285 : vector<1x4x1xf32> to vector<4x1xf32>
    %287 = vector.shape_cast %284 : vector<4x1xf32> to vector<1x4x1xf32>
    tpu.vector_store %arg48[%c0_157, %c0_158, %c0_159], %287 {strides = array<i32>} : memref<1x4x1xf32, #tpu.memory_space<vmem>>, vector<1x4x1xf32>,
    return
  }
  func.func @transform_0(%arg0: i32) -> (i32, i32) {
    %c0_i32 = arith.constant 0 : i32
    %c0_i32_0 = arith.constant 0 : i32
    return %arg0, %c0_i32 : i32, i32
  }
  func.func @transform_1(%arg0: i32) -> (i32, i32) {
    %c0_i32 = arith.constant 0 : i32
    %c0_i32_0 = arith.constant 0 : i32
    return %arg0, %c0_i32 : i32, i32
  }
  func.func @transform_2(%arg0: i32) -> (i32, i32, i32) {
    %c0_i32 = arith.constant 0 : i32
    %c0_i32_0 = arith.constant 0 : i32
    %c0_i32_1 = arith.constant 0 : i32
    return %arg0, %c0_i32, %c0_i32_0 : i32, i32, i32
  }
  func.func @transform_3(%arg0: i32) -> (i32, i32, i32) {
    %c0_i32 = arith.constant 0 : i32
    %c0_i32_0 = arith.constant 0 : i32
    %c0_i32_1 = arith.constant 0 : i32
    return %arg0, %c0_i32, %c0_i32_0 : i32, i32, i32
  }
  func.func @transform_4(%arg0: i32) -> (i32, i32, i32) {
    %c0_i32 = arith.constant 0 : i32
    %c0_i32_0 = arith.constant 0 : i32
    %c0_i32_1 = arith.constant 0 : i32
    return %arg0, %c0_i32, %c0_i32_0 : i32, i32, i32
  }
  func.func @transform_5(%arg0: i32) -> (i32, i32) {
    %c0_i32 = arith.constant 0 : i32
    %c0_i32_0 = arith.constant 0 : i32
    %c0_i32_1 = arith.constant 0 : i32
    return %c0_i32, %c0_i32_0 : i32, i32
  }
  func.func @transform_6(%arg0: i32) -> (i32, i32) {
    %c0_i32 = arith.constant 0 : i32
    %c0_i32_0 = arith.constant 0 : i32
    %c0_i32_1 = arith.constant 0 : i32
    return %c0_i32, %c0_i32_0 : i32, i32
  }
  func.func @transform_7(%arg0: i32) -> (i32, i32) {
    %c0_i32 = arith.constant 0 : i32
    %c0_i32_0 = arith.constant 0 : i32
    %c0_i32_1 = arith.constant 0 : i32
    return %c0_i32, %c0_i32_0 : i32, i32
  }
  func.func @transform_8(%arg0: i32) -> (i32, i32) {
    %c0_i32 = arith.constant 0 : i32
    %c0_i32_0 = arith.constant 0 : i32
    %c0_i32_1 = arith.constant 0 : i32
    return %c0_i32, %c0_i32_0 : i32, i32
  }
  func.func @transform_9(%arg0: i32) -> (i32, i32) {
    %c0_i32 = arith.constant 0 : i32
    %c0_i32_0 = arith.constant 0 : i32
    %c0_i32_1 = arith.constant 0 : i32
    return %c0_i32, %c0_i32_0 : i32, i32
  }
  func.func @transform_10(%arg0: i32) -> (i32, i32) {
    %c0_i32 = arith.constant 0 : i32
    %c0_i32_0 = arith.constant 0 : i32
    %c0_i32_1 = arith.constant 0 : i32
    return %c0_i32, %c0_i32_0 : i32, i32
  }
  func.func @transform_11(%arg0: i32) -> (i32, i32) {
    %c0_i32 = arith.constant 0 : i32
    %c0_i32_0 = arith.constant 0 : i32
    %c0_i32_1 = arith.constant 0 : i32
    return %c0_i32, %c0_i32_0 : i32, i32
  }
  func.func @transform_12(%arg0: i32) -> (i32, i32) {
    %c0_i32 = arith.constant 0 : i32
    %c0_i32_0 = arith.constant 0 : i32
    %c0_i32_1 = arith.constant 0 : i32
    return %c0_i32, %c0_i32_0 : i32, i32
  }
  func.func @transform_13(%arg0: i32) -> (i32, i32) {
    %c0_i32 = arith.constant 0 : i32
    %c0_i32_0 = arith.constant 0 : i32
    %c0_i32_1 = arith.constant 0 : i32
    return %c0_i32, %c0_i32_0 : i32, i32
  }
  func.func @transform_14(%arg0: i32) -> (i32, i32) {
    %c0_i32 = arith.constant 0 : i32
    %c0_i32_0 = arith.constant 0 : i32
    %c0_i32_1 = arith.constant 0 : i32
    return %c0_i32, %c0_i32_0 : i32, i32
  }
  func.func @transform_15(%arg0: i32) -> (i32, i32) {
    %c0_i32 = arith.constant 0 : i32
    %c0_i32_0 = arith.constant 0 : i32
    %c0_i32_1 = arith.constant 0 : i32
    return %c0_i32, %c0_i32_0 : i32, i32
  }
  func.func @transform_16(%arg0: i32) -> (i32, i32) {
    %c0_i32 = arith.constant 0 : i32
    %c0_i32_0 = arith.constant 0 : i32
    %c0_i32_1 = arith.constant 0 : i32
    return %c0_i32, %c0_i32_0 : i32, i32
  }
  func.func @transform_17(%arg0: i32) -> (i32, i32) {
    %c0_i32 = arith.constant 0 : i32
    %c0_i32_0 = arith.constant 0 : i32
    %c0_i32_1 = arith.constant 0 : i32
    return %c0_i32, %c0_i32_0 : i32, i32
  }
  func.func @transform_18(%arg0: i32) -> (i32, i32) {
    %c0_i32 = arith.constant 0 : i32
    %c0_i32_0 = arith.constant 0 : i32
    %c0_i32_1 = arith.constant 0 : i32
    return %c0_i32, %c0_i32_0 : i32, i32
  }
  func.func @transform_19(%arg0: i32) -> (i32, i32) {
    %c0_i32 = arith.constant 0 : i32
    %c0_i32_0 = arith.constant 0 : i32
    %c0_i32_1 = arith.constant 0 : i32
    return %c0_i32, %c0_i32_0 : i32, i32
  }
  func.func @transform_20(%arg0: i32) -> (i32, i32) {
    %c0_i32 = arith.constant 0 : i32
    %c0_i32_0 = arith.constant 0 : i32
    %c0_i32_1 = arith.constant 0 : i32
    return %c0_i32, %c0_i32_0 : i32, i32
  }
  func.func @transform_21(%arg0: i32) -> (i32, i32) {
    %c0_i32 = arith.constant 0 : i32
    %c0_i32_0 = arith.constant 0 : i32
    %c0_i32_1 = arith.constant 0 : i32
    return %c0_i32, %c0_i32_0 : i32, i32
  }
  func.func @transform_22(%arg0: i32) -> (i32, i32) {
    %c0_i32 = arith.constant 0 : i32
    %c0_i32_0 = arith.constant 0 : i32
    %c0_i32_1 = arith.constant 0 : i32
    return %c0_i32, %c0_i32_0 : i32, i32
  }
  func.func @transform_23(%arg0: i32) -> (i32, i32) {
    %c0_i32 = arith.constant 0 : i32
    %c0_i32_0 = arith.constant 0 : i32
    %c0_i32_1 = arith.constant 0 : i32
    return %c0_i32, %c0_i32_0 : i32, i32
  }
  func.func @transform_24(%arg0: i32) -> (i32, i32) {
    %c0_i32 = arith.constant 0 : i32
    %c0_i32_0 = arith.constant 0 : i32
    %c0_i32_1 = arith.constant 0 : i32
    return %c0_i32, %c0_i32_0 : i32, i32
  }
  func.func @transform_25(%arg0: i32) -> (i32, i32) {
    %c0_i32 = arith.constant 0 : i32
    %c0_i32_0 = arith.constant 0 : i32
    %c0_i32_1 = arith.constant 0 : i32
    return %c0_i32, %c0_i32_0 : i32, i32
  }
  func.func @transform_26(%arg0: i32) -> (i32, i32) {
    %c0_i32 = arith.constant 0 : i32
    %c0_i32_0 = arith.constant 0 : i32
    %c0_i32_1 = arith.constant 0 : i32
    return %c0_i32, %c0_i32_0 : i32, i32
  }
  func.func @transform_27(%arg0: i32) -> (i32, i32) {
    %c0_i32 = arith.constant 0 : i32
    %c0_i32_0 = arith.constant 0 : i32
    %c0_i32_1 = arith.constant 0 : i32
    return %c0_i32, %c0_i32_0 : i32, i32
  }
  func.func @transform_28(%arg0: i32) -> (i32, i32) {
    %c0_i32 = arith.constant 0 : i32
    %c0_i32_0 = arith.constant 0 : i32
    %c0_i32_1 = arith.constant 0 : i32
    return %c0_i32, %c0_i32_0 : i32, i32
  }
  func.func @transform_29(%arg0: i32) -> (i32, i32) {
    %c0_i32 = arith.constant 0 : i32
    %c0_i32_0 = arith.constant 0 : i32
    %c0_i32_1 = arith.constant 0 : i32
    return %c0_i32, %c0_i32_0 : i32, i32
  }
  func.func @transform_30(%arg0: i32) -> (i32, i32) {
    %c0_i32 = arith.constant 0 : i32
    %c0_i32_0 = arith.constant 0 : i32
    %c0_i32_1 = arith.constant 0 : i32
    return %c0_i32, %c0_i32_0 : i32, i32
  }
  func.func @transform_31(%arg0: i32) -> (i32, i32) {
    %c0_i32 = arith.constant 0 : i32
    %c0_i32_0 = arith.constant 0 : i32
    %c0_i32_1 = arith.constant 0 : i32
    return %c0_i32, %c0_i32_0 : i32, i32
  }
  func.func @transform_32(%arg0: i32) -> (i32, i32) {
    %c0_i32 = arith.constant 0 : i32
    %c0_i32_0 = arith.constant 0 : i32
    %c0_i32_1 = arith.constant 0 : i32
    return %c0_i32, %c0_i32_0 : i32, i32
  }
  func.func @transform_33(%arg0: i32) -> (i32, i32) {
    %c0_i32 = arith.constant 0 : i32
    %c0_i32_0 = arith.constant 0 : i32
    %c0_i32_1 = arith.constant 0 : i32
    return %c0_i32, %c0_i32_0 : i32, i32
  }
  func.func @transform_34(%arg0: i32) -> (i32, i32) {
    %c0_i32 = arith.constant 0 : i32
    %c0_i32_0 = arith.constant 0 : i32
    %c0_i32_1 = arith.constant 0 : i32
    return %c0_i32, %c0_i32_0 : i32, i32
  }
  func.func @transform_35(%arg0: i32) -> (i32, i32) {
    %c0_i32 = arith.constant 0 : i32
    %c0_i32_0 = arith.constant 0 : i32
    %c0_i32_1 = arith.constant 0 : i32
    return %c0_i32, %c0_i32_0 : i32, i32
  }
  func.func @transform_36(%arg0: i32) -> (i32, i32) {
    %c0_i32 = arith.constant 0 : i32
    %c0_i32_0 = arith.constant 0 : i32
    %c0_i32_1 = arith.constant 0 : i32
    return %c0_i32, %c0_i32_0 : i32, i32
  }
  func.func @transform_37(%arg0: i32) -> (i32, i32) {
    %c0_i32 = arith.constant 0 : i32
    %c0_i32_0 = arith.constant 0 : i32
    %c0_i32_1 = arith.constant 0 : i32
    return %c0_i32, %c0_i32_0 : i32, i32
  }
  func.func @transform_38(%arg0: i32) -> (i32, i32) {
    %c0_i32 = arith.constant 0 : i32
    %c0_i32_0 = arith.constant 0 : i32
    %c0_i32_1 = arith.constant 0 : i32
    return %c0_i32, %c0_i32_0 : i32, i32
  }
  func.func @transform_39(%arg0: i32) -> (i32, i32) {
    %c0_i32 = arith.constant 0 : i32
    %c0_i32_0 = arith.constant 0 : i32
    %c0_i32_1 = arith.constant 0 : i32
    return %c0_i32, %c0_i32_0 : i32, i32
  }
  func.func @transform_40(%arg0: i32) -> (i32, i32) {
    %c0_i32 = arith.constant 0 : i32
    %c0_i32_0 = arith.constant 0 : i32
    %c0_i32_1 = arith.constant 0 : i32
    return %c0_i32, %c0_i32_0 : i32, i32
  }
  func.func @transform_41(%arg0: i32) -> (i32, i32) {
    %c0_i32 = arith.constant 0 : i32
    %c0_i32_0 = arith.constant 0 : i32
    %c0_i32_1 = arith.constant 0 : i32
    return %c0_i32, %c0_i32_0 : i32, i32
  }
  func.func @transform_42(%arg0: i32) -> (i32, i32) {
    %c0_i32 = arith.constant 0 : i32
    %c0_i32_0 = arith.constant 0 : i32
    %c0_i32_1 = arith.constant 0 : i32
    return %c0_i32, %c0_i32_0 : i32, i32
  }
  func.func @transform_43(%arg0: i32) -> (i32, i32) {
    %c0_i32 = arith.constant 0 : i32
    %c0_i32_0 = arith.constant 0 : i32
    %c0_i32_1 = arith.constant 0 : i32
    return %c0_i32, %c0_i32_0 : i32, i32
  }
  func.func @transform_44(%arg0: i32) -> (i32, i32) {
    %c0_i32 = arith.constant 0 : i32
    %c0_i32_0 = arith.constant 0 : i32
    %c0_i32_1 = arith.constant 0 : i32
    return %c0_i32, %c0_i32_0 : i32, i32
  }
  func.func @transform_45(%arg0: i32) -> (i32, i32) {
    %c0_i32 = arith.constant 0 : i32
    %c0_i32_0 = arith.constant 0 : i32
    %c0_i32_1 = arith.constant 0 : i32
    return %c0_i32, %c0_i32_0 : i32, i32
  }
  func.func @transform_46(%arg0: i32) -> (i32, i32) {
    %c0_i32 = arith.constant 0 : i32
    %c0_i32_0 = arith.constant 0 : i32
    %c0_i32_1 = arith.constant 0 : i32
    return %c0_i32, %c0_i32_0 : i32, i32
  }
  func.func @transform_47(%arg0: i32) -> (i32, i32, i32) {
    %c0_i32 = arith.constant 0 : i32
    %c0_i32_0 = arith.constant 0 : i32
    %c0_i32_1 = arith.constant 0 : i32
    return %arg0, %c0_i32, %c0_i32_0 : i32, i32, i32
  }
}

</mosaic_0001>

<bundles_post_ra>
// kernel: graph_transformer_forward.1
= control target key start
LH: loop header
LB: loop body
LE: loop exit
PB: predicated region body
PF: predicated region fallthrough
CT: control target
= control target key end

     0   :  { %s9967_s6 = smov 1   ;;  %s9968_s10 = smov 2   ;;  %s12058_s0 = inlined_call_operand.smem [shape: u32[48], index: -1, kind: input, shape index: {}] }
   0x1   :  { %s10018_s5 = sld [smem:[%s12058_s0]]   ;;  %s9969_s14 = smov 3  }
   0x2   :  { %s10023_s9 = sld [smem:[%s12058_s0 + %s9967_s6]]   ;;  %s9970_s18 = smov 4  }
   0x3   :  { %s10028_s13 = sld [smem:[%s12058_s0 + %s9968_s10]]   ;;  %s9971_s22 = smov 5  }
   0x4   :  { %s10033_s17 = sld [smem:[%s12058_s0 + %s9969_s14]]   ;;  %s9972_s26 = smov 6  }
   0x5   :  { %s10038_s21 = sld [smem:[%s12058_s0 + %s9970_s18]]   ;;  %s9973_s30 = smov 7  }
   0x6   :  { %s10043_s25 = sld [smem:[%s12058_s0 + %s9971_s22]]   ;;  %s9974_s4 = smov 8  }
   0x7   :  { %s10048_s29 = sld [smem:[%s12058_s0 + %s9972_s26]]   ;;  %s9975_s10 = smov 9  }
   0x8   :  { %s10053_s3 = sld [smem:[%s12058_s0 + %s9973_s30]]   ;;  %s9976_s15 = smov 10  }
   0x9   :  { %s10058_s8 = sld [smem:[%s12058_s0 + %s9974_s4]]   ;;  %s9977_s20 = smov 11  }
   0xa   :  { %s10063_s14 = sld [smem:[%s12058_s0 + %s9975_s10]]   ;;  %s9978_s26 = smov 12  }
   0xb   :  { %s10068_s19 = sld [smem:[%s12058_s0 + %s9976_s15]]   ;;  %s9979_s1 = smov 13  }
   0xc   :  { %s10073_s24 = sld [smem:[%s12058_s0 + %s9977_s20]]   ;;  %s9980_s7 = smov 14  }
   0xd   :  { %12077 = sst [smem:[#allocation3_spill]] %s10048_s29  ;;  %s9981_s15 = smov 15  }
   0xe   :  { %s10078_s30 = sld [smem:[%s12058_s0 + %s9978_s26]]   ;;  %s9982_s22 = smov 16  }
   0xf   :  { %s10083_s6 = sld [smem:[%s12058_s0 + %s9979_s1]]   ;;  %s9983_s28 = smov 17  }
  0x10   :  { %s10088_s12 = sld [smem:[%s12058_s0 + %s9980_s7]]   ;;  %s9984_s7 = smov 18  }
  0x11   :  { %s10093_s20 = sld [smem:[%s12058_s0 + %s9981_s15]]   ;;  %s9985_s15 = smov 19  }
  0x12   :  { %s10098_s27 = sld [smem:[%s12058_s0 + %s9982_s22]]   ;;  %s9986_s22 = smov 20  }
  0x13   :  { %s10103_s4 = sld [smem:[%s12058_s0 + %s9983_s28]]   ;;  %s9987_s28 = smov 21  }
  0x14   :  { %s10108_s29 = sld [smem:[%s12058_s0 + %s9984_s7]]   ;;  %s9988_s7 = smov 22  }
  0x15   :  { %s10007_s1 = smov 47  }
  0x17   :  { %12078 = sst [smem:[#allocation4_spill]] %s10093_s20 }
  0x18   :  { %12079 = sst [smem:[#allocation5_spill]] %s10098_s27 }
  0x19   :  { %12080 = sst [smem:[#allocation6_spill]] %s10103_s4 }
  0x1a   :  { %12081 = sst [smem:[#allocation7_spill]] %s10108_s29 }
  0x1b   :  { %s10113_s20 = sld [smem:[%s12058_s0 + %s9985_s15]]   ;;  %s9989_s15 = smov 23  }
  0x1c   :  { %s10118_s27 = sld [smem:[%s12058_s0 + %s9986_s22]]   ;;  %s9990_s22 = smov 24  }
  0x1d   :  { %s10123_s4 = sld [smem:[%s12058_s0 + %s9987_s28]]   ;;  %s9991_s28 = smov 25  }
  0x1e   :  { %s10128_s29 = sld [smem:[%s12058_s0 + %s9988_s7]]   ;;  %s9992_s7 = smov 26  }
  0x21   :  { %12082 = sst [smem:[#allocation8_spill]] %s10113_s20 }
  0x22   :  { %12083 = sst [smem:[#allocation9_spill]] %s10118_s27 }
  0x23   :  { %12084 = sst [smem:[#allocation10_spill]] %s10123_s4 }
  0x24   :  { %12085 = sst [smem:[#allocation11_spill]] %s10128_s29 }
  0x25   :  { %s10133_s20 = sld [smem:[%s12058_s0 + %s9989_s15]]   ;;  %s9993_s15 = smov 27  }
  0x26   :  { %s10138_s27 = sld [smem:[%s12058_s0 + %s9990_s22]]   ;;  %s9994_s22 = smov 28  }
  0x27   :  { %s10143_s4 = sld [smem:[%s12058_s0 + %s9991_s28]]   ;;  %s9995_s28 = smov 29  }
  0x28   :  { %s10148_s29 = sld [smem:[%s12058_s0 + %s9992_s7]]   ;;  %s9996_s7 = smov 32  }
  0x2b   :  { %12086 = sst [smem:[#allocation12_spill]] %s10133_s20 }
  0x2c   :  { %12087 = sst [smem:[#allocation13_spill]] %s10138_s27 }
  0x2d   :  { %12088 = sst [smem:[#allocation14_spill]] %s10143_s4 }
  0x2e   :  { %12089 = sst [smem:[#allocation15_spill]] %s10148_s29 }
  0x2f   :  { %s10153_s20 = sld [smem:[%s12058_s0 + %s9993_s15]]   ;;  %s9997_s15 = smov 33  }
  0x30   :  { %s10158_s27 = sld [smem:[%s12058_s0 + %s9994_s22]]   ;;  %s9998_s22 = smov 34  }
  0x31   :  { %s10163_s4 = sld [smem:[%s12058_s0 + %s9995_s28]]   ;;  %s9999_s28 = smov 35  }
  0x32   :  { %s10168_s29 = sld [smem:[%s12058_s0 + %s9996_s7]]   ;;  %s10000_s7 = smov 36  }
  0x35   :  { %12090 = sst [smem:[#allocation16_spill]] %s10153_s20 }
  0x36   :  { %12091 = sst [smem:[#allocation17_spill]] %s10158_s27 }
  0x37   :  { %12092 = sst [smem:[#allocation18_spill]] %s10163_s4 }
  0x38   :  { %12093 = sst [smem:[#allocation19_spill]] %s10168_s29 }
  0x39   :  { %s10173_s20 = sld [smem:[%s12058_s0 + %s9997_s15]]   ;;  %s10001_s15 = smov 41  }
  0x3a   :  { %s10178_s27 = sld [smem:[%s12058_s0 + %s9998_s22]]   ;;  %s10002_s22 = smov 42  }
  0x3b   :  { %s10183_s4 = sld [smem:[%s12058_s0 + %s9999_s28]]   ;;  %s10003_s28 = smov 43  }
  0x3c   :  { %s10188_s29 = sld [smem:[%s12058_s0 + %s10000_s7]]   ;;  %s10004_s7 = smov 44  }
  0x3f   :  { %12094 = sst [smem:[#allocation20_spill]] %s10173_s20 }
  0x40   :  { %12095 = sst [smem:[#allocation21_spill]] %s10178_s27 }
  0x41   :  { %12096 = sst [smem:[#allocation22_spill]] %s10183_s4 }
  0x42   :  { %12097 = sst [smem:[#allocation23_spill]] %s10188_s29 }
  0x43   :  { %s10193_s20 = sld [smem:[%s12058_s0 + %s10001_s15]]   ;;  %s10005_s15 = smov 45  }
  0x44   :  { %s10198_s27 = sld [smem:[%s12058_s0 + %s10002_s22]]   ;;  %s10006_s22 = smov 46  }
  0x45   :  { %s10203_s4 = sld [smem:[%s12058_s0 + %s10003_s28]]  }
  0x46   :  { %s10208_s29 = sld [smem:[%s12058_s0 + %s10004_s7]]   ;;  %s10223_s7 = smov 0  }
  0x49   :  { %12098 = sst [smem:[#allocation24_spill]] %s10193_s20 }
  0x4a   :  { %12099 = sst [smem:[#allocation25_spill]] %s10198_s27 }
  0x4b   :  { %12100 = sst [smem:[#allocation26_spill]] %s10203_s4 }
  0x4c   :  { %s10213_s20 = sld [smem:[%s12058_s0 + %s10005_s15]]  }
  0x4d   :  { %s7739_s27 = sld [smem:[%s12058_s0 + %s10006_s22]]  }
  0x4e   :  { %s10221_s4 = sld [smem:[%s12058_s0 + %s10007_s1]]  }
  0x53   :  { %v100_v0 = vstv %s7739_s27 }
  0x54   :  { %101 = vst [vmem:[#allocation2] sm:$0x1] %v100_v0 }
  0x55 LB: > { %s10229_s10 = sadd.s32 4294967295, %s9965_s7   ;;  %p7745_p0 = scmp.ge.s32.totalorder %s9965_s7, 1  ;;  %s9965_s7 = sphi %s10223_s7, %s107_s7  }
  0x56   : > { %p1329_p1 = scmp.lt.s32.totalorder %s9965_s7, 3 }
  0x58   : > { %p1330_p2 = pnand %p7745_p0, %p1329_p1 }
  0x59   : > { %s7746_s0 = sshll.u32 (!%p1330_p2), %s10229_s10, 3  ;;  %s7748_s11 = sshll.u32 (!%p1330_p2), %s10229_s10, 4 }
  0x5a   : > { %1333 = sbr.rel (%p1330_p2) target bundleno = 5164 (0x142c), region = 208  ;;  %p1461_p3 = scmp.lt.s32.totalorder (!%p1330_p2), %s7746_s0, 15 }
  0x5b   : > { %p1467_p4 = scmp.lt.s32.totalorder (!%p1330_p2), %s7748_s11, 31  ;;  %p1472_p5 = scmp.lt.s32.totalorder (!%p1330_p2), %s10229_s10, 1 }
  0x5c   : > { %s12101_s2 = sld [smem:[#allocation5_spill]] (!%p1330_p2) }
  0x5f   : > { %v1563_v1 = vld [vmem:[%s10053_s3 + $0x18] sm:$0xff]  ;;  %v1562_v3 = vld [vmem:[%s10053_s3 + $0x10] sm:$0xff]  ;;  %v1561_v5 = vld [vmem:[%s10053_s3 + $0x8] sm:$0xff]  ;;  %s12126_s0 = smov (!%p1461_p3, %s7746_s0), 15  ;;  %vm1615_vm0 = vcmask 261120   ;;  %s12128_s11 = smov (!%p1467_p4, %s7748_s11), 31 }
  0x60   : > { %v1567_v2 = vld [vmem:[%s10058_s8 + $0x18] sm:$0xff]  ;;  %8669 = vmatprep.subr.mxu0 %v1563_v1  ;;  %v1566_v4 = vld [vmem:[%s10058_s8 + $0x10] sm:$0xff]  ;;  %v1565_v6 = vld [vmem:[%s10058_s8 + $0x8] sm:$0xff]  ;;  %s7747_s27 = sshll.u32 %s12126_s0, 3  ;;  %s7749_s16 = sshll.u32 %s12128_s11, 3  ;;  %vm2148_vm1 = vcmask 523264  }
  0x61   : > { %8689 = vmatprep.subr.mxu1 %v1567_v2  ;;  %8670 = vmatpush3.msra.mxu0 %v1563_v1  ;;  %v1560_v7 = vld [vmem:[%s10053_s3] sm:$0xff]  ;;  %s10244_s15 = scalar_lea.vmem %s10018_s5, %s7747_s27  ;;  %v1571_v12 = vld [vmem:[%s10063_s14 + $0x18] sm:$0xff]  ;;  %v1570_v16 = vld [vmem:[%s10063_s14 + $0x10] sm:$0xff]  ;;  %s10275_s18 = scalar_lea.vmem %s10023_s9, %s7749_s16  ;;  %vm10009_vm2 = vmmov 0   ;;  %vm7442_vm3 = vcmask 130048   ;;  %vm7523_vm4 = vcmask 64512  }
  0x62   : > { %8690 = vmatpush3.msra.mxu1 %v1567_v2  ;;  %8671 = vmatprep.subr.mxu0 %v1562_v3  ;;  %v1564_v8 = vld [vmem:[%s10058_s8] sm:$0xff]  ;;  %v1492_v10 = vld [vmem:[%s10244_s15 + $0x8] sm:$0xff]  ;;  %v1493_v11 = vld [vmem:[%s10244_s15 + $0x10] sm:$0xff]  ;;  %s12130_s10 = smov (!%p1472_p5, %s10229_s10), 1  ;;  %s12102_s0 = sld [smem:[#allocation4_spill]]  ;;  %vm7597_vm5 = vcmask 3072  }
  0x63   : > { %8691 = vmatprep.subr.mxu1 %v1566_v4  ;;  %8672 = vmatpush3.msra.mxu0 %v1562_v3  ;;  %v1491_v9 = vld [vmem:[%s10244_s15] sm:$0xff]  ;;  %v1575_v13 = vld [vmem:[%s10068_s19 + $0x18] sm:$0xff]  ;;  %v1574_v17 = vld [vmem:[%s10068_s19 + $0x10] sm:$0xff]  ;;  %s8111_s22 = sshll.u32 %s12130_s10, 7  ;;  %s8113_s1 = sshll.u32 %s12130_s10, 6 }
  0x64   : > { %8692 = vmatpush3.msra.mxu1 %v1566_v4  ;;  %8673 = vmatprep.subr.mxu0 %v1561_v5  ;;  %v1494_v14 = vld [vmem:[%s10244_s15 + $0x18] sm:$0xff]  ;;  %v1495_v15 = vld [vmem:[%s10244_s15 + $0x20] sm:$0xff]  ;;  %v1496_v18 = vld [vmem:[%s10244_s15 + $0x28] sm:$0xff]  ;;  %s10327_s23 = scalar_lea.vmem %s10028_s13, %s8111_s22  ;;  %s10330_s26 = scalar_lea.vmem %s10033_s17, %s8111_s22 }
  0x65   : > { %8693 = vmatprep.subr.mxu1 %v1565_v6  ;;  %8674 = vmatpush3.msra.mxu0 %v1561_v5  ;;  %v1497_v19 = vld [vmem:[%s10244_s15 + $0x30] sm:$0xff]  ;;  %v1569_v20 = vld [vmem:[%s10063_s14 + $0x8] sm:$0xff]  ;;  %v1498_v22 = vld [vmem:[%s10244_s15 + $0x38] sm:$0xff]  ;;  %s10536_s28 = scalar_lea.vmem %s10038_s21, %s8113_s1  ;;  %s12103_s27 = sld [smem:[#allocation9_spill]] }
  0x66   : > { %8694 = vmatpush3.msra.mxu1 %v1565_v6  ;;  %8675 = vmatprep.subr.mxu0 %v1560_v7  ;;  %v1573_v21 = vld [vmem:[%s10068_s19 + $0x8] sm:$0xff]  ;;  %v1568_v23 = vld [vmem:[%s10063_s14] sm:$0xff]  ;;  %v1501_v27 = vld [vmem:[%s10275_s18 + $0x10] sm:$0xff]  ;;  %s12104_s11 = sld [smem:[#allocation7_spill]] }
  0x67   : > { %8695 = vmatprep.subr.mxu1 %v1564_v8  ;;  %8676 = vmatpush3.msra.mxu0 %v1560_v7  ;;  %v1572_v24 = vld [vmem:[%s10068_s19] sm:$0xff]  ;;  %v1500_v26 = vld [vmem:[%s10275_s18 + $0x8] sm:$0xff]  ;;  %v1502_v28 = vld [vmem:[%s10275_s18 + $0x18] sm:$0xff]  ;;  %s12106_s16 = sld [smem:[#allocation6_spill]] }
  0x68   : > { %8677 = vmatprep.mubr.msk.f32.mxu0 %vm1615_vm0, %v1491_v9  ;;  %8696 = vmatpush3.msra.mxu1 %v1564_v8  ;;  %v1499_v25 = vld [vmem:[%s10275_s18] sm:$0xff]  ;;  %v1504_v30 = vld [vmem:[%s10275_s18 + $0x28] sm:$0xff]  ;;  %v1505_v31 = vld [vmem:[%s10275_s18 + $0x30] sm:$0xff]  ;;  %s12108_s22 = sld [smem:[#allocation8_spill]] }
  0x69   : > { %8697 = vmatprep.mubr.msk.f32.mxu1 %vm1615_vm0, %v1491_v9  ;;  %8678 = vmatmul.mubr.msk.f32.vlgmr.msra.gmra.mxu0 %vm1615_vm0, %v1492_v10  ;;  %v1503_v29 = vld [vmem:[%s10275_s18 + $0x20] sm:$0xff]  ;;  %v1506_v32 = vld [vmem:[%s10275_s18 + $0x38] sm:$0xff]  ;;  %v1508_v34 = vld [vmem:[%s10275_s18 + $0x48] sm:$0xff]  ;;  %s12109_s1 = sld [smem:[#allocation12_spill]] }
  0x6a   : > { %8698 = vmatmul.mubr.msk.f32.vlgmr.msra.gmra.mxu1 %vm1615_vm0, %v1492_v10  ;;  %8680 = vmatprep.mubr.msk.f32.mxu0 %vm1615_vm0, %v1493_v11  ;;  %v1507_v33 = vld [vmem:[%s10275_s18 + $0x40] sm:$0xff]  ;;  %v1509_v35 = vld [vmem:[%s10275_s18 + $0x50] sm:$0xff]  ;;  %v1510_v36 = vld [vmem:[%s10275_s18 + $0x58] sm:$0xff] }
  0x6b   : > { %8700 = vmatprep.mubr.msk.f32.mxu1 %vm1615_vm0, %v1493_v11  ;;  %8709 = vmatprep.subr.mxu0 %v1571_v12  ;;  %v1511_v37 = vld [vmem:[%s10275_s18 + $0x60] sm:$0xff]  ;;  %v1512_v38 = vld [vmem:[%s10275_s18 + $0x68] sm:$0xff]  ;;  %v1513_v39 = vld [vmem:[%s10275_s18 + $0x70] sm:$0xff] }
  0x6c   : > { %8729 = vmatprep.subr.mxu1 %v1575_v13  ;;  %8710 = vmatpush3.msra.mxu0 %v1571_v12  ;;  %v1514_v40 = vld [vmem:[%s10275_s18 + $0x78] sm:$0xff]  ;;  %v1515_v41 = vld [vmem:[%s10327_s23] sm:$0xff]  ;;  %v1516_v0 = vld [vmem:[%s10327_s23 + $0x8] sm:$0xff] }
  0x6d   : > { %8730 = vmatpush3.msra.mxu1 %v1575_v13  ;;  %8681 = vmatmul.mubr.msk.f32.gmra.mxu0 %vm1615_vm0, %v1494_v14  ;;  %v10334_v42 = vld [vmem:[%s10330_s26] sm:$0xff]  ;;  %v10349_v1 = vld [vmem:[%s10330_s26 + $0x8] sm:$0xff]  ;;  %v1517_v3 = vld [vmem:[%s10327_s23 + $0x10] sm:$0xff] }
  0x6e   : > { %8701 = vmatmul.mubr.msk.f32.gmra.mxu1 %vm1615_vm0, %v1494_v14  ;;  %8683 = vmatprep.mubr.msk.f32.mxu0 %vm1615_vm0, %v1495_v15  ;;  %v10353_v4 = vld [vmem:[%s10330_s26 + $0x10] sm:$0xff]  ;;  %v1558_v6 = vld [vmem:[%s10043_s25 + $0x18] sm:$0xff]  ;;  %v1520_v12 = vld [vmem:[%s10327_s23 + $0x28] sm:$0xff] }
  0x6f   : > { %8703 = vmatprep.mubr.msk.f32.mxu1 %vm1615_vm0, %v1495_v15  ;;  %8711 = vmatprep.subr.mxu0 %v1570_v16  ;;  %v1518_v7 = vld [vmem:[%s10327_s23 + $0x18] sm:$0xff]  ;;  %v1536_v13 = vld [vmem:[%s10330_s26 + $0x28] sm:$0xff] }
  0x70   : > { %8731 = vmatprep.subr.mxu1 %v1574_v17  ;;  %8712 = vmatpush3.msra.mxu0 %v1570_v16  ;;  %v10364_v8 = vld [vmem:[%s10330_s26 + $0x18] sm:$0xff] }
  0x71   : > { %8732 = vmatpush3.msra.mxu1 %v1574_v17  ;;  %8684 = vmatmul.mubr.msk.f32.gmra.mxu0 %vm1615_vm0, %v1496_v18  ;;  %v1522_v16 = vld [vmem:[%s10327_s23 + $0x38] sm:$0xff] }
  0x72   : > { %8704 = vmatmul.mubr.msk.f32.gmra.mxu1 %vm1615_vm0, %v1496_v18  ;;  %8686 = vmatprep.mubr.msk.f32.mxu0 %vm1615_vm0, %v1497_v19  ;;  %v1538_v17 = vld [vmem:[%s10330_s26 + $0x38] sm:$0xff] }
  0x73   : > { %8706 = vmatprep.mubr.msk.f32.mxu1 %vm1615_vm0, %v1497_v19  ;;  %8713 = vmatprep.subr.mxu0 %v1569_v20 }
  0x74   : > { %8733 = vmatprep.subr.mxu1 %v1573_v21  ;;  %8714 = vmatpush3.msra.mxu0 %v1569_v20  ;;  %v1524_v20 = vld [vmem:[%s10327_s23 + $0x48] sm:$0xff] }
  0x75   : > { %8734 = vmatpush3.msra.mxu1 %v1573_v21  ;;  %8687 = vmatmul.mubr.msk.f32.gmra.mxu0 %vm1615_vm0, %v1498_v22  ;;  %v1540_v21 = vld [vmem:[%s10330_s26 + $0x48] sm:$0xff] }
  0x76   : > { %8707 = vmatmul.mubr.msk.f32.gmra.mxu1 %vm1615_vm0, %v1498_v22  ;;  %8715 = vmatprep.subr.mxu0 %v1568_v23 }
  0x77   : > { %8717 = vmatprep.mubr.msk.f32.mxu0 %vm1615_vm0, %v1491_v9  ;;  %8716 = vmatpush3.msra.mxu0 %v1568_v23  ;;  %v1519_v9 = vld [vmem:[%s10327_s23 + $0x20] sm:$0xff]  ;;  %v1541_v23 = vld [vmem:[%s10330_s26 + $0x50] sm:$0xff] }
  0x78   : > { %8735 = vmatprep.subr.mxu1 %v1572_v24  ;;  %8737 = vmatprep.mubr.msk.f32.mxu1 %vm1615_vm0, %v1499_v25  ;;  %v1542_v25 = vld [vmem:[%s10330_s26 + $0x58] sm:$0xff] }
  0x79   : > { %8736 = vmatpush3.msra.mxu1 %v1572_v24  ;;  %8718 = vmatmul.mubr.msk.f32.vlgmr.msra.gmra.mxu0 %vm1615_vm0, %v1492_v10  ;;  %v10368_v10 = vld [vmem:[%s10330_s26 + $0x20] sm:$0xff]  ;;  %v1526_v24 = vld [vmem:[%s10327_s23 + $0x58] sm:$0xff] }
  0x7a   : > { %8738 = vmatmul.mubr.msk.f32.vlgmr.msra.gmra.mxu1 %vm1615_vm0, %v1500_v26  ;;  %8720 = vmatprep.mubr.msk.f32.mxu0 %vm1615_vm0, %v1493_v11  ;;  %v1527_v26 = vld [vmem:[%s10327_s23 + $0x60] sm:$0xff] }
  0x7b   : > { %8740 = vmatprep.mubr.msk.f32.mxu1 %vm1615_vm0, %v1501_v27  ;;  %v1543_v27 = vld [vmem:[%s10330_s26 + $0x60] sm:$0xff] }
  0x7d   : > { %8721 = vmatmul.mubr.msk.f32.gmra.mxu0 %vm1615_vm0, %v1494_v14  ;;  %v1521_v14 = vld [vmem:[%s10327_s23 + $0x30] sm:$0xff] }
  0x7e   : > { %8741 = vmatmul.mubr.msk.f32.gmra.mxu1 %vm1615_vm0, %v1502_v28  ;;  %8723 = vmatprep.mubr.msk.f32.mxu0 %vm1615_vm0, %v1495_v15  ;;  %v1537_v15 = vld [vmem:[%s10330_s26 + $0x30] sm:$0xff]  ;;  %v1528_v28 = vld [vmem:[%s10327_s23 + $0x68] sm:$0xff] }
  0x7f   : > { %8743 = vmatprep.mubr.msk.f32.mxu1 %vm1615_vm0, %v1503_v29  ;;  %v1544_v29 = vld [vmem:[%s10330_s26 + $0x68] sm:$0xff] }
  0x81   : > { %8724 = vmatmul.mubr.msk.f32.gmra.mxu0 %vm1615_vm0, %v1496_v18  ;;  %v1523_v18 = vld [vmem:[%s10327_s23 + $0x40] sm:$0xff] }
  0x82   : > { %8726 = vmatprep.mubr.msk.f32.mxu0 %vm1615_vm0, %v1497_v19  ;;  %8744 = vmatmul.mubr.msk.f32.gmra.mxu1 %vm1615_vm0, %v1504_v30  ;;  %v1539_v19 = vld [vmem:[%s10330_s26 + $0x40] sm:$0xff]  ;;  %v1529_v30 = vld [vmem:[%s10327_s23 + $0x70] sm:$0xff] }
  0x83   : > { %8746 = vmatprep.mubr.msk.f32.mxu1 %vm1615_vm0, %v1505_v31  ;;  %v1545_v31 = vld [vmem:[%s10330_s26 + $0x70] sm:$0xff] }
  0x85   : > { %8727 = vmatmul.mubr.msk.f32.gmra.mxu0 %vm1615_vm0, %v1498_v22  ;;  %v1525_v22 = vld [vmem:[%s10327_s23 + $0x50] sm:$0xff] }
  0x86   : > { %8747 = vmatmul.mubr.msk.f32.gmra.mxu1 %vm1615_vm0, %v1506_v32  ;;  %8777 = vmatprep.mubr.msk.f32.mxu0 %vm2148_vm1, %v1515_v41  ;;  %v1530_v32 = vld [vmem:[%s10327_s23 + $0x78] sm:$0xff] }
  0x87   : > { %8749 = vmatprep.mubr.msk.f32.mxu1 %vm1615_vm0, %v1507_v33  ;;  %v1546_v33 = vld [vmem:[%s10330_s26 + $0x78] sm:$0xff] }
  0x8a   : > { %8750 = vmatmul.mubr.msk.f32.gmra.mxu1 %vm1615_vm0, %v1508_v34  ;;  %v1557_v34 = vld [vmem:[%s10043_s25 + $0x10] sm:$0xff] }
  0x8b   : > { %8752 = vmatprep.mubr.msk.f32.mxu1 %vm1615_vm0, %v1509_v35  ;;  %v1556_v35 = vld [vmem:[%s10043_s25 + $0x8] sm:$0xff] }
  0x8e   : > { %8753 = vmatmul.mubr.msk.f32.gmra.mxu1 %vm1615_vm0, %v1510_v36  ;;  %v1555_v36 = vld [vmem:[%s10043_s25] sm:$0xff] }
  0x8f   : > { %8755 = vmatprep.mubr.msk.f32.mxu1 %vm1615_vm0, %v1511_v37 }
  0x92   : > { %8756 = vmatmul.mubr.msk.f32.gmra.mxu1 %vm1615_vm0, %v1512_v38 }
  0x93   : > { %8758 = vmatprep.mubr.msk.f32.mxu1 %vm1615_vm0, %v1513_v39 }
  0x96   : > { %8759 = vmatmul.mubr.msk.f32.gmra.mxu1 %vm1615_vm0, %v1514_v40 }
  0x97   : > { %8817 = vmatprep.mubr.msk.f32.mxu1 %vm2148_vm1, %v10334_v42 }
 0x129   : > { %v8679_v43 = vpop.f32.mrf.mxu0 }
 0x12a   : > { %v8699_v44 = vpop.f32.mrf.mxu1 }
 0x12b   : > { %v1706_v45 = vpop.f32.mrf.mxu0 }
 0x12c   : > { %v1811_v46 = vpop.f32.mrf.mxu1 }
 0x12d   : > { %v8682_v47 = vpop.f32.mrf.mxu0 }
 0x12e   : > { %v8702_v48 = vpop.f32.mrf.mxu1 }
 0x12f   : > { %v1716_v49 = vpop.f32.mrf.mxu0 }
 0x130   : > { %v1821_v50 = vpop.f32.mrf.mxu1 }
 0x131   : > { %v8685_v51 = vpop.f32.mrf.mxu0 }
 0x132   : > { %v8705_v52 = vpop.f32.mrf.mxu1 }
 0x133   : > { %v1726_v53 = vpop.f32.mrf.mxu0 }
 0x134   : > { %v1831_v54 = vpop.f32.mrf.mxu1 }
 0x135   : > { %v8688_v55 = vpop.f32.mrf.mxu0 }
 0x136   : > { %v8708_v56 = vpop.f32.mrf.mxu1  ;;  %8761 = vmatprep.subr.mxu0 %v8688_v55 }
 0x137   : > { %8801 = vmatprep.subr.mxu1 %v8708_v56  ;;  %v1736_v57 = vpop.f32.mrf.mxu0  ;;  %8762 = vmatpush3.msra.mxu0 %v8688_v55 }
 0x138   : > { %v1841_v58 = vpop.f32.mrf.mxu1  ;;  %8802 = vmatpush3.msra.mxu1 %v8708_v56  ;;  %8763 = vmatprep.subr.mxu0 %v1736_v57 }
 0x139   : > { %8803 = vmatprep.subr.mxu1 %v1841_v58  ;;  %8764 = vmatpush3.msra.mxu0 %v1736_v57  ;;  %v10339_v59 = vpop.f32.mrf.mxu0 }
 0x13a   : > { %8804 = vmatpush3.msra.mxu1 %v1841_v58  ;;  %8765 = vmatprep.subr.mxu0 %v8685_v51  ;;  %v8739_v37 = vpop.f32.mrf.mxu1 }
 0x13b   : > { %8805 = vmatprep.subr.mxu1 %v8705_v52  ;;  %8766 = vmatpush3.msra.mxu0 %v8685_v51  ;;  %v10341_v60 = vpop.f32.mrf.mxu0 }
 0x13c   : > { %8806 = vmatpush3.msra.mxu1 %v8705_v52  ;;  %8767 = vmatprep.subr.mxu0 %v1726_v53  ;;  %v2069_v38 = vpop.f32.mrf.mxu1 }
 0x13d   : > { %8807 = vmatprep.subr.mxu1 %v1831_v54  ;;  %8768 = vmatpush3.msra.mxu0 %v1726_v53  ;;  %v10343_v61 = vpop.f32.mrf.mxu0 }
 0x13e   : > { %8808 = vmatpush3.msra.mxu1 %v1831_v54  ;;  %8769 = vmatprep.subr.mxu0 %v8682_v47  ;;  %v8742_v39 = vpop.f32.mrf.mxu1 }
 0x13f   : > { %8809 = vmatprep.subr.mxu1 %v8702_v48  ;;  %8770 = vmatpush3.msra.mxu0 %v8682_v47  ;;  %v10345_v62 = vpop.f32.mrf.mxu0 }
 0x140   : > { %8810 = vmatpush3.msra.mxu1 %v8702_v48  ;;  %8771 = vmatprep.subr.mxu0 %v1716_v49  ;;  %v2079_v40 = vpop.f32.mrf.mxu1 }
 0x141   : > { %8811 = vmatprep.subr.mxu1 %v1821_v50  ;;  %8772 = vmatpush3.msra.mxu0 %v1716_v49  ;;  %v8725_v63 = vpop.f32.mrf.mxu0 }
 0x142   : > { %8812 = vmatpush3.msra.mxu1 %v1821_v50  ;;  %8773 = vmatprep.subr.mxu0 %v8679_v43  ;;  %v8745_v41 = vpop.f32.mrf.mxu1 }
 0x143   : > { %8813 = vmatprep.subr.mxu1 %v8699_v44  ;;  %8774 = vmatpush3.msra.mxu0 %v8679_v43  ;;  %v1936_v2 = vpop.f32.mrf.mxu0 }
 0x144   : > { %8814 = vmatpush3.msra.mxu1 %v8699_v44  ;;  %8775 = vmatprep.subr.mxu0 %v1706_v45 }
 0x145   : > { %8815 = vmatprep.subr.mxu1 %v1811_v46  ;;  %8776 = vmatpush3.msra.mxu0 %v1706_v45  ;;  %v8728_v5 = vpop.f32.mrf.mxu0 }
 0x146   : > { %8816 = vmatpush3.msra.mxu1 %v1811_v46  ;;  %8778 = vmatmul.mubr.msk.f32.vlgmr.msra.gmra.mxu0 %vm2148_vm1, %v1516_v0 }
 0x147   : > { %8818 = vmatmul.mubr.msk.f32.vlgmr.msra.gmra.mxu1 %vm2148_vm1, %v10349_v1  ;;  %8780 = vmatprep.mubr.msk.f32.mxu0 %vm2148_vm1, %v1517_v3  ;;  %v1946_v11 = vpop.f32.mrf.mxu0 }
 0x148   : > { %8820 = vmatprep.mubr.msk.f32.mxu1 %vm2148_vm1, %v10353_v4  ;;  %8841 = vmatprep.subr.mxu0 %v8728_v5 }
 0x149   : > { %8881 = vmatprep.subr.mxu1 %v1558_v6  ;;  %8842 = vmatpush3.msra.mxu0 %v8728_v5 }
 0x14a   : > { %8882 = vmatpush3.msra.mxu1 %v1558_v6  ;;  %8781 = vmatmul.mubr.msk.f32.gmra.mxu0 %vm2148_vm1, %v1518_v7 }
 0x14b   : > { %8821 = vmatmul.mubr.msk.f32.gmra.mxu1 %vm2148_vm1, %v10364_v8  ;;  %8783 = vmatprep.mubr.msk.f32.mxu0 %vm2148_vm1, %v1519_v9 }
 0x14c   : > { %8823 = vmatprep.mubr.msk.f32.mxu1 %vm2148_vm1, %v10368_v10  ;;  %8843 = vmatprep.subr.mxu0 %v1946_v11 }
 0x14d   : > { %8844 = vmatpush3.msra.mxu0 %v1946_v11  ;;  %8883 = vmatprep.subr.mxu1 %v1557_v34 }
 0x14e   : > { %8784 = vmatmul.mubr.msk.f32.gmra.mxu0 %vm2148_vm1, %v1520_v12  ;;  %8845 = vmatprep.subr.mxu0 %v8725_v63 }
 0x14f   : > { %8824 = vmatmul.mubr.msk.f32.gmra.mxu1 %vm2148_vm1, %v1536_v13  ;;  %8786 = vmatprep.mubr.msk.f32.mxu0 %vm2148_vm1, %v1521_v14 }
 0x150   : > { %8826 = vmatprep.mubr.msk.f32.mxu1 %vm2148_vm1, %v1537_v15  ;;  %8846 = vmatpush3.msra.mxu0 %v8725_v63 }
 0x151   : > { %8847 = vmatprep.subr.mxu0 %v1936_v2  ;;  %8884 = vmatpush3.msra.mxu1 %v1557_v34 }
 0x152   : > { %8787 = vmatmul.mubr.msk.f32.gmra.mxu0 %vm2148_vm1, %v1522_v16  ;;  %8885 = vmatprep.subr.mxu1 %v1556_v35 }
 0x153   : > { %8827 = vmatmul.mubr.msk.f32.gmra.mxu1 %vm2148_vm1, %v1538_v17  ;;  %8789 = vmatprep.mubr.msk.f32.mxu0 %vm2148_vm1, %v1523_v18 }
 0x154   : > { %8829 = vmatprep.mubr.msk.f32.mxu1 %vm2148_vm1, %v1539_v19  ;;  %8848 = vmatpush3.msra.mxu0 %v1936_v2 }
 0x155   : > { %8849 = vmatprep.subr.mxu0 %v10343_v61  ;;  %8886 = vmatpush3.msra.mxu1 %v1556_v35 }
 0x156   : > { %8790 = vmatmul.mubr.msk.f32.gmra.mxu0 %vm2148_vm1, %v1524_v20  ;;  %8887 = vmatprep.subr.mxu1 %v1555_v36 }
 0x157   : > { %8830 = vmatmul.mubr.msk.f32.gmra.mxu1 %vm2148_vm1, %v1540_v21  ;;  %8792 = vmatprep.mubr.msk.f32.mxu0 %vm2148_vm1, %v1525_v22 }
 0x158   : > { %8832 = vmatprep.mubr.msk.f32.mxu1 %vm2148_vm1, %v1541_v23  ;;  %8850 = vmatpush3.msra.mxu0 %v10343_v61 }
 0x159   : > { %8851 = vmatprep.subr.mxu0 %v10345_v62  ;;  %8888 = vmatpush3.msra.mxu1 %v1555_v36 }
 0x15a   : > { %8793 = vmatmul.mubr.msk.f32.gmra.mxu0 %vm2148_vm1, %v1526_v24 }
 0x15b   : > { %8833 = vmatmul.mubr.msk.f32.gmra.mxu1 %vm2148_vm1, %v1542_v25  ;;  %8795 = vmatprep.mubr.msk.f32.mxu0 %vm2148_vm1, %v1527_v26 }
 0x15c   : > { %8835 = vmatprep.mubr.msk.f32.mxu1 %vm2148_vm1, %v1543_v27  ;;  %8852 = vmatpush3.msra.mxu0 %v10345_v62 }
 0x15d   : > { %8853 = vmatprep.subr.mxu0 %v10339_v59 }
 0x15e   : > { %8796 = vmatmul.mubr.msk.f32.gmra.mxu0 %vm2148_vm1, %v1528_v28 }
 0x15f   : > { %8836 = vmatmul.mubr.msk.f32.gmra.mxu1 %vm2148_vm1, %v1544_v29  ;;  %8798 = vmatprep.mubr.msk.f32.mxu0 %vm2148_vm1, %v1529_v30 }
 0x160   : > { %8838 = vmatprep.mubr.msk.f32.mxu1 %vm2148_vm1, %v1545_v31  ;;  %8854 = vmatpush3.msra.mxu0 %v10339_v59 }
 0x161   : > { %8855 = vmatprep.subr.mxu0 %v10341_v60 }
 0x162   : > { %8799 = vmatmul.mubr.msk.f32.gmra.mxu0 %vm2148_vm1, %v1530_v32 }
 0x163   : > { %8839 = vmatmul.mubr.msk.f32.gmra.mxu1 %vm2148_vm1, %v1546_v33  ;;  %8857 = vmatprep.mubr.msk.f32.mxu0 %vm2148_vm1, %v10334_v42  ;;  %v2089_v42 = vpop.f32.mrf.mxu1 }
 0x164   : > { %8856 = vmatpush3.msra.mxu0 %v10341_v60 }
 0x165   : > { %v8748_v43 = vpop.f32.mrf.mxu1 }
 0x166   : > { %8858 = vmatmul.mubr.msk.f32.vlgmr.msra.gmra.mxu0 %vm2148_vm1, %v10349_v1 }
 0x167   : > { %8860 = vmatprep.mubr.msk.f32.mxu0 %vm2148_vm1, %v10353_v4  ;;  %v2099_v44 = vpop.f32.mrf.mxu1 }
 0x169   : > { %v8751_v45 = vpop.f32.mrf.mxu1 }
 0x16a   : > { %8861 = vmatmul.mubr.msk.f32.gmra.mxu0 %vm2148_vm1, %v10364_v8 }
 0x16b   : > { %8863 = vmatprep.mubr.msk.f32.mxu0 %vm2148_vm1, %v10368_v10  ;;  %v2109_v46 = vpop.f32.mrf.mxu1 }
 0x16d   : > { %v10452_v47 = vpop.f32.mrf.mxu1 }
 0x16e   : > { %8864 = vmatmul.mubr.msk.f32.gmra.mxu0 %vm2148_vm1, %v1536_v13 }
 0x16f   : > { %8866 = vmatprep.mubr.msk.f32.mxu0 %vm2148_vm1, %v1537_v15  ;;  %v10454_v48 = vpop.f32.mrf.mxu1 }
 0x171   : > { %v10456_v49 = vpop.f32.mrf.mxu1 }
 0x172   : > { %8867 = vmatmul.mubr.msk.f32.gmra.mxu0 %vm2148_vm1, %v1538_v17 }
 0x173   : > { %8869 = vmatprep.mubr.msk.f32.mxu0 %vm2148_vm1, %v1539_v19  ;;  %v10458_v50 = vpop.f32.mrf.mxu1 }
 0x175   : > { %v10460_v51 = vpop.f32.mrf.mxu1 }
 0x176   : > { %8870 = vmatmul.mubr.msk.f32.gmra.mxu0 %vm2148_vm1, %v1540_v21 }
 0x177   : > { %8872 = vmatprep.mubr.msk.f32.mxu0 %vm2148_vm1, %v1541_v23  ;;  %v10462_v52 = vpop.f32.mrf.mxu1 }
 0x17a   : > { %8873 = vmatmul.mubr.msk.f32.gmra.mxu0 %vm2148_vm1, %v1542_v25 }
 0x17b   : > { %8875 = vmatprep.mubr.msk.f32.mxu0 %vm2148_vm1, %v1543_v27 }
 0x17e   : > { %8876 = vmatmul.mubr.msk.f32.gmra.mxu0 %vm2148_vm1, %v1544_v29 }
 0x17f   : > { %8878 = vmatprep.mubr.msk.f32.mxu0 %vm2148_vm1, %v1545_v31 }
 0x182   : > { %8879 = vmatmul.mubr.msk.f32.gmra.mxu0 %vm2148_vm1, %v1546_v33 }
 0x206   : > { %v8779_v53 = vpop.f32.mrf.mxu0 }
 0x207   : > { %v8819_v54 = vpop.f32.mrf.mxu1 }
 0x208   : > { %v2681_v55 = vmul.f32 %v8819_v54, %v8779_v53  ;;  %v2263_v56 = vpop.f32.mrf.mxu0 }
 0x209   : > { %v2456_v57 = vpop.f32.mrf.mxu1 }
 0x20a   : > { %v2680_v58 = vmul.f32 %v2456_v57, %v2263_v56  ;;  %v8782_v59 = vpop.f32.mrf.mxu0  ;;  %v10466_v62 = vmul.f32 %v8739_v37, %v2681_v55 }
 0x20b   : > { %v8822_v60 = vpop.f32.mrf.mxu1 }
 0x20c   : > { %v10464_v61 = vmul.f32 %v2680_v58, %v2069_v38  ;;  %v2683_v63 = vmul.f32 %v8822_v60, %v8782_v59  ;;  %v2273_v0 = vpop.f32.mrf.mxu0 }
 0x20d   : > { %v2466_v1 = vpop.f32.mrf.mxu1 }
 0x20e   : > { %v2682_v2 = vmul.f32 %v2466_v1, %v2273_v0  ;;  %8889 = vmatprep.mubr.msk.f32.mxu1 %vm1615_vm0, %v10464_v61  ;;  %v8785_v3 = vpop.f32.mrf.mxu0  ;;  %v10474_v6 = vmul.f32 %v8742_v39, %v2683_v63 }
 0x20f   : > { %v8825_v4 = vpop.f32.mrf.mxu1  ;;  %8890 = vmatmul.mubr.msk.f32.vlgmr.msra.gmra.mxu1 %vm1615_vm0, %v10466_v62 }
 0x210   : > { %v10472_v5 = vmul.f32 %v2682_v2, %v2079_v40  ;;  %v2685_v7 = vmul.f32 %v8825_v4, %v8785_v3  ;;  %v2283_v8 = vpop.f32.mrf.mxu0 }
 0x211   : > { %v2476_v9 = vpop.f32.mrf.mxu1 }
 0x212   : > { %v2684_v10 = vmul.f32 %v2476_v9, %v2283_v8  ;;  %8892 = vmatprep.mubr.msk.f32.mxu1 %vm1615_vm0, %v10472_v5  ;;  %v8788_v11 = vpop.f32.mrf.mxu0  ;;  %v10482_v14 = vmul.f32 %v8745_v41, %v2685_v7 }
 0x213   : > { %v8828_v12 = vpop.f32.mrf.mxu1  ;;  %8893 = vmatmul.mubr.msk.f32.gmra.mxu1 %vm1615_vm0, %v10474_v6 }
 0x214   : > { %v10480_v13 = vmul.f32 %v2684_v10, %v2089_v42  ;;  %v2687_v15 = vmul.f32 %v8828_v12, %v8788_v11  ;;  %v2293_v16 = vpop.f32.mrf.mxu0 }
 0x215   : > { %v2486_v17 = vpop.f32.mrf.mxu1 }
 0x216   : > { %v2686_v18 = vmul.f32 %v2486_v17, %v2293_v16  ;;  %8895 = vmatprep.mubr.msk.f32.mxu1 %vm1615_vm0, %v10480_v13  ;;  %v8791_v19 = vpop.f32.mrf.mxu0  ;;  %v10490_v22 = vmul.f32 %v8748_v43, %v2687_v15 }
 0x217   : > { %v8831_v20 = vpop.f32.mrf.mxu1  ;;  %8896 = vmatmul.mubr.msk.f32.gmra.mxu1 %vm1615_vm0, %v10482_v14 }
 0x218   : > { %v10488_v21 = vmul.f32 %v2686_v18, %v2099_v44  ;;  %v2689_v23 = vmul.f32 %v8831_v20, %v8791_v19  ;;  %v2303_v24 = vpop.f32.mrf.mxu0 }
 0x219   : > { %v2496_v25 = vpop.f32.mrf.mxu1 }
 0x21a   : > { %v2688_v26 = vmul.f32 %v2496_v25, %v2303_v24  ;;  %8898 = vmatprep.mubr.msk.f32.mxu1 %vm1615_vm0, %v10488_v21  ;;  %v8794_v27 = vpop.f32.mrf.mxu0  ;;  %v10498_v30 = vmul.f32 %v8751_v45, %v2689_v23 }
 0x21b   : > { %v8834_v28 = vpop.f32.mrf.mxu1  ;;  %8899 = vmatmul.mubr.msk.f32.gmra.mxu1 %vm1615_vm0, %v10490_v22 }
 0x21c   : > { %v10496_v29 = vmul.f32 %v2688_v26, %v2109_v46  ;;  %v2691_v31 = vmul.f32 %v8834_v28, %v8794_v27  ;;  %v2313_v32 = vpop.f32.mrf.mxu0 }
 0x21d   : > { %v2506_v33 = vpop.f32.mrf.mxu1 }
 0x21e   : > { %v2690_v34 = vmul.f32 %v2506_v33, %v2313_v32  ;;  %8901 = vmatprep.mubr.msk.f32.mxu1 %vm1615_vm0, %v10496_v29  ;;  %v8797_v35 = vpop.f32.mrf.mxu0  ;;  %v10508_v38 = vmul.f32 %v10452_v47, %v2691_v31 }
 0x21f   : > { %v8837_v36 = vpop.f32.mrf.mxu1  ;;  %8902 = vmatmul.mubr.msk.f32.gmra.mxu1 %vm1615_vm0, %v10498_v30 }
 0x220   : > { %v10505_v37 = vmul.f32 %v2690_v34, %v10454_v48  ;;  %v2693_v39 = vmul.f32 %v8837_v36, %v8797_v35  ;;  %v2323_v40 = vpop.f32.mrf.mxu0 }
 0x221   : > { %v2516_v41 = vpop.f32.mrf.mxu1 }
 0x222   : > { %v2692_v42 = vmul.f32 %v2516_v41, %v2323_v40  ;;  %8904 = vmatprep.mubr.msk.f32.mxu1 %vm1615_vm0, %v10505_v37  ;;  %v8800_v43 = vpop.f32.mrf.mxu0  ;;  %v10518_v46 = vmul.f32 %v10456_v49, %v2693_v39  ;;  %v1547_v49 = vld [vmem:[%s10536_s28] sm:$0xff] }
 0x223   : > { %v8840_v44 = vpop.f32.mrf.mxu1  ;;  %8905 = vmatmul.mubr.msk.f32.gmra.mxu1 %vm1615_vm0, %v10508_v38  ;;  %8945 = vmatprep.mubr.f32.mxu0 %v1547_v49 }
 0x224   : > { %v10515_v45 = vmul.f32 %v2692_v42, %v10458_v50  ;;  %v2695_v47 = vmul.f32 %v8840_v44, %v8800_v43  ;;  %v2333_v48 = vpop.f32.mrf.mxu0 }
 0x225   : > { %v2526_v53 = vpop.f32.mrf.mxu1 }
 0x226   : > { %v2694_v54 = vmul.f32 %v2526_v53, %v2333_v48  ;;  %8907 = vmatprep.mubr.msk.f32.mxu1 %vm1615_vm0, %v10515_v45  ;;  %v10528_v56 = vmul.f32 %v10460_v51, %v2695_v47  ;;  %v10539_v50 = vpop.f32.mrf.mxu0 }
 0x227   : > { %8908 = vmatmul.mubr.msk.f32.gmra.mxu1 %vm1615_vm0, %v10518_v46 }
 0x228   : > { %v10525_v55 = vmul.f32 %v2694_v54, %v10462_v52  ;;  %v10541_v52 = vpop.f32.mrf.mxu0 }
 0x22a   : > { %8910 = vmatprep.mubr.msk.f32.mxu1 %vm1615_vm0, %v10525_v55  ;;  %v10543_v57 = vpop.f32.mrf.mxu0 }
 0x22b   : > { %8911 = vmatmul.mubr.msk.f32.gmra.mxu1 %vm1615_vm0, %v10528_v56 }
 0x22c   : > { %8989 = vmatprep.mubr.f32.mxu1 %v1547_v49  ;;  %v10545_v51 = vpop.f32.mrf.mxu0 }
 0x22e   : > { %v10551_v60 = vpop.f32.mrf.mxu0 }
 0x230   : > { %v10557_v1 = vpop.f32.mrf.mxu0 }
 0x232   : > { %v10559_v4 = vpop.f32.mrf.mxu0 }
 0x234   : > { %v10561_v9 = vpop.f32.mrf.mxu0 }
 0x236   : > { %v10563_v12 = vpop.f32.mrf.mxu0 }
 0x238   : > { %v10565_v17 = vpop.f32.mrf.mxu0 }
 0x23a   : > { %v10567_v23 = vpop.f32.mrf.mxu0 }
 0x23c   : > { %v10569_v31 = vpop.f32.mrf.mxu0 }
 0x23e   : > { %v8877_v40 = vpop.f32.mrf.mxu0 }
 0x240   : > { %v2661_v47 = vpop.f32.mrf.mxu0 }
 0x2cf   : > { %v10547_v58 = vpop.f32.mrf.mxu1 }
 0x2d1   : > { %v10549_v59 = vpop.f32.mrf.mxu1 }
 0x2d3   : > { %v10553_v63 = vpop.f32.mrf.mxu1 }
 0x2d5   : > { %v10555_v0 = vpop.f32.mrf.mxu1 }
 0x2d7   : > { %v8897_v2 = vpop.f32.mrf.mxu1 }
 0x2d9   : > { %v2846_v3 = vpop.f32.mrf.mxu1 }
 0x2db   : > { %v8900_v7 = vpop.f32.mrf.mxu1 }
 0x2dc   : > { %v7868_v48 = vclamps-f32 %v8900_v7, 5.0 }
 0x2dd   : > { %v2856_v8 = vpop.f32.mrf.mxu1 }
 0x2de   : > { %v7867_v54 = vclamps-f32 %v2856_v8, 5.0  ;;  %v7863_v8 = vclamps-f32 %v10555_v0, 5.0  ;;  %v7861_v0 = vclamps-f32 %v10549_v59, 5.0 }
 0x2df   : > { %v8903_v10 = vpop.f32.mrf.mxu1 }
 0x2e0   : > { %v7870_v41 = vclamps-f32 %v8903_v10, 5.0 }
 0x2e1   : > { %v2866_v11 = vpop.f32.mrf.mxu1 }
 0x2e2   : > { %v7869_v43 = vclamps-f32 %v2866_v11, 5.0  ;;  %v2955_v53 = vmul.f32 1.442695, %v7870_v41  ;;  %v7864_v11 = vclamps-f32 %v10553_v63, 5.0 }
 0x2e3   : > { %v8906_v15 = vpop.f32.mrf.mxu1 }
 0x2e4   : > { %v7872_v32 = vclamps-f32 %v8906_v15, 5.0  ;;  %v2953_v49 = vmul.f32 1.442695, %v7869_v43  ;;  %v8880_v15 = vpop.f32.mrf.mxu0 }
 0x2e5   : > { %v2876_v16 = vpop.f32.mrf.mxu1 }
 0x2e6   : > { %v7871_v35 = vclamps-f32 %v2876_v16, 5.0  ;;  %v2959_v42 = vmul.f32 1.442695, %v7872_v32  ;;  %v7866_v16 = vclamps-f32 %v8897_v2, 5.0  ;;  %v7862_v32 = vclamps-f32 %v10547_v58, 5.0 }
 0x2e7   : > { %v8909_v18 = vpop.f32.mrf.mxu1 }
 0x2e8   : > { %v7874_v19 = vclamps-f32 %v8909_v18, 5.0  ;;  %v2957_v44 = vmul.f32 1.442695, %v7871_v35  ;;  %v2951_v18 = vmul.f32 1.442695, %v7868_v48 }
 0x2e9   : > { %v2886_v20 = vpop.f32.mrf.mxu1  ;;  %v2941_v35 = vmul.f32 1.442695, %v7863_v8  ;;  %v2939_v41 = vmul.f32 1.442695, %v7862_v32 }
 0x2ea   : > { %v7873_v25 = vclamps-f32 %v2886_v20, 5.0  ;;  %v2963_v27 = vmul.f32 1.442695, %v7874_v19  ;;  %v7865_v19 = vclamps-f32 %v2846_v3, 5.0  ;;  %v2949_v20 = vmul.f32 1.442695, %v7867_v54 }
 0x2eb   : > { %v8912_v24 = vpop.f32.mrf.mxu1 }
 0x2ec   : > { %v7876_v26 = vclamps-f32 %v8912_v24, 5.0  ;;  %v2961_v36 = vmul.f32 1.442695, %v7873_v25  ;;  %v2671_v24 = vpop.f32.mrf.mxu0 }
 0x2ed   : > { %v2896_v28 = vpop.f32.mrf.mxu1 }
 0x2ee   : > { %v2967_v33 = vmul.f32 1.442695, %v7876_v26  ;;  %v7875_v34 = vclamps-f32 %v2896_v28, 5.0  ;;  %v2947_v26 = vmul.f32 1.442695, %v7866_v16 }
 0x2ef   : > { %v2945_v28 = vmul.f32 1.442695, %v7865_v19 }
 0x2f0   : > { %9666 = vpow2.f32 %v2967_v33  ;;  %v2965_v39 = vmul.f32 1.442695, %v7875_v34  ;;  %v2943_v33 = vmul.f32 1.442695, %v7864_v11  ;;  %v1578_v11 = vld [vmem:[%s10073_s24 + $0x10] sm:$0xff] }
 0x2f1   : > { %9668 = vpow2.f32 %v2963_v27 }
 0x2f2   : > { %9670 = vpow2.f32 %v2965_v39 }
 0x2f3   : > { %9672 = vpow2.f32 %v2961_v36 }
 0x2f4   : > { %9674 = vpow2.f32 %v2959_v42  ;;  %v2937_v42 = vmul.f32 1.442695, %v7861_v0 }
 0x2f5   : > { %9676 = vpow2.f32 %v2957_v44 }
 0x2f6   : > { %9678 = vpow2.f32 %v2955_v53 }
 0x2f7   : > { %9680 = vpow2.f32 %v2953_v49 }
 0x2f8   : > { %9682 = vpow2.f32 %v2951_v18 }
 0x2f9   : > { %9684 = vpow2.f32 %v2949_v20  ;;  %v1551_v20 = vld [vmem:[%s10536_s28 + $0x20] sm:$0xff] }
 0x2fa   : > { %9686 = vpow2.f32 %v2947_v26  ;;  %v1577_v26 = vld [vmem:[%s10073_s24 + $0x8] sm:$0xff] }
 0x2fb   : > { %9688 = vpow2.f32 %v2945_v28 }
 0x2fc   : > { %9690 = vpow2.f32 %v2943_v33 }
 0x2fd   : > { %v9667_v10 = vpop.eup %9666  ;;  %9692 = vpow2.f32 %v2941_v35 }
 0x2fe   : > { %v9669_v25 = vpop.eup %9668  ;;  %v2984_v7 = vmul.f32 %v9667_v10, %v8880_v15  ;;  %8957 = vmatprep.subr.mxu1 %v9667_v10  ;;  %9694 = vpow2.f32 %v2939_v41 }
 0x2ff   : > { %v9671_v27 = vpop.eup %9670  ;;  %8958 = vmatpush3.msra.mxu1 %v9667_v10  ;;  %v2982_v63 = vmul.f32 %v9669_v25, %v8877_v40  ;;  %9696 = vpow2.f32 %v2937_v42  ;;  %v1553_v10 = vld [vmem:[%s10536_s28 + $0x30] sm:$0xff] }
 0x300   : > { %v2983_v2 = vmul.f32 %v9671_v27, %v2671_v24  ;;  %8913 = vmatprep.subr.mxu0 %v2984_v7  ;;  %8959 = vmatprep.subr.mxu1 %v9671_v27  ;;  %v9673_v3 = vpop.eup %9672  ;;  %v1554_v24 = vld [vmem:[%s10536_s28 + $0x38] sm:$0xff] }
 0x301   : > { %8914 = vmatpush3.msra.mxu0 %v2984_v7  ;;  %8960 = vmatpush3.msra.mxu1 %v9671_v27  ;;  %v9675_v34 = vpop.eup %9674  ;;  %v2981_v36 = vmul.f32 %v9673_v3, %v2661_v47  ;;  %v1576_v7 = vld [vmem:[%s10073_s24] sm:$0xff]  ;;  %v1584_v27 = vld [vmem:[%s10083_s6 + $0x18] sm:$0xff] }
 0x302   : > { %8915 = vmatprep.subr.mxu0 %v2983_v2  ;;  %8961 = vmatprep.subr.mxu1 %v9669_v25  ;;  %v9677_v39 = vpop.eup %9676  ;;  %v2980_v58 = vmul.f32 %v9675_v34, %v10567_v23 }
 0x303   : > { %8916 = vmatpush3.msra.mxu0 %v2983_v2  ;;  %8962 = vmatpush3.msra.mxu1 %v9669_v25  ;;  %v9679_v40 = vpop.eup %9678  ;;  %v2979_v59 = vmul.f32 %v9677_v39, %v10569_v31  ;;  %v1579_v25 = vld [vmem:[%s10073_s24 + $0x18] sm:$0xff] }
 0x304   : > { %8917 = vmatprep.subr.mxu0 %v2982_v63  ;;  %8963 = vmatprep.subr.mxu1 %v9673_v3  ;;  %v9681_v43 = vpop.eup %9680  ;;  %v2978_v44 = vmul.f32 %v9679_v40, %v10563_v12 }
 0x305   : > { %8918 = vmatpush3.msra.mxu0 %v2982_v63  ;;  %8964 = vmatpush3.msra.mxu1 %v9673_v3  ;;  %v9683_v23 = vpop.eup %9682  ;;  %v2977_v47 = vmul.f32 %v9681_v43, %v10565_v17 }
 0x306   : > { %8919 = vmatprep.subr.mxu0 %v2981_v36  ;;  %8965 = vmatprep.subr.mxu1 %v9675_v34  ;;  %v9685_v48 = vpop.eup %9684  ;;  %v2976_v31 = vmul.f32 %v9683_v23, %v10559_v4 }
 0x307   : > { %8920 = vmatpush3.msra.mxu0 %v2981_v36  ;;  %8966 = vmatpush3.msra.mxu1 %v9675_v34  ;;  %v9687_v53 = vpop.eup %9686  ;;  %v2975_v12 = vmul.f32 %v9685_v48, %v10561_v9 }
 0x308   : > { %8921 = vmatprep.subr.mxu0 %v2980_v58  ;;  %8967 = vmatprep.subr.mxu1 %v9677_v39  ;;  %v9689_v54 = vpop.eup %9688  ;;  %v2974_v17 = vmul.f32 %v9687_v53, %v10551_v60 }
 0x309   : > { %8922 = vmatpush3.msra.mxu0 %v2980_v58  ;;  %8968 = vmatpush3.msra.mxu1 %v9677_v39  ;;  %v9691_v49 = vpop.eup %9690  ;;  %v2973_v4 = vmul.f32 %v9689_v54, %v10557_v1 }
 0x30a   : > { %8923 = vmatprep.subr.mxu0 %v2979_v59  ;;  %8969 = vmatprep.subr.mxu1 %v9679_v40  ;;  %v9693_v15 = vpop.eup %9692  ;;  %v2972_v9 = vmul.f32 %v9691_v49, %v10543_v57  ;;  %v1548_v57 = vld [vmem:[%s10536_s28 + $0x8] sm:$0xff] }
 0x30b   : > { %8924 = vmatpush3.msra.mxu0 %v2979_v59  ;;  %8970 = vmatpush3.msra.mxu1 %v9679_v40  ;;  %v9695_v16 = vpop.eup %9694  ;;  %v2971_v60 = vmul.f32 %v9693_v15, %v10545_v51  ;;  %v1549_v51 = vld [vmem:[%s10536_s28 + $0x10] sm:$0xff] }
 0x30c   : > { %8925 = vmatprep.subr.mxu0 %v2978_v44  ;;  %8971 = vmatprep.subr.mxu1 %v9681_v43  ;;  %v9697_v18 = vpop.eup %9696  ;;  %v2970_v1 = vmul.f32 %v9695_v16, %v10539_v50  ;;  %v1550_v50 = vld [vmem:[%s10536_s28 + $0x18] sm:$0xff] }
 0x30d   : > { %8926 = vmatpush3.msra.mxu0 %v2978_v44  ;;  %8972 = vmatpush3.msra.mxu1 %v9681_v43  ;;  %v2969_v19 = vmul.f32 %v9697_v18, %v10541_v52  ;;  %v1552_v52 = vld [vmem:[%s10536_s28 + $0x28] sm:$0xff] }
 0x30e   : > { %8927 = vmatprep.subr.mxu0 %v2977_v47  ;;  %8973 = vmatprep.subr.mxu1 %v9683_v23 }
 0x30f   : > { %8928 = vmatpush3.msra.mxu0 %v2977_v47  ;;  %8974 = vmatpush3.msra.mxu1 %v9683_v23 }
 0x310   : > { %8929 = vmatprep.subr.mxu0 %v2976_v31  ;;  %8975 = vmatprep.subr.mxu1 %v9685_v48 }
 0x311   : > { %8930 = vmatpush3.msra.mxu0 %v2976_v31  ;;  %8976 = vmatpush3.msra.mxu1 %v9685_v48 }
 0x312   : > { %8931 = vmatprep.subr.mxu0 %v2975_v12  ;;  %8977 = vmatprep.subr.mxu1 %v9687_v53 }
 0x313   : > { %8932 = vmatpush3.msra.mxu0 %v2975_v12  ;;  %8978 = vmatpush3.msra.mxu1 %v9687_v53 }
 0x314   : > { %8933 = vmatprep.subr.mxu0 %v2974_v17  ;;  %8979 = vmatprep.subr.mxu1 %v9689_v54 }
 0x315   : > { %8934 = vmatpush3.msra.mxu0 %v2974_v17  ;;  %8980 = vmatpush3.msra.mxu1 %v9689_v54 }
 0x316   : > { %8935 = vmatprep.subr.mxu0 %v2973_v4  ;;  %8981 = vmatprep.subr.mxu1 %v9691_v49 }
 0x317   : > { %8936 = vmatpush3.msra.mxu0 %v2973_v4  ;;  %8982 = vmatpush3.msra.mxu1 %v9691_v49  ;;  %v1583_v49 = vld [vmem:[%s10083_s6 + $0x10] sm:$0xff] }
 0x318   : > { %8937 = vmatprep.subr.mxu0 %v2972_v9  ;;  %8983 = vmatprep.subr.mxu1 %v9693_v15 }
 0x319   : > { %8938 = vmatpush3.msra.mxu0 %v2972_v9  ;;  %8984 = vmatpush3.msra.mxu1 %v9693_v15  ;;  %v1582_v9 = vld [vmem:[%s10083_s6 + $0x8] sm:$0xff] }
 0x31a   : > { %8939 = vmatprep.subr.mxu0 %v2971_v60  ;;  %8985 = vmatprep.subr.mxu1 %v9695_v16 }
 0x31b   : > { %8940 = vmatpush3.msra.mxu0 %v2971_v60  ;;  %8986 = vmatpush3.msra.mxu1 %v9695_v16 }
 0x31c   : > { %8941 = vmatprep.subr.mxu0 %v2970_v1  ;;  %8987 = vmatprep.subr.mxu1 %v9697_v18 }
 0x31d   : > { %8942 = vmatpush3.msra.mxu0 %v2970_v1  ;;  %8988 = vmatpush3.msra.mxu1 %v9697_v18  ;;  %v1581_v1 = vld [vmem:[%s10083_s6] sm:$0xff] }
 0x31e   : > { %8943 = vmatprep.subr.mxu0 %v2969_v19  ;;  %8990 = vmatmul.mubr.f32.vlgmr.msra.gmra.mxu1 %v1548_v57 }
 0x31f   : > { %8944 = vmatpush3.msra.mxu0 %v2969_v19  ;;  %8992 = vmatprep.mubr.f32.mxu1 %v1549_v51 }
 0x320   : > { %8946 = vmatmul.mubr.f32.vlgmr.msra.gmra.mxu0 %v1548_v57  ;;  %9001 = vmatprep.subr.mxu0 %v1579_v25 }
 0x321   : > { %8948 = vmatprep.mubr.f32.mxu0 %v1549_v51  ;;  %9002 = vmatpush3.msra.mxu0 %v1579_v25 }
 0x322   : > { %8993 = vmatmul.mubr.f32.gmra.mxu1 %v1550_v50  ;;  %9003 = vmatprep.subr.mxu0 %v1578_v11 }
 0x323   : > { %8995 = vmatprep.mubr.f32.mxu1 %v1551_v20  ;;  %9004 = vmatpush3.msra.mxu0 %v1578_v11 }
 0x324   : > { %8949 = vmatmul.mubr.f32.gmra.mxu0 %v1550_v50  ;;  %9005 = vmatprep.subr.mxu0 %v1577_v26 }
 0x325   : > { %8951 = vmatprep.mubr.f32.mxu0 %v1551_v20  ;;  %9006 = vmatpush3.msra.mxu0 %v1577_v26 }
 0x326   : > { %8996 = vmatmul.mubr.f32.gmra.mxu1 %v1552_v52  ;;  %9007 = vmatprep.subr.mxu0 %v1576_v7 }
 0x327   : > { %8998 = vmatprep.mubr.f32.mxu1 %v1553_v10  ;;  %9008 = vmatpush3.msra.mxu0 %v1576_v7 }
 0x328   : > { %8952 = vmatmul.mubr.f32.gmra.mxu0 %v1552_v52  ;;  %9021 = vmatprep.subr.mxu0 %v1584_v27 }
 0x329   : > { %8954 = vmatprep.mubr.f32.mxu0 %v1553_v10 }
 0x32a   : > { %8999 = vmatmul.mubr.f32.gmra.mxu1 %v1554_v24 }
 0x32c   : > { %8955 = vmatmul.mubr.f32.gmra.mxu0 %v1554_v24 }
 0x3de   : > { %v8991_v8 = vpop.f32.mrf.mxu1 }
 0x3df   : > { %v3162_v28 = vadd.f32 1e-06, %v8991_v8 }
 0x3e0   : > { %v3156_v2 = vpop.f32.mrf.mxu1  ;;  %v8947_v3 = vpop.f32.mrf.mxu0 }
 0x3e1   : > { %v3157_v32 = vadd.f32 1e-06, %v3156_v2  ;;  %9698 = vrcp.f32 %v3162_v28  ;;  %v9895_v28 = vld [vmem:[%s10244_s15 + $0x20] sm:$0xff] }
 0x3e2   : > { %v8994_v33 = vpop.f32.mrf.mxu1  ;;  %v3051_v0 = vpop.f32.mrf.mxu0 }
 0x3e3   : > { %9700 = vrcp.f32 %v3157_v32  ;;  %v3172_v63 = vadd.f32 1e-06, %v8994_v33 }
 0x3e4   : > { %v3166_v34 = vpop.f32.mrf.mxu1  ;;  %v8950_v58 = vpop.f32.mrf.mxu0 }
 0x3e5   : > { %v3167_v35 = vadd.f32 1e-06, %v3166_v34  ;;  %9702 = vrcp.f32 %v3172_v63 }
 0x3e6   : > { %v8997_v36 = vpop.f32.mrf.mxu1  ;;  %v3061_v44 = vpop.f32.mrf.mxu0 }
 0x3e7   : > { %9704 = vrcp.f32 %v3167_v35  ;;  %v3182_v39 = vadd.f32 1e-06, %v8997_v36  ;;  %v9896_v35 = vld [vmem:[%s10244_s15 + $0x38] sm:$0xff] }
 0x3e8   : > { %v3176_v41 = vpop.f32.mrf.mxu1  ;;  %v8953_v47 = vpop.f32.mrf.mxu0 }
 0x3e9   : > { %9706 = vrcp.f32 %v3182_v39  ;;  %v3177_v40 = vadd.f32 1e-06, %v3176_v41  ;;  %v9897_v39 = vld [vmem:[%s10244_s15 + $0x30] sm:$0xff] }
 0x3ea   : > { %v9000_v42 = vpop.f32.mrf.mxu1  ;;  %v3071_v54 = vpop.f32.mrf.mxu0 }
 0x3eb   : > { %9708 = vrcp.f32 %v3177_v40  ;;  %v3192_v59 = vadd.f32 1e-06, %v9000_v42 }
 0x3ec   : > { %v3186_v43 = vpop.f32.mrf.mxu1  ;;  %v8956_v18 = vpop.f32.mrf.mxu0 }
 0x3ed   : > { %9710 = vrcp.f32 %v3192_v59  ;;  %v3187_v23 = vadd.f32 1e-06, %v3186_v43 }
 0x3ee   : > { %v9699_v48 = vpop.eup %9698  ;;  %v3081_v20 = vpop.f32.mrf.mxu0 }
 0x3ef   : > { %9712 = vrcp.f32 %v3187_v23  ;;  %v3204_v12 = vmul.f32 %v9699_v48, %v8947_v3 }
 0x3f0   : > { %v9701_v31 = vpop.eup %9700 }
 0x3f1   : > { %v3203_v53 = vmul.f32 %v9701_v31, %v3051_v0 }
 0x3f2   : > { %v9703_v17 = vpop.eup %9702 }
 0x3f3   : > { %9009 = vmatprep.mubr.msk.f32.mxu0 %vm1615_vm0, %v3203_v53  ;;  %v3206_v60 = vmul.f32 %v9703_v17, %v8950_v58 }
 0x3f4   : > { %v9705_v4 = vpop.eup %9704  ;;  %9010 = vmatmul.mubr.msk.f32.vlgmr.msra.gmra.mxu0 %vm1615_vm0, %v3204_v12 }
 0x3f5   : > { %v3205_v15 = vmul.f32 %v9705_v4, %v3061_v44  ;;  %9022 = vmatpush3.msra.mxu0 %v1584_v27  ;;  %v9894_v27 = vld [vmem:[%s10244_s15 + $0x28] sm:$0xff] }
 0x3f6   : > { %v9707_v16 = vpop.eup %9706  ;;  %9023 = vmatprep.subr.mxu0 %v1583_v49 }
 0x3f7   : > { %9012 = vmatprep.mubr.msk.f32.mxu0 %vm1615_vm0, %v3205_v15  ;;  %9024 = vmatpush3.msra.mxu0 %v1583_v49  ;;  %v3208_v19 = vmul.f32 %v9707_v16, %v8953_v47 }
 0x3f8   : > { %v9709_v57 = vpop.eup %9708  ;;  %9013 = vmatmul.mubr.msk.f32.gmra.mxu0 %vm1615_vm0, %v3206_v60  ;;  %9025 = vmatprep.subr.mxu0 %v1582_v9 }
 0x3f9   : > { %v3207_v51 = vmul.f32 %v9709_v57, %v3071_v54  ;;  %9026 = vmatpush3.msra.mxu0 %v1582_v9 }
 0x3fa   : > { %v9711_v50 = vpop.eup %9710  ;;  %9027 = vmatprep.subr.mxu0 %v1581_v1 }
 0x3fb   : > { %9015 = vmatprep.mubr.msk.f32.mxu0 %vm1615_vm0, %v3207_v51  ;;  %9028 = vmatpush3.msra.mxu0 %v1581_v1  ;;  %v3210_v10 = vmul.f32 %v9711_v50, %v8956_v18 }
 0x3fc   : > { %v9713_v52 = vpop.eup %9712  ;;  %9016 = vmatmul.mubr.msk.f32.gmra.mxu0 %vm1615_vm0, %v3208_v19 }
 0x3fd   : > { %v3209_v24 = vmul.f32 %v9713_v52, %v3081_v20 }
 0x3ff   : > { %9018 = vmatprep.mubr.msk.f32.mxu0 %vm1615_vm0, %v3209_v24 }
 0x400   : > { %9019 = vmatmul.mubr.msk.f32.gmra.mxu0 %vm1615_vm0, %v3210_v10 }
 0x401   : > { %9029 = vmatprep.mubr.msk.f32.mxu0 %vm1615_vm0, %v10464_v61 }
 0x404   : > { %9030 = vmatmul.mubr.msk.f32.vlgmr.msra.gmra.mxu0 %vm1615_vm0, %v10466_v62 }
 0x405   : > { %9032 = vmatprep.mubr.msk.f32.mxu0 %vm1615_vm0, %v10472_v5  ;;  %v9890_v5 = vld [vmem:[%s10244_s15 + $0x8] sm:$0xff] }
 0x408   : > { %9033 = vmatmul.mubr.msk.f32.gmra.mxu0 %vm1615_vm0, %v10474_v6 }
 0x409   : > { %9035 = vmatprep.mubr.msk.f32.mxu0 %vm1615_vm0, %v10480_v13  ;;  %v9891_v13 = vld [vmem:[%s10244_s15] sm:$0xff] }
 0x40c   : > { %9036 = vmatmul.mubr.msk.f32.gmra.mxu0 %vm1615_vm0, %v10482_v14 }
 0x40d   : > { %9038 = vmatprep.mubr.msk.f32.mxu0 %vm1615_vm0, %v10488_v21 }
 0x410   : > { %9039 = vmatmul.mubr.msk.f32.gmra.mxu0 %vm1615_vm0, %v10490_v22  ;;  %v7885_v22 = vld [vmem:[%s10078_s30] ss:$0 sm:$0xff] }
 0x411   : > { %9041 = vmatprep.mubr.msk.f32.mxu0 %vm1615_vm0, %v10496_v29 }
 0x414   : > { %9042 = vmatmul.mubr.msk.f32.gmra.mxu0 %vm1615_vm0, %v10498_v30  ;;  %v9892_v30 = vld [vmem:[%s10244_s15 + $0x18] sm:$0xff] }
 0x415   : > { %9044 = vmatprep.mubr.msk.f32.mxu0 %vm1615_vm0, %v10505_v37 }
 0x418   : > { %9045 = vmatmul.mubr.msk.f32.gmra.mxu0 %vm1615_vm0, %v10508_v38 }
 0x419   : > { %9047 = vmatprep.mubr.msk.f32.mxu0 %vm1615_vm0, %v10515_v45  ;;  %v9893_v45 = vld [vmem:[%s10244_s15 + $0x10] sm:$0xff]  ;;  %s12105_s15 = sld [smem:[#allocation11_spill]] }
 0x41c   : > { %9048 = vmatmul.mubr.msk.f32.gmra.mxu0 %vm1615_vm0, %v10518_v46 }
 0x41d   : > { %9050 = vmatprep.mubr.msk.f32.mxu0 %vm1615_vm0, %v10525_v55 }
 0x420   : > { %9051 = vmatmul.mubr.msk.f32.gmra.mxu0 %vm1615_vm0, %v10528_v56 }
 0x4b4   : > { %v9011_v61 = vpop.f32.mrf.mxu0 }
 0x4b5   : > { %v3341_v6 = vadd.f32 %v9890_v5, %v9011_v61 }
 0x4b6   : > { %v3301_v62 = vpop.f32.mrf.mxu0 }
 0x4b7   : > { %v3340_v14 = vadd.f32 %v9891_v13, %v3301_v62  ;;  %v3355_v25 = vadd.f32 %v7885_v22, %v3341_v6 }
 0x4b8   : > { %v9014_v21 = vpop.f32.mrf.mxu0 }
 0x4b9   : > { %v3354_v29 = vadd.f32 %v7885_v22, %v3340_v14  ;;  %v3343_v37 = vadd.f32 %v9892_v30, %v9014_v21  ;;  %v3548_v3 = vsel %vm1615_vm0, %v3355_v25, 0.0 }
 0x4ba   : > { %v3311_v38 = vpop.f32.mrf.mxu0 }
 0x4bb   : > { %v3342_v46 = vadd.f32 %v9893_v45, %v3311_v38  ;;  %v3545_v55 = vsel %vm1615_vm0, %v3354_v29, 0.0  ;;  %v3357_v7 = vadd.f32 %v7885_v22, %v3343_v37 }
 0x4bc   : > { %3546 = vadd.xlane.f32.xlu0 %v3545_v55  ;;  %v9017_v56 = vpop.f32.mrf.mxu0 }
 0x4bd   : > { %v3356_v11 = vadd.f32 %v7885_v22, %v3342_v46  ;;  %v3345_v8 = vadd.f32 %v9894_v27, %v9017_v56  ;;  %v3554_v0 = vsel %vm1615_vm0, %v3357_v7, 0.0  ;;  %v9898_v46 = vld [vmem:[%s10275_s18] sm:$0xff] }
 0x4be   : > { %v3321_v26 = vpop.f32.mrf.mxu0 }
 0x4bf   : > { %v3344_v2 = vadd.f32 %v9895_v28, %v3321_v26  ;;  %v3551_v32 = vsel %vm1615_vm0, %v3356_v11, 0.0  ;;  %v3359_v40 = vadd.f32 %v7885_v22, %v3345_v8 }
 0x4c0   : > { %3549 = vadd.xlane.f32.xlu0 %v3548_v3  ;;  %3552 = vadd.xlane.f32.xlu1 %v3551_v32  ;;  %v9020_v33 = vpop.f32.mrf.mxu0  ;;  %v10709_v3 = vld [vmem:[%s10088_s12] ss:$0 sm:$0xff]  ;;  %v9899_v32 = vld [vmem:[%s10275_s18 + $0x8] sm:$0xff] }
 0x4c1   : > { %v3358_v63 = vadd.f32 %v7885_v22, %v3344_v2  ;;  %v3347_v36 = vadd.f32 %v9896_v35, %v9020_v33  ;;  %v3560_v59 = vsel %vm1615_vm0, %v3359_v40, 0.0 }
 0x4c2   : > { %v3331_v34 = vpop.f32.mrf.mxu0 }
 0x4c3   : > { %v3346_v41 = vadd.f32 %v9897_v39, %v3331_v34  ;;  %v3557_v58 = vsel %vm1615_vm0, %v3358_v63, 0.0  ;;  %v10658_v44 = vadd.f32 %v7885_v22, %v3347_v36  ;;  %v9900_v34 = vld [vmem:[%s10275_s18 + $0x10] sm:$0xff] }
 0x4c4   : > { %3555 = vadd.xlane.f32.xlu1 %v3554_v0  ;;  %3558 = vadd.xlane.f32.xlu0 %v3557_v58  ;;  %v9031_v47 = vpop.f32.mrf.mxu0 }
 0x4c5   : > { %v3360_v42 = vadd.f32 %v7885_v22, %v3346_v41  ;;  %v3566_v23 = vsel %vm1615_vm0, %v10658_v44, 0.0  ;;  %v3508_v33 = vadd.f32 %v9899_v32, %v9031_v47  ;;  %v1589_v32 = vld [vmem:[%s12101_s2 + $0x10] sm:$0xff] }
 0x4c6   : > { %v3428_v48 = vpop.f32.mrf.mxu0 }
 0x4c7   : > { %v3563_v43 = vsel %vm1615_vm0, %v3360_v42, 0.0  ;;  %v3507_v55 = vadd.f32 %v9898_v46, %v3428_v48  ;;  %v9909_v46 = vld [vmem:[%s10275_s18 + $0x58] sm:$0xff] }
 0x4c8   : > { %3561 = vadd.xlane.f32.xlu1 %v3560_v59  ;;  %3564 = vadd.xlane.f32.xlu0 %v3563_v43  ;;  %v10662_v31 = vpop.f32.mrf.mxu0  ;;  %v10726_v59 = vadd.f32 %v10709_v3, %v3508_v33  ;;  %v9902_v43 = vld [vmem:[%s10275_s18 + $0x20] sm:$0xff] }
 0x4ca   : > { %v3438_v53 = vpop.f32.mrf.mxu0 }
 0x4cb   : > { %v3509_v0 = vadd.f32 %v9900_v34, %v3438_v53 }
 0x4cc   : > { %3567 = vadd.xlane.f32.xlu1 %v3566_v23  ;;  %v10664_v12 = vpop.f32.mrf.mxu0 }
 0x4cd   : > { %v10734_v48 = vadd.f32 %v10709_v3, %v3509_v0  ;;  %v1588_v0 = vld [vmem:[%s12101_s2 + $0x8] sm:$0xff] }
 0x4ce   : > { %v10666_v54 = vpop.f32.mrf.mxu0 }
 0x4d0   : > { %v10668_v4 = vpop.f32.mrf.mxu0 }
 0x4d2   : > { %v10674_v57 = vpop.f32.mrf.mxu0 }
 0x4d4   : > { %v10685_v5 = vpop.f32.mrf.mxu0 }
 0x545   : > { %v3547_v17 = vpop.xlane.xlu0 %3546 }
 0x546   : > { %v3570_v49 = vmul.f32 0.03125, %v3547_v17 }
 0x548   : > { %v10670_v15 = vsub.f32 %v3354_v29, %v3570_v49 }
 0x549   : > { %v3550_v9 = vpop.xlane.xlu0 %3549  ;;  %v3553_v16 = vpop.xlane.xlu1 %3552 }
 0x54a   : > { %v3571_v60 = vmul.f32 0.03125, %v3550_v9  ;;  %v3572_v18 = vmul.f32 0.03125, %v3553_v16  ;;  %v3586_v1 = vmul.f32 %v10670_v15, %v10670_v15  ;;  %v3677_v16 = vsel %vm1615_vm0, %v10726_v59, 0.0 }
 0x54c   : > { %v10676_v19 = vsub.f32 %v3355_v25, %v3571_v60  ;;  %v10678_v51 = vsub.f32 %v3356_v11, %v3572_v18  ;;  %v3594_v50 = vsel %vm1615_vm0, %v3586_v1, 0.0  ;;  %v3680_v60 = vsel %vm1615_vm0, %v10734_v48, 0.0 }
 0x54d   : > { %v3556_v20 = vpop.xlane.xlu1 %3555  ;;  %v3559_v52 = vpop.xlane.xlu0 %3558  ;;  %3595 = vadd.xlane.f32.xlu0 %v3594_v50 }
 0x54e   : > { %v3573_v10 = vmul.f32 0.03125, %v3556_v20  ;;  %v3574_v24 = vmul.f32 0.03125, %v3559_v52  ;;  %v3587_v61 = vmul.f32 %v10676_v19, %v10676_v19  ;;  %v3588_v62 = vmul.f32 %v10678_v51, %v10678_v51  ;;  %v9906_v52 = vld [vmem:[%s10275_s18 + $0x40] sm:$0xff] }
 0x550   : > { %v10687_v6 = vsub.f32 %v3357_v7, %v3573_v10  ;;  %v10689_v13 = vsub.f32 %v3358_v63, %v3574_v24  ;;  %v3597_v14 = vsel %vm1615_vm0, %v3587_v61, 0.0  ;;  %v3600_v21 = vsel %vm1615_vm0, %v3588_v62, 0.0  ;;  %v3468_v7 = vpop.f32.mrf.mxu0 }
 0x551   : > { %v3562_v22 = vpop.xlane.xlu1 %3561  ;;  %3598 = vadd.xlane.f32.xlu1 %v3597_v14  ;;  %3601 = vadd.xlane.f32.xlu0 %v3600_v21  ;;  %v3565_v29 = vpop.xlane.xlu0 %3564  ;;  %v10713_v63 = vadd.f32 %v10709_v3, %v3507_v55  ;;  %v3515_v10 = vadd.f32 %v9906_v52, %v3468_v7  ;;  %v9907_v14 = vld [vmem:[%s10275_s18 + $0x48] sm:$0xff] }
 0x552   : > { %v3575_v30 = vmul.f32 0.03125, %v3562_v22  ;;  %v3576_v37 = vmul.f32 0.03125, %v3565_v29  ;;  %v3589_v38 = vmul.f32 %v10687_v6, %v10687_v6  ;;  %v3590_v45 = vmul.f32 %v10689_v13, %v10689_v13  ;;  %v9046_v41 = vpop.f32.mrf.mxu0  ;;  %v9908_v22 = vld [vmem:[%s10275_s18 + $0x50] sm:$0xff] }
 0x553   : > { %v3674_v47 = vsel %vm1615_vm0, %v10713_v63, 0.0  ;;  %v3516_v21 = vadd.f32 %v9907_v14, %v10685_v5  ;;  %v3518_v5 = vadd.f32 %v9909_v46, %v9046_v41  ;;  %v9912_v41 = vld [vmem:[%s10275_s18 + $0x70] sm:$0xff] }
 0x554   : > { %v10698_v25 = vsub.f32 %v3359_v40, %v3575_v30  ;;  %v10700_v56 = vsub.f32 %v3360_v42, %v3576_v37  ;;  %v3603_v11 = vsel %vm1615_vm0, %v3589_v38, 0.0  ;;  %v3606_v26 = vsel %vm1615_vm0, %v3590_v45, 0.0  ;;  %v9901_v40 = vld [vmem:[%s10275_s18 + $0x18] sm:$0xff]  ;;  %v3478_v53 = vpop.f32.mrf.mxu0 }
 0x555   : > { %3604 = vadd.xlane.f32.xlu1 %v3603_v11  ;;  %v3568_v27 = vpop.xlane.xlu1 %3567  ;;  %3607 = vadd.xlane.f32.xlu0 %v3606_v26  ;;  %v3510_v42 = vadd.f32 %v9901_v40, %v10662_v31  ;;  %v9903_v31 = vld [vmem:[%s10275_s18 + $0x28] sm:$0xff]  ;;  %v3517_v29 = vadd.f32 %v9908_v22, %v3478_v53  ;;  %v10774_v38 = vadd.f32 %v10709_v3, %v3515_v10  ;;  %v1590_v11 = vld [vmem:[%s12101_s2 + $0x18] sm:$0xff]  ;;  %v9910_v26 = vld [vmem:[%s10275_s18 + $0x60] sm:$0xff] }
 0x556   : > { %v3577_v8 = vmul.f32 0.03125, %v3568_v27  ;;  %v3591_v28 = vmul.f32 %v10698_v25, %v10698_v25  ;;  %v3592_v2 = vmul.f32 %v10700_v56, %v10700_v56  ;;  %v3512_v17 = vadd.f32 %v9903_v31, %v10664_v12  ;;  %v9049_v1 = vpop.f32.mrf.mxu0  ;;  %9053 = vmatprep.subr.mxu1 %v1590_v11 }
 0x557   : > { %v10739_v49 = vadd.f32 %v10709_v3, %v3510_v42  ;;  %v10778_v55 = vadd.f32 %v10709_v3, %v3516_v21  ;;  %9054 = vmatpush3.msra.mxu1 %v1590_v11  ;;  %v10793_v34 = vadd.f32 %v10709_v3, %v3518_v5 }
 0x558   : > { %v10717_v35 = vsub.f32 %v10658_v44, %v3577_v8  ;;  %v3609_v36 = vsel %vm1615_vm0, %v3591_v28, 0.0  ;;  %v3612_v39 = vsel %vm1615_vm0, %v3592_v2, 0.0  ;;  %v3511_v44 = vadd.f32 %v9902_v43, %v10666_v54  ;;  %v9904_v54 = vld [vmem:[%s10275_s18 + $0x30] sm:$0xff]  ;;  %v3488_v62 = vpop.f32.mrf.mxu0  ;;  %9055 = vmatprep.subr.mxu1 %v1589_v32  ;;  %v1587_v43 = vld [vmem:[%s12101_s2] sm:$0xff]  ;;  %s12124_s2 = sld [smem:[#allocation25_spill]] }
 0x559   : > { %3610 = vadd.xlane.f32.xlu1 %v3609_v36  ;;  %3613 = vadd.xlane.f32.xlu0 %v3612_v39  ;;  %v3513_v9 = vadd.f32 %v9904_v54, %v10674_v57  ;;  %v3683_v12 = vsel %vm1615_vm0, %v10739_v49, 0.0  ;;  %v10753_v50 = vadd.f32 %v10709_v3, %v3512_v17  ;;  %v9905_v57 = vld [vmem:[%s10275_s18 + $0x38] sm:$0xff]  ;;  %v3519_v7 = vadd.f32 %v9910_v26, %v3488_v62  ;;  %v9911_v36 = vld [vmem:[%s10275_s18 + $0x68] sm:$0xff] }
 0x55a   : > { %v3593_v58 = vmul.f32 %v10717_v35, %v10717_v35  ;;  %v10748_v18 = vadd.f32 %v10709_v3, %v3511_v44  ;;  %v3514_v20 = vadd.f32 %v9905_v57, %v10668_v4  ;;  %v9052_v45 = vpop.f32.mrf.mxu0  ;;  %v3698_v8 = vsel %vm1615_vm0, %v10774_v38, 0.0  ;;  %9056 = vmatpush3.msra.mxu1 %v1589_v32 }
 0x55b   : > { %v10761_v61 = vadd.f32 %v10709_v3, %v3513_v9  ;;  %v3689_v4 = vsel %vm1615_vm0, %v10753_v50, 0.0  ;;  %v10787_v28 = vadd.f32 %v10709_v3, %v3517_v29  ;;  %v3701_v33 = vsel %vm1615_vm0, %v10778_v55, 0.0  ;;  %9057 = vmatprep.subr.mxu1 %v1588_v0 }
 0x55c   : > { %v3615_v23 = vsel %vm1615_vm0, %v3593_v58, 0.0  ;;  %v3686_v24 = vsel %vm1615_vm0, %v10748_v18, 0.0  ;;  %v10771_v37 = vadd.f32 %v10709_v3, %v3514_v20  ;;  %v3498_v2 = vpop.f32.mrf.mxu0  ;;  %v3520_v39 = vadd.f32 %v9911_v36, %v9049_v1  ;;  %9058 = vmatpush3.msra.mxu1 %v1588_v0 }
 0x55d   : > { %3616 = vadd.xlane.f32.xlu1 %v3615_v23  ;;  %3675 = vadd.xlane.f32.xlu0 %v3674_v47  ;;  %v3692_v30 = vsel %vm1615_vm0, %v10761_v61, 0.0  ;;  %v3521_v58 = vadd.f32 %v9912_v41, %v3498_v2  ;;  %v3704_v40 = vsel %vm1615_vm0, %v10787_v28, 0.0  ;;  %v10801_v42 = vadd.f32 %v10709_v3, %v3519_v7  ;;  %v9913_v23 = vld [vmem:[%s10275_s18 + $0x78] sm:$0xff]  ;;  %s12107_s18 = sld [smem:[#allocation10_spill]] }
 0x55e   : > { %v3695_v27 = vsel %vm1615_vm0, %v10771_v37, 0.0  ;;  %v3707_v44 = vsel %vm1615_vm0, %v10793_v34, 0.0  ;;  %v3522_v47 = vadd.f32 %v9913_v23, %v9052_v45  ;;  %v10810_v31 = vadd.f32 %v10709_v3, %v3520_v39  ;;  %9059 = vmatprep.subr.mxu1 %v1587_v43 }
 0x55f   : > { %v3710_v53 = vsel %vm1615_vm0, %v10801_v42, 0.0  ;;  %v10813_v17 = vadd.f32 %v10709_v3, %v3521_v58  ;;  %9060 = vmatpush3.msra.mxu1 %v1587_v43  ;;  %v3650_v62 = vlaneseq }
 0x560   : > { %v3713_v54 = vsel %vm1615_vm0, %v10810_v31, 0.0 }
 0x561   : > { %3678 = vadd.xlane.f32.xlu1 %v3677_v16  ;;  %3681 = vadd.xlane.f32.xlu0 %v3680_v60  ;;  %v3716_v9 = vsel %vm1615_vm0, %v10813_v17, 0.0  ;;  %v10820_v16 = vadd.f32 %v10709_v3, %v3522_v47 }
 0x563   : > { %v3719_v60 = vsel %vm1615_vm0, %v10820_v16, 0.0 }
 0x565   : > { %3684 = vadd.xlane.f32.xlu1 %v3683_v12  ;;  %3687 = vadd.xlane.f32.xlu0 %v3686_v24 }
 0x569   : > { %3690 = vadd.xlane.f32.xlu1 %v3689_v4  ;;  %3693 = vadd.xlane.f32.xlu0 %v3692_v30  ;;  %v10824_v30 = vshrl.u32 %v3650_v62, 7 }
 0x56b   : > { %v3664_v36 = vsub.s32 1, %v10824_v30 }
 0x56d   : > { %3696 = vadd.xlane.f32.xlu1 %v3695_v27  ;;  %3699 = vadd.xlane.f32.xlu0 %v3698_v8  ;;  %v3652_v27 = vsub.s32 0, %v10824_v30  ;;  %v10828_v8 = vld [vmem:[%s12102_s0] sm:$0xff] }
 0x571   : > { %3702 = vadd.xlane.f32.xlu1 %v3701_v33  ;;  %3705 = vadd.xlane.f32.xlu0 %v3704_v40  ;;  %v10834_v40 = vrot.slane %v10828_v8, %v3652_v27 }
 0x575   : > { %3708 = vadd.xlane.f32.xlu1 %v3707_v44  ;;  %3711 = vadd.xlane.f32.xlu0 %v3710_v53 }
 0x579   : > { %3714 = vadd.xlane.f32.xlu1 %v3713_v54  ;;  %3717 = vadd.xlane.f32.xlu0 %v3716_v9  ;;  %v10843_v54 = vrot.slane %v10828_v8, %v3664_v36 }
 0x57d   : > { %3720 = vadd.xlane.f32.xlu1 %v3719_v60 }
 0x5d6   : > { %v3596_v1 = vpop.xlane.xlu0 %3595 }
 0x5d7   : > { %v3618_v12 = vmul.f32 0.03125, %v3596_v1 }
 0x5d9   : > { %v3626_v57 = vadd.f32 1e-05, %v3618_v12 }
 0x5da   : > { %v3599_v20 = vpop.xlane.xlu1 %3598  ;;  %v3602_v52 = vpop.xlane.xlu0 %3601 }
 0x5db   : > { %9714 = vrsqrt.f32 %v3626_v57  ;;  %v3619_v10 = vmul.f32 0.03125, %v3599_v20  ;;  %v3620_v24 = vmul.f32 0.03125, %v3602_v52 }
 0x5dd   : > { %v3627_v14 = vadd.f32 1e-05, %v3619_v10  ;;  %v3628_v21 = vadd.f32 1e-05, %v3620_v24 }
 0x5de   : > { %v3605_v4 = vpop.xlane.xlu1 %3604  ;;  %v3608_v3 = vpop.xlane.xlu0 %3607 }
 0x5df   : > { %9716 = vrsqrt.f32 %v3627_v14  ;;  %v3621_v22 = vmul.f32 0.03125, %v3605_v4  ;;  %v3622_v29 = vmul.f32 0.03125, %v3608_v3 }
 0x5e0   : > { %9718 = vrsqrt.f32 %v3628_v21 }
 0x5e1   : > { %v3629_v45 = vadd.f32 1e-05, %v3621_v22  ;;  %v3630_v46 = vadd.f32 1e-05, %v3622_v29 }
 0x5e2   : > { %v3611_v5 = vpop.xlane.xlu1 %3610  ;;  %v3614_v11 = vpop.xlane.xlu0 %3613 }
 0x5e3   : > { %9720 = vrsqrt.f32 %v3629_v45  ;;  %v3623_v26 = vmul.f32 0.03125, %v3611_v5  ;;  %v3624_v7 = vmul.f32 0.03125, %v3614_v11 }
 0x5e4   : > { %9722 = vrsqrt.f32 %v3630_v46 }
 0x5e5   : > { %v3631_v2 = vadd.f32 1e-05, %v3623_v26  ;;  %v3632_v32 = vadd.f32 1e-05, %v3624_v7 }
 0x5e6   : > { %v3617_v33 = vpop.xlane.xlu1 %3616  ;;  %v3676_v0 = vpop.xlane.xlu0 %3675 }
 0x5e7   : > { %9724 = vrsqrt.f32 %v3631_v2  ;;  %v3625_v39 = vmul.f32 0.03125, %v3617_v33  ;;  %v3722_v41 = vmul.f32 0.03125, %v3676_v0 }
 0x5e8   : > { %v9715_v58 = vpop.eup %9714  ;;  %9726 = vrsqrt.f32 %v3632_v32 }
 0x5e9   : > { %v3633_v43 = vadd.f32 1e-05, %v3625_v39  ;;  %v10837_v44 = vsub.f32 %v10713_v63, %v3722_v41  ;;  %v3642_v23 = vmul.f32 %v9715_v58, %v10670_v15 }
 0x5ea   : > { %v3679_v47 = vpop.xlane.xlu1 %3678  ;;  %v3682_v53 = vpop.xlane.xlu0 %3681 }
 0x5eb   : > { %9728 = vrsqrt.f32 %v3633_v43  ;;  %v3723_v9 = vmul.f32 0.03125, %v3679_v47  ;;  %v3724_v60 = vmul.f32 0.03125, %v3682_v53  ;;  %v3754_v1 = vmul.f32 %v10837_v44, %v10837_v44 }
 0x5ec   : > { %v9717_v12 = vpop.eup %9716  ;;  %v3654_v57 = vmul.f32 %v10834_v40, %v3642_v23 }
 0x5ed   : > { %v9719_v63 = vpop.eup %9718  ;;  %v3643_v20 = vmul.f32 %v9717_v12, %v10676_v19  ;;  %v10850_v15 = vsub.f32 %v10726_v59, %v3723_v9  ;;  %v10853_v52 = vsub.f32 %v10734_v48, %v3724_v60  ;;  %v3770_v10 = vsel %vm1615_vm0, %v3754_v1, 0.0 }
 0x5ee   : > { %v3685_v24 = vpop.xlane.xlu1 %3684  ;;  %3771 = vadd.xlane.f32.xlu0 %v3770_v10  ;;  %v3688_v62 = vpop.xlane.xlu0 %3687  ;;  %v10857_v14 = vadd.f32 %v10843_v54, %v3654_v57  ;;  %v3644_v21 = vmul.f32 %v9719_v63, %v10678_v51 }
 0x5ef   : > { %v3655_v4 = vmul.f32 %v10834_v40, %v3643_v20  ;;  %v3725_v3 = vmul.f32 0.03125, %v3685_v24  ;;  %v3726_v19 = vmul.f32 0.03125, %v3688_v62  ;;  %v3755_v59 = vmul.f32 %v10850_v15, %v10850_v15 }
 0x5f0   : > { %v9721_v22 = vpop.eup %9720  ;;  %9061 = vmatprep.mubr.msk.f32.mxu1 %vm1615_vm0, %v10857_v14  ;;  %v3756_v48 = vmul.f32 %v10853_v52, %v10853_v52  ;;  %v3656_v29 = vmul.f32 %v10834_v40, %v3644_v21 }
 0x5f1   : > { %v9723_v45 = vpop.eup %9722  ;;  %v10869_v46 = vsub.f32 %v10739_v49, %v3725_v3  ;;  %v10872_v51 = vsub.f32 %v10748_v18, %v3726_v19  ;;  %v3773_v5 = vsel %vm1615_vm0, %v3755_v59, 0.0  ;;  %v10876_v11 = vadd.f32 %v10843_v54, %v3655_v4 }
 0x5f2   : > { %v3691_v26 = vpop.xlane.xlu1 %3690  ;;  %3774 = vadd.xlane.f32.xlu1 %v3773_v5  ;;  %v3776_v7 = vsel %vm1615_vm0, %v3756_v48, 0.0  ;;  %v3694_v2 = vpop.xlane.xlu0 %3693  ;;  %v10880_v32 = vadd.f32 %v10843_v54, %v3656_v29  ;;  %v3645_v33 = vmul.f32 %v9721_v22, %v10687_v6  ;;  %v3646_v49 = vmul.f32 %v9723_v45, %v10689_v13 }
 0x5f3   : > { %v3727_v0 = vmul.f32 0.03125, %v3691_v26  ;;  %3777 = vadd.xlane.f32.xlu0 %v3776_v7  ;;  %v3728_v18 = vmul.f32 0.03125, %v3694_v2  ;;  %9062 = vmatmul.mubr.msk.f32.vlgmr.msra.gmra.mxu1 %vm1615_vm0, %v10876_v11  ;;  %v3757_v39 = vmul.f32 %v10869_v46, %v10869_v46  ;;  %v3758_v41 = vmul.f32 %v10872_v51, %v10872_v51 }
 0x5f4   : > { %v9725_v58 = vpop.eup %9724  ;;  %9064 = vmatprep.mubr.msk.f32.mxu1 %vm1615_vm0, %v10880_v32  ;;  %v3657_v6 = vmul.f32 %v10834_v40, %v3645_v33  ;;  %v3658_v13 = vmul.f32 %v10834_v40, %v3646_v49 }
 0x5f5   : > { %v9727_v43 = vpop.eup %9726  ;;  %v10895_v23 = vsub.f32 %v10753_v50, %v3727_v0  ;;  %v10898_v47 = vsub.f32 %v10761_v61, %v3728_v18  ;;  %v3779_v53 = vsel %vm1615_vm0, %v3757_v39, 0.0  ;;  %v3782_v9 = vsel %vm1615_vm0, %v3758_v41, 0.0 }
 0x5f6   : > { %v3697_v60 = vpop.xlane.xlu1 %3696  ;;  %3780 = vadd.xlane.f32.xlu1 %v3779_v53  ;;  %v3700_v1 = vpop.xlane.xlu0 %3699  ;;  %v10903_v12 = vadd.f32 %v10843_v54, %v3657_v6  ;;  %v10906_v57 = vadd.f32 %v10843_v54, %v3658_v13  ;;  %v3647_v63 = vmul.f32 %v9725_v58, %v10698_v25  ;;  %v3648_v50 = vmul.f32 %v9727_v43, %v10700_v56 }
 0x5f7   : > { %v3729_v20 = vmul.f32 0.03125, %v3697_v60  ;;  %3783 = vadd.xlane.f32.xlu0 %v3782_v9  ;;  %v3730_v61 = vmul.f32 0.03125, %v3700_v1  ;;  %v3759_v10 = vmul.f32 %v10895_v23, %v10895_v23  ;;  %v3760_v24 = vmul.f32 %v10898_v47, %v10898_v47 }
 0x5f8   : > { %v9729_v62 = vpop.eup %9728  ;;  %9065 = vmatmul.mubr.msk.f32.gmra.mxu1 %vm1615_vm0, %v10903_v12  ;;  %v3659_v21 = vmul.f32 %v10834_v40, %v3647_v63  ;;  %v3660_v4 = vmul.f32 %v10834_v40, %v3648_v50 }
 0x5f9   : > { %v10919_v25 = vsub.f32 %v10771_v37, %v3729_v20  ;;  %v10922_v56 = vsub.f32 %v10774_v38, %v3730_v61  ;;  %9067 = vmatprep.mubr.msk.f32.mxu1 %vm1615_vm0, %v10906_v57  ;;  %v3785_v3 = vsel %vm1615_vm0, %v3759_v10, 0.0  ;;  %v3788_v19 = vsel %vm1615_vm0, %v3760_v24, 0.0 }
 0x5fa   : > { %v3703_v59 = vpop.xlane.xlu1 %3702  ;;  %3786 = vadd.xlane.f32.xlu1 %v3785_v3  ;;  %v3706_v22 = vpop.xlane.xlu0 %3705  ;;  %v10929_v48 = vadd.f32 %v10843_v54, %v3659_v21  ;;  %v10932_v29 = vadd.f32 %v10843_v54, %v3660_v4  ;;  %v3649_v37 = vmul.f32 %v9729_v62, %v10717_v35  ;;  %v1604_v3 = vld [vmem:[%s12103_s27 + $0x18] sm:$0xff] }
 0x5fb   : > { %v3731_v38 = vmul.f32 0.03125, %v3703_v59  ;;  %3789 = vadd.xlane.f32.xlu0 %v3788_v19  ;;  %v3732_v45 = vmul.f32 0.03125, %v3706_v22  ;;  %v3761_v5 = vmul.f32 %v10919_v25, %v10919_v25  ;;  %v3762_v26 = vmul.f32 %v10922_v56, %v10922_v56  ;;  %9101 = vmatprep.subr.mxu0 %v1604_v3  ;;  %v1602_v59 = vld [vmem:[%s12103_s27 + $0x8] sm:$0xff]  ;;  %v1601_v22 = vld [vmem:[%s12103_s27] sm:$0xff] }
 0x5fc   : > { %9068 = vmatmul.mubr.msk.f32.gmra.mxu1 %vm1615_vm0, %v10929_v48  ;;  %v3661_v7 = vmul.f32 %v10834_v40, %v3649_v37  ;;  %9102 = vmatpush3.msra.mxu0 %v1604_v3  ;;  %v1599_v37 = vld [vmem:[%s12104_s11 + $0x38] sm:$0xff] }
 0x5fd   : > { %v10943_v2 = vsub.f32 %v10778_v55, %v3731_v38  ;;  %v10946_v33 = vsub.f32 %v10787_v28, %v3732_v45  ;;  %9070 = vmatprep.mubr.msk.f32.mxu1 %vm1615_vm0, %v10932_v29  ;;  %v3791_v35 = vsel %vm1615_vm0, %v3761_v5, 0.0  ;;  %v3794_v49 = vsel %vm1615_vm0, %v3762_v26, 0.0  ;;  %9073 = vmatprep.subr.mxu1 %v1599_v37  ;;  %v1598_v38 = vld [vmem:[%s12104_s11 + $0x30] sm:$0xff]  ;;  %v1597_v45 = vld [vmem:[%s12104_s11 + $0x28] sm:$0xff]  ;;  %v1596_v5 = vld [vmem:[%s12104_s11 + $0x20] sm:$0xff] }
 0x5fe   : > { %v3709_v0 = vpop.xlane.xlu1 %3708  ;;  %3792 = vadd.xlane.f32.xlu1 %v3791_v35  ;;  %v3712_v18 = vpop.xlane.xlu0 %3711  ;;  %v10953_v39 = vadd.f32 %v10843_v54, %v3661_v7  ;;  %9074 = vmatpush3.msra.mxu1 %v1599_v37  ;;  %v1595_v26 = vld [vmem:[%s12104_s11 + $0x18] sm:$0xff]  ;;  %v1594_v7 = vld [vmem:[%s12104_s11 + $0x10] sm:$0xff]  ;;  %v1593_v35 = vld [vmem:[%s12104_s11 + $0x8] sm:$0xff] }
 0x5ff   : > { %v3733_v40 = vmul.f32 0.03125, %v3709_v0  ;;  %3795 = vadd.xlane.f32.xlu0 %v3794_v49  ;;  %v3734_v55 = vmul.f32 0.03125, %v3712_v18  ;;  %v3763_v28 = vmul.f32 %v10943_v2, %v10943_v2  ;;  %v3764_v41 = vmul.f32 %v10946_v33, %v10946_v33  ;;  %9075 = vmatprep.subr.mxu1 %v1598_v38  ;;  %v1592_v49 = vld [vmem:[%s12104_s11] sm:$0xff]  ;;  %v11006_v0 = vld [vmem:[%s12105_s15 + $0x38] sm:$0xff] }
 0x600   : > { %9071 = vmatmul.mubr.msk.f32.gmra.mxu1 %vm1615_vm0, %v10953_v39 }
 0x601   : > { %v10962_v58 = vsub.f32 %v10793_v34, %v3733_v40  ;;  %v10965_v6 = vsub.f32 %v10801_v42, %v3734_v55  ;;  %v3797_v54 = vsel %vm1615_vm0, %v3763_v28, 0.0  ;;  %v3800_v13 = vsel %vm1615_vm0, %v3764_v41, 0.0  ;;  %9076 = vmatpush3.msra.mxu1 %v1598_v38 }
 0x602   : > { %v3715_v43 = vpop.xlane.xlu1 %3714  ;;  %3798 = vadd.xlane.f32.xlu1 %v3797_v54  ;;  %v3718_v53 = vpop.xlane.xlu0 %3717  ;;  %9077 = vmatprep.subr.mxu1 %v1597_v45 }
 0x603   : > { %v3735_v9 = vmul.f32 0.03125, %v3715_v43  ;;  %3801 = vadd.xlane.f32.xlu0 %v3800_v13  ;;  %v3736_v60 = vmul.f32 0.03125, %v3718_v53  ;;  %v3765_v1 = vmul.f32 %v10962_v58, %v10962_v58  ;;  %v3766_v34 = vmul.f32 %v10965_v6, %v10965_v6  ;;  %9078 = vmatpush3.msra.mxu1 %v1597_v45 }
 0x604   : > { %9079 = vmatprep.subr.mxu1 %v1596_v5 }
 0x605   : > { %v10974_v63 = vsub.f32 %v10810_v31, %v3735_v9  ;;  %v10977_v42 = vsub.f32 %v10813_v17, %v3736_v60  ;;  %v3803_v50 = vsel %vm1615_vm0, %v3765_v1, 0.0  ;;  %v3806_v20 = vsel %vm1615_vm0, %v3766_v34, 0.0  ;;  %9080 = vmatpush3.msra.mxu1 %v1596_v5 }
 0x606   : > { %3804 = vadd.xlane.f32.xlu1 %v3803_v50  ;;  %v3721_v61 = vpop.xlane.xlu1 %3720  ;;  %9081 = vmatprep.subr.mxu1 %v1595_v26 }
 0x607   : > { %v3737_v10 = vmul.f32 0.03125, %v3721_v61  ;;  %3807 = vadd.xlane.f32.xlu0 %v3806_v20  ;;  %v3767_v24 = vmul.f32 %v10974_v63, %v10974_v63  ;;  %v3768_v31 = vmul.f32 %v10977_v42, %v10977_v42  ;;  %9082 = vmatpush3.msra.mxu1 %v1595_v26 }
 0x608   : > { %9083 = vmatprep.subr.mxu1 %v1594_v7 }
 0x609   : > { %v10986_v62 = vsub.f32 %v10820_v16, %v3737_v10  ;;  %v3809_v17 = vsel %vm1615_vm0, %v3767_v24, 0.0  ;;  %v3812_v21 = vsel %vm1615_vm0, %v3768_v31, 0.0  ;;  %v1603_v16 = vld [vmem:[%s12103_s27 + $0x10] sm:$0xff]  ;;  %9084 = vmatpush3.msra.mxu1 %v1594_v7  ;;  %v3884_v10 = vsub.s32 2, %v10824_v30 }
 0x60a   : > { %3810 = vadd.xlane.f32.xlu1 %v3809_v17  ;;  %9103 = vmatprep.subr.mxu0 %v1603_v16 }
 0x60b   : > { %3813 = vadd.xlane.f32.xlu0 %v3812_v21  ;;  %v3769_v4 = vmul.f32 %v10986_v62, %v10986_v62  ;;  %9104 = vmatpush3.msra.mxu0 %v1603_v16  ;;  %v3904_v21 = vsub.s32 3, %v10824_v30  ;;  %v11012_v16 = vrot.slane %v10828_v8, %v3884_v10 }
 0x60c   : > { %9105 = vmatprep.subr.mxu0 %v1602_v59  ;;  %9085 = vmatprep.subr.mxu1 %v1593_v35 }
 0x60d   : > { %v3815_v19 = vsel %vm1615_vm0, %v3769_v4, 0.0  ;;  %9106 = vmatpush3.msra.mxu0 %v1602_v59  ;;  %9086 = vmatpush3.msra.mxu1 %v1593_v35  ;;  %v11015_v45 = vrot.slane %v10828_v8, %v3904_v21 }
 0x60e   : > { %3816 = vadd.xlane.f32.xlu1 %v3815_v19  ;;  %9107 = vmatprep.subr.mxu0 %v1601_v22 }
 0x60f   : > { %9108 = vmatpush3.msra.mxu0 %v1601_v22  ;;  %9087 = vmatprep.subr.mxu1 %v1592_v49 }
 0x610   : > { %9088 = vmatpush3.msra.mxu1 %v1592_v49 }
 0x611   : > { %9133 = vmatprep.subr.mxu1 %v11006_v0 }
 0x677   : > { %v3772_v18 = vpop.xlane.xlu0 %3771 }
 0x678   : > { %v3818_v40 = vmul.f32 0.03125, %v3772_v18 }
 0x67a   : > { %v3834_v55 = vadd.f32 1e-05, %v3818_v40 }
 0x67b   : > { %v3775_v28 = vpop.xlane.xlu1 %3774 }
 0x67c   : > { %9730 = vrsqrt.f32 %v3834_v55  ;;  %v3819_v41 = vmul.f32 0.03125, %v3775_v28  ;;  %v3778_v54 = vpop.xlane.xlu0 %3777 }
 0x67d   : > { %v3820_v13 = vmul.f32 0.03125, %v3778_v54 }
 0x67e   : > { %v3835_v43 = vadd.f32 1e-05, %v3819_v41 }
 0x67f   : > { %v3836_v53 = vadd.f32 1e-05, %v3820_v13  ;;  %v3781_v9 = vpop.xlane.xlu1 %3780 }
 0x680   : > { %9732 = vrsqrt.f32 %v3835_v43  ;;  %v3821_v60 = vmul.f32 0.03125, %v3781_v9  ;;  %v3784_v1 = vpop.xlane.xlu0 %3783 }
 0x681   : > { %9734 = vrsqrt.f32 %v3836_v53  ;;  %v3822_v34 = vmul.f32 0.03125, %v3784_v1 }
 0x682   : > { %v3837_v50 = vadd.f32 1e-05, %v3821_v60 }
 0x683   : > { %v3838_v20 = vadd.f32 1e-05, %v3822_v34  ;;  %v3787_v61 = vpop.xlane.xlu1 %3786 }
 0x684   : > { %9736 = vrsqrt.f32 %v3837_v50  ;;  %v3823_v24 = vmul.f32 0.03125, %v3787_v61  ;;  %v3790_v31 = vpop.xlane.xlu0 %3789 }
 0x685   : > { %9738 = vrsqrt.f32 %v3838_v20  ;;  %v3824_v17 = vmul.f32 0.03125, %v3790_v31 }
 0x686   : > { %v3839_v4 = vadd.f32 1e-05, %v3823_v24 }
 0x687   : > { %v3840_v3 = vadd.f32 1e-05, %v3824_v17  ;;  %v3793_v19 = vpop.xlane.xlu1 %3792 }
 0x688   : > { %9740 = vrsqrt.f32 %v3839_v4  ;;  %v3825_v59 = vmul.f32 0.03125, %v3793_v19  ;;  %v3796_v22 = vpop.xlane.xlu0 %3795 }
 0x689   : > { %v9731_v37 = vpop.eup %9730  ;;  %9742 = vrsqrt.f32 %v3840_v3  ;;  %v3826_v38 = vmul.f32 0.03125, %v3796_v22 }
 0x68a   : > { %v3841_v5 = vadd.f32 1e-05, %v3825_v59  ;;  %v3866_v26 = vmul.f32 %v9731_v37, %v10837_v44 }
 0x68b   : > { %v3842_v7 = vadd.f32 1e-05, %v3826_v38  ;;  %v3799_v35 = vpop.xlane.xlu1 %3798 }
 0x68c   : > { %9744 = vrsqrt.f32 %v3841_v5  ;;  %v3827_v49 = vmul.f32 0.03125, %v3799_v35  ;;  %v3802_v18 = vpop.xlane.xlu0 %3801  ;;  %v3886_v40 = vmul.f32 %v11012_v16, %v3866_v26 }
 0x68d   : > { %v9733_v55 = vpop.eup %9732  ;;  %9746 = vrsqrt.f32 %v3842_v7  ;;  %v3828_v28 = vmul.f32 0.03125, %v3802_v18 }
 0x68e   : > { %v9735_v41 = vpop.eup %9734  ;;  %v3867_v54 = vmul.f32 %v9733_v55, %v10850_v15  ;;  %v3843_v13 = vadd.f32 1e-05, %v3827_v49  ;;  %v11021_v8 = vadd.f32 %v11015_v45, %v3886_v40 }
 0x68f   : > { %v3844_v43 = vadd.f32 1e-05, %v3828_v28  ;;  %v3805_v53 = vpop.xlane.xlu1 %3804  ;;  %v3868_v44 = vmul.f32 %v9735_v41, %v10853_v52 }
 0x690   : > { %v3887_v9 = vmul.f32 %v11012_v16, %v3867_v54  ;;  %9748 = vrsqrt.f32 %v3843_v13  ;;  %v3829_v60 = vmul.f32 0.03125, %v3805_v53  ;;  %v3808_v1 = vpop.xlane.xlu0 %3807  ;;  %9109 = vmatprep.mubr.msk.f32.mxu0 %vm1615_vm0, %v11021_v8 }
 0x691   : > { %v9737_v34 = vpop.eup %9736  ;;  %9750 = vrsqrt.f32 %v3844_v43  ;;  %v3830_v50 = vmul.f32 0.03125, %v3808_v1  ;;  %v3888_v15 = vmul.f32 %v11012_v16, %v3868_v44 }
 0x692   : > { %v9739_v20 = vpop.eup %9738  ;;  %v3845_v61 = vadd.f32 1e-05, %v3829_v60  ;;  %v11029_v10 = vadd.f32 %v11015_v45, %v3887_v9  ;;  %v3869_v52 = vmul.f32 %v9737_v34, %v10869_v46 }
 0x693   : > { %v3846_v24 = vadd.f32 1e-05, %v3830_v50  ;;  %v3811_v31 = vpop.xlane.xlu1 %3810  ;;  %v11033_v17 = vadd.f32 %v11015_v45, %v3888_v15  ;;  %v3870_v21 = vmul.f32 %v9739_v20, %v10872_v51 }
 0x694   : > { %9752 = vrsqrt.f32 %v3845_v61  ;;  %v3831_v4 = vmul.f32 0.03125, %v3811_v31  ;;  %v3814_v3 = vpop.xlane.xlu0 %3813  ;;  %9110 = vmatmul.mubr.msk.f32.vlgmr.msra.gmra.mxu0 %vm1615_vm0, %v11029_v10  ;;  %v3889_v19 = vmul.f32 %v11012_v16, %v3869_v52 }
 0x695   : > { %v9741_v59 = vpop.eup %9740  ;;  %9754 = vrsqrt.f32 %v3846_v24  ;;  %v3832_v22 = vmul.f32 0.03125, %v3814_v3  ;;  %9112 = vmatprep.mubr.msk.f32.mxu0 %vm1615_vm0, %v11033_v17  ;;  %v3890_v46 = vmul.f32 %v11012_v16, %v3870_v21 }
 0x696   : > { %v9743_v37 = vpop.eup %9742  ;;  %v3847_v38 = vadd.f32 1e-05, %v3831_v4  ;;  %v11043_v51 = vadd.f32 %v11015_v45, %v3889_v19  ;;  %v3871_v5 = vmul.f32 %v9741_v59, %v10895_v23 }
 0x697   : > { %v3848_v26 = vadd.f32 1e-05, %v3832_v22  ;;  %v3817_v7 = vpop.xlane.xlu1 %3816  ;;  %v11047_v35 = vadd.f32 %v11015_v45, %v3890_v46  ;;  %v3872_v49 = vmul.f32 %v9743_v37, %v10898_v47 }
 0x698   : > { %9756 = vrsqrt.f32 %v3847_v38  ;;  %v3833_v18 = vmul.f32 0.03125, %v3817_v7  ;;  %9113 = vmatmul.mubr.msk.f32.gmra.mxu0 %vm1615_vm0, %v11043_v51  ;;  %v3891_v40 = vmul.f32 %v11012_v16, %v3871_v5  ;;  %v7903_v7 = vld [vmem:[%s12106_s16] ss:$0 sm:$0xff]  ;;  %s12110_s16 = sld [smem:[#allocation13_spill]] }
 0x699   : > { %v9745_v55 = vpop.eup %9744  ;;  %9758 = vrsqrt.f32 %v3848_v26  ;;  %9115 = vmatprep.mubr.msk.f32.mxu0 %vm1615_vm0, %v11047_v35  ;;  %v3892_v23 = vmul.f32 %v11012_v16, %v3872_v49 }
 0x69a   : > { %v9747_v28 = vpop.eup %9746  ;;  %v3849_v41 = vadd.f32 1e-05, %v3833_v18  ;;  %v11057_v54 = vadd.f32 %v11015_v45, %v3891_v40  ;;  %v3873_v47 = vmul.f32 %v9745_v55, %v10919_v25 }
 0x69b   : > { %v11061_v13 = vadd.f32 %v11015_v45, %v3892_v23  ;;  %v3874_v43 = vmul.f32 %v9747_v28, %v10922_v56 }
 0x69c   : > { %9760 = vrsqrt.f32 %v3849_v41  ;;  %9116 = vmatmul.mubr.msk.f32.gmra.mxu0 %vm1615_vm0, %v11057_v54  ;;  %v3893_v53 = vmul.f32 %v11012_v16, %v3873_v47  ;;  %v1612_v47 = vld [vmem:[%s12105_s15 + $0x30] sm:$0xff] }
 0x69d   : > { %v9749_v44 = vpop.eup %9748  ;;  %9118 = vmatprep.mubr.msk.f32.mxu0 %vm1615_vm0, %v11061_v13  ;;  %v3894_v9 = vmul.f32 %v11012_v16, %v3874_v43 }
 0x69e   : > { %v9751_v60 = vpop.eup %9750  ;;  %v11071_v25 = vadd.f32 %v11015_v45, %v3893_v53  ;;  %v3875_v1 = vmul.f32 %v9749_v44, %v10943_v2  ;;  %v1611_v53 = vld [vmem:[%s12105_s15 + $0x28] sm:$0xff] }
 0x69f   : > { %v11075_v56 = vadd.f32 %v11015_v45, %v3894_v9  ;;  %v3876_v34 = vmul.f32 %v9751_v60, %v10946_v33 }
 0x6a0   : > { %9119 = vmatmul.mubr.msk.f32.gmra.mxu0 %vm1615_vm0, %v11071_v25  ;;  %v3895_v50 = vmul.f32 %v11012_v16, %v3875_v1 }
 0x6a1   : > { %v9753_v15 = vpop.eup %9752  ;;  %9121 = vmatprep.mubr.msk.f32.mxu0 %vm1615_vm0, %v11075_v56  ;;  %v3896_v20 = vmul.f32 %v11012_v16, %v3876_v34 }
 0x6a2   : > { %v9755_v61 = vpop.eup %9754  ;;  %v11085_v52 = vadd.f32 %v11015_v45, %v3895_v50  ;;  %v3877_v2 = vmul.f32 %v9753_v15, %v10962_v58  ;;  %v1610_v50 = vld [vmem:[%s12105_s15 + $0x20] sm:$0xff] }
 0x6a3   : > { %v11089_v24 = vadd.f32 %v11015_v45, %v3896_v20  ;;  %v3878_v33 = vmul.f32 %v9755_v61, %v10965_v6 }
 0x6a4   : > { %9122 = vmatmul.mubr.msk.f32.gmra.mxu0 %vm1615_vm0, %v11085_v52  ;;  %v3897_v31 = vmul.f32 %v11012_v16, %v3877_v2 }
 0x6a5   : > { %v9757_v21 = vpop.eup %9756  ;;  %9124 = vmatprep.mubr.msk.f32.mxu0 %vm1615_vm0, %v11089_v24  ;;  %v3898_v4 = vmul.f32 %v11012_v16, %v3878_v33 }
 0x6a6   : > { %v9759_v3 = vpop.eup %9758  ;;  %v11099_v19 = vadd.f32 %v11015_v45, %v3897_v31  ;;  %v3879_v58 = vmul.f32 %v9757_v21, %v10974_v63 }
 0x6a7   : > { %v11103_v6 = vadd.f32 %v11015_v45, %v3898_v4  ;;  %v3880_v59 = vmul.f32 %v9759_v3, %v10977_v42  ;;  %v1609_v4 = vld [vmem:[%s12105_s15 + $0x18] sm:$0xff]  ;;  %v1608_v3 = vld [vmem:[%s12105_s15 + $0x10] sm:$0xff] }
 0x6a8   : > { %9125 = vmatmul.mubr.msk.f32.gmra.mxu0 %vm1615_vm0, %v11099_v19  ;;  %v3899_v22 = vmul.f32 %v11012_v16, %v3879_v58  ;;  %v1607_v58 = vld [vmem:[%s12105_s15 + $0x8] sm:$0xff] }
 0x6a9   : > { %v9761_v46 = vpop.eup %9760  ;;  %9127 = vmatprep.mubr.msk.f32.mxu0 %vm1615_vm0, %v11103_v6  ;;  %v3900_v37 = vmul.f32 %v11012_v16, %v3880_v59  ;;  %v1606_v59 = vld [vmem:[%s12105_s15] sm:$0xff] }
 0x6aa   : > { %v11113_v38 = vadd.f32 %v11015_v45, %v3899_v22  ;;  %v3881_v63 = vmul.f32 %v9761_v46, %v10986_v62  ;;  %v7921_v22 = vld [vmem:[%s12107_s18] ss:$0 sm:$0xff]  ;;  %s12111_s18 = sld [smem:[#allocation14_spill]] }
 0x6ab   : > { %v11117_v5 = vadd.f32 %v11015_v45, %v3900_v37 }
 0x6ac   : > { %9128 = vmatmul.mubr.msk.f32.gmra.mxu0 %vm1615_vm0, %v11113_v38  ;;  %v3901_v42 = vmul.f32 %v11012_v16, %v3881_v63 }
 0x6ad   : > { %9130 = vmatprep.mubr.msk.f32.mxu0 %vm1615_vm0, %v11117_v5 }
 0x6ae   : > { %v11125_v26 = vadd.f32 %v11015_v45, %v3901_v42 }
 0x6b0   : > { %9131 = vmatmul.mubr.msk.f32.gmra.mxu0 %vm1615_vm0, %v11125_v26 }
 0x6b3   : > { %v9063_v62 = vpop.f32.mrf.mxu1 }
 0x6b4   : > { %v4024_v49 = vadd.f32 %v9063_v62, %v7903_v7 }
 0x6b5   : > { %v4018_v18 = vpop.f32.mrf.mxu1 }
 0x6b6   : > { %v4019_v40 = vadd.f32 %v7903_v7, %v4018_v18  ;;  %v4058_v28 = vmax.f32 %v4024_v49, 0.0 }
 0x6b8   : > { %v4057_v55 = vmax.f32 %v4019_v40, 0.0  ;;  %v9066_v23 = vpop.f32.mrf.mxu1 }
 0x6b9   : > { %v4034_v41 = vadd.f32 %v9066_v23, %v7903_v7 }
 0x6ba   : > { %v4028_v16 = vpop.f32.mrf.mxu1  ;;  %9089 = vmatprep.mubr.msk.f32.mxu1 %vm2148_vm1, %v4057_v55 }
 0x6bb   : > { %v4029_v45 = vadd.f32 %v7903_v7, %v4028_v16  ;;  %9090 = vmatmul.mubr.msk.f32.vlgmr.msra.gmra.mxu1 %vm2148_vm1, %v4058_v28  ;;  %v4060_v9 = vmax.f32 %v4034_v41, 0.0 }
 0x6bc   : > { %v9069_v43 = vpop.f32.mrf.mxu1  ;;  %9134 = vmatpush3.msra.mxu1 %v11006_v0 }
 0x6bd   : > { %v4059_v44 = vmax.f32 %v4029_v45, 0.0  ;;  %9135 = vmatprep.subr.mxu1 %v1612_v47  ;;  %v4044_v60 = vadd.f32 %v9069_v43, %v7903_v7 }
 0x6be   : > { %v4038_v1 = vpop.f32.mrf.mxu1  ;;  %9136 = vmatpush3.msra.mxu1 %v1612_v47 }
 0x6bf   : > { %v4039_v34 = vadd.f32 %v7903_v7, %v4038_v1  ;;  %9092 = vmatprep.mubr.msk.f32.mxu1 %vm2148_vm1, %v4059_v44  ;;  %9137 = vmatprep.subr.mxu1 %v1611_v53  ;;  %v4062_v0 = vmax.f32 %v4044_v60, 0.0 }
 0x6c0   : > { %v9072_v15 = vpop.f32.mrf.mxu1  ;;  %9093 = vmatmul.mubr.msk.f32.gmra.mxu1 %vm2148_vm1, %v4060_v9 }
 0x6c1   : > { %v4061_v20 = vmax.f32 %v4039_v34, 0.0  ;;  %9138 = vmatpush3.msra.mxu1 %v1611_v53  ;;  %v4054_v61 = vadd.f32 %v9072_v15, %v7903_v7 }
 0x6c2   : > { %v4048_v2 = vpop.f32.mrf.mxu1  ;;  %9139 = vmatprep.subr.mxu1 %v1610_v50 }
 0x6c3   : > { %v4049_v33 = vadd.f32 %v7903_v7, %v4048_v2  ;;  %9095 = vmatprep.mubr.msk.f32.mxu1 %vm2148_vm1, %v4061_v20  ;;  %9140 = vmatpush3.msra.mxu1 %v1610_v50  ;;  %v4064_v21 = vmax.f32 %v4054_v61, 0.0 }
 0x6c4   : > { %9096 = vmatmul.mubr.msk.f32.gmra.mxu1 %vm2148_vm1, %v4062_v0  ;;  %9141 = vmatprep.subr.mxu1 %v1609_v4 }
 0x6c5   : > { %v4063_v31 = vmax.f32 %v4049_v33, 0.0  ;;  %9142 = vmatpush3.msra.mxu1 %v1609_v4 }
 0x6c6   : > { %9143 = vmatprep.subr.mxu1 %v1608_v3 }
 0x6c7   : > { %9098 = vmatprep.mubr.msk.f32.mxu1 %vm2148_vm1, %v4063_v31  ;;  %9144 = vmatpush3.msra.mxu1 %v1608_v3 }
 0x6c8   : > { %9099 = vmatmul.mubr.msk.f32.gmra.mxu1 %vm2148_vm1, %v4064_v21  ;;  %9145 = vmatprep.subr.mxu1 %v1607_v58 }
 0x6c9   : > { %9146 = vmatpush3.msra.mxu1 %v1607_v58 }
 0x6ca   : > { %9147 = vmatprep.subr.mxu1 %v1606_v59 }
 0x6cb   : > { %9148 = vmatpush3.msra.mxu1 %v1606_v59 }
 0x754   : > { %v9111_v46 = vpop.f32.mrf.mxu0 }
 0x755   : > { %v4342_v37 = vadd.f32 %v9111_v46, %v7921_v22 }
 0x756   : > { %v4336_v63 = vpop.f32.mrf.mxu0 }
 0x757   : > { %v4337_v42 = vadd.f32 %v7921_v22, %v4336_v63  ;;  %v4416_v49 = vmax.f32 %v4342_v37, 0.0 }
 0x758   : > { %v9114_v7 = vpop.f32.mrf.mxu0 }
 0x759   : > { %v4415_v62 = vmax.f32 %v4337_v42, 0.0  ;;  %v4352_v18 = vadd.f32 %v9114_v7, %v7921_v22 }
 0x75a   : > { %v4346_v40 = vpop.f32.mrf.mxu0 }
 0x75b   : > { %v4347_v55 = vadd.f32 %v7921_v22, %v4346_v40  ;;  %9149 = vmatprep.mubr.msk.f32.mxu1 %vm2148_vm1, %v4415_v62  ;;  %v4418_v41 = vmax.f32 %v4352_v18, 0.0 }
 0x75c   : > { %v9117_v23 = vpop.f32.mrf.mxu0  ;;  %9150 = vmatmul.mubr.msk.f32.vlgmr.msra.gmra.mxu1 %vm2148_vm1, %v4416_v49 }
 0x75d   : > { %v4417_v28 = vmax.f32 %v4347_v55, 0.0  ;;  %v4362_v16 = vadd.f32 %v9117_v23, %v7921_v22 }
 0x75e   : > { %v4356_v47 = vpop.f32.mrf.mxu0 }
 0x75f   : > { %v4357_v45 = vadd.f32 %v7921_v22, %v4356_v47  ;;  %9152 = vmatprep.mubr.msk.f32.mxu1 %vm2148_vm1, %v4417_v28  ;;  %v4420_v44 = vmax.f32 %v4362_v16, 0.0  ;;  %v7920_v16 = vld [vmem:[%s12108_s22] ss:$0 sm:$0xff]  ;;  %s12112_s22 = sld [smem:[#allocation15_spill]] }
 0x760   : > { %v9120_v43 = vpop.f32.mrf.mxu0  ;;  %9153 = vmatmul.mubr.msk.f32.gmra.mxu1 %vm2148_vm1, %v4418_v41 }
 0x761   : > { %v4419_v53 = vmax.f32 %v4357_v45, 0.0  ;;  %v4372_v9 = vadd.f32 %v9120_v43, %v7921_v22 }
 0x762   : > { %v4366_v60 = vpop.f32.mrf.mxu0 }
 0x763   : > { %v4367_v1 = vadd.f32 %v7921_v22, %v4366_v60  ;;  %9155 = vmatprep.mubr.msk.f32.mxu1 %vm2148_vm1, %v4419_v53  ;;  %v4422_v15 = vmax.f32 %v4372_v9, 0.0 }
 0x764   : > { %v9123_v34 = vpop.f32.mrf.mxu0  ;;  %9156 = vmatmul.mubr.msk.f32.gmra.mxu1 %vm2148_vm1, %v4420_v44 }
 0x765   : > { %v4421_v50 = vmax.f32 %v4367_v1, 0.0  ;;  %v4382_v20 = vadd.f32 %v9123_v34, %v7921_v22 }
 0x766   : > { %v4376_v0 = vpop.f32.mrf.mxu0 }
 0x767   : > { %v4377_v61 = vadd.f32 %v7921_v22, %v4376_v0  ;;  %9158 = vmatprep.mubr.msk.f32.mxu1 %vm2148_vm1, %v4421_v50  ;;  %v4424_v31 = vmax.f32 %v4382_v20, 0.0 }
 0x768   : > { %v9126_v2 = vpop.f32.mrf.mxu0  ;;  %9159 = vmatmul.mubr.msk.f32.gmra.mxu1 %vm2148_vm1, %v4422_v15 }
 0x769   : > { %v4423_v33 = vmax.f32 %v4377_v61, 0.0  ;;  %v4392_v21 = vadd.f32 %v9126_v2, %v7921_v22 }
 0x76a   : > { %v4386_v4 = vpop.f32.mrf.mxu0 }
 0x76b   : > { %v4387_v3 = vadd.f32 %v7921_v22, %v4386_v4  ;;  %9161 = vmatprep.mubr.msk.f32.mxu1 %vm2148_vm1, %v4423_v33  ;;  %v4426_v46 = vmax.f32 %v4392_v21, 0.0 }
 0x76c   : > { %v9129_v58 = vpop.f32.mrf.mxu0  ;;  %9162 = vmatmul.mubr.msk.f32.gmra.mxu1 %vm2148_vm1, %v4424_v31 }
 0x76d   : > { %v4425_v59 = vmax.f32 %v4387_v3, 0.0  ;;  %v4402_v37 = vadd.f32 %v9129_v58, %v7921_v22 }
 0x76e   : > { %v4396_v63 = vpop.f32.mrf.mxu0 }
 0x76f   : > { %v4397_v42 = vadd.f32 %v7921_v22, %v4396_v63  ;;  %9164 = vmatprep.mubr.msk.f32.mxu1 %vm2148_vm1, %v4425_v59  ;;  %v4428_v49 = vmax.f32 %v4402_v37, 0.0 }
 0x770   : > { %v9132_v7 = vpop.f32.mrf.mxu0  ;;  %9165 = vmatmul.mubr.msk.f32.gmra.mxu1 %vm2148_vm1, %v4426_v46 }
 0x771   : > { %v4427_v62 = vmax.f32 %v4397_v42, 0.0  ;;  %v4412_v18 = vadd.f32 %v9132_v7, %v7921_v22 }
 0x772   : > { %v4406_v40 = vpop.f32.mrf.mxu0 }
 0x773   : > { %v4407_v55 = vadd.f32 %v7921_v22, %v4406_v40  ;;  %9167 = vmatprep.mubr.msk.f32.mxu1 %vm2148_vm1, %v4427_v62  ;;  %v4430_v28 = vmax.f32 %v4412_v18, 0.0 }
 0x774   : > { %9168 = vmatmul.mubr.msk.f32.gmra.mxu1 %vm2148_vm1, %v4428_v49 }
 0x775   : > { %v4429_v23 = vmax.f32 %v4407_v55, 0.0 }
 0x777   : > { %9170 = vmatprep.mubr.msk.f32.mxu1 %vm2148_vm1, %v4429_v23 }
 0x778   : > { %9171 = vmatmul.mubr.msk.f32.gmra.mxu1 %vm2148_vm1, %v4430_v28 }
 0x77b   : > { %v9091_v41 = vpop.f32.mrf.mxu1 }
 0x77c   : > { %v4195_v47 = vadd.f32 %v9091_v41, %v10876_v11 }
 0x77d   : > { %v4155_v45 = vpop.f32.mrf.mxu1 }
 0x77e   : > { %v4194_v43 = vadd.f32 %v4155_v45, %v10857_v14  ;;  %v4209_v53 = vadd.f32 %v7920_v16, %v4195_v47 }
 0x780   : > { %v9094_v44 = vpop.f32.mrf.mxu1  ;;  %v4665_v22 = vsel %vm1615_vm0, %v4209_v53, 0.0  ;;  %v4208_v9 = vadd.f32 %v7920_v16, %v4194_v43 }
 0x781   : > { %v4197_v60 = vadd.f32 %v9094_v44, %v10903_v12  ;;  %4666 = vadd.xlane.f32.xlu1 %v4665_v22 }
 0x782   : > { %v4165_v1 = vpop.f32.mrf.mxu1  ;;  %v4662_v34 = vsel %vm1615_vm0, %v4208_v9, 0.0 }
 0x783   : > { %v4196_v50 = vadd.f32 %v4165_v1, %v10880_v32  ;;  %4663 = vadd.xlane.f32.xlu0 %v4662_v34  ;;  %v4211_v15 = vadd.f32 %v7920_v16, %v4197_v60 }
 0x784   : > { %v9097_v20 = vpop.f32.mrf.mxu1 }
 0x785   : > { %v4199_v11 = vadd.f32 %v9097_v20, %v10929_v48  ;;  %v4671_v14 = vsel %vm1615_vm0, %v4211_v15, 0.0  ;;  %v4210_v0 = vadd.f32 %v7920_v16, %v4196_v50 }
 0x786   : > { %4672 = vadd.xlane.f32.xlu1 %v4671_v14  ;;  %v4175_v61 = vpop.f32.mrf.mxu1 }
 0x787   : > { %v4198_v2 = vadd.f32 %v4175_v61, %v10906_v57  ;;  %v4668_v12 = vsel %vm1615_vm0, %v4210_v0, 0.0  ;;  %v4213_v33 = vadd.f32 %v7920_v16, %v4199_v11 }
 0x788   : > { %v9100_v31 = vpop.f32.mrf.mxu1  ;;  %4669 = vadd.xlane.f32.xlu0 %v4668_v12 }
 0x789   : > { %v4201_v21 = vadd.f32 %v9100_v31, %v10953_v39  ;;  %v4677_v32 = vsel %vm1615_vm0, %v4213_v33, 0.0  ;;  %v4212_v4 = vadd.f32 %v7920_v16, %v4198_v2 }
 0x78a   : > { %4678 = vadd.xlane.f32.xlu1 %v4677_v32  ;;  %v4185_v3 = vpop.f32.mrf.mxu1 }
 0x78b   : > { %v4200_v48 = vadd.f32 %v4185_v3, %v10932_v29  ;;  %v4674_v58 = vsel %vm1615_vm0, %v4212_v4, 0.0  ;;  %v4215_v59 = vadd.f32 %v7920_v16, %v4201_v21  ;;  %v11217_v3 = vld [vmem:[%s12109_s1] ss:$0 sm:$0xff]  ;;  %s12113_s1 = sld [smem:[#allocation16_spill]] }
 0x78c   : > { %4675 = vadd.xlane.f32.xlu0 %v4674_v58 }
 0x78d   : > { %v4683_v57 = vsel %vm1615_vm0, %v4215_v59, 0.0  ;;  %v4214_v46 = vadd.f32 %v7920_v16, %v4200_v48 }
 0x78e   : > { %4684 = vadd.xlane.f32.xlu1 %v4683_v57 }
 0x78f   : > { %v4680_v37 = vsel %vm1615_vm0, %v4214_v46, 0.0 }
 0x790   : > { %4681 = vadd.xlane.f32.xlu0 %v4680_v37 }
 0x80a   : > { %v4667_v63 = vpop.xlane.xlu1 %4666 }
 0x80b   : > { %v4687_v39 = vmul.f32 0.03125, %v4667_v63 }
 0x80c   : > { %v4664_v42 = vpop.xlane.xlu0 %4663 }
 0x80d   : > { %v11180_v7 = vsub.f32 %v4209_v53, %v4687_v39  ;;  %v4686_v62 = vmul.f32 0.03125, %v4664_v42 }
 0x80f   : > { %v11182_v49 = vsub.f32 %v4208_v9, %v4686_v62  ;;  %v4673_v29 = vpop.xlane.xlu1 %4672  ;;  %v4703_v18 = vmul.f32 %v11180_v7, %v11180_v7 }
 0x810   : > { %v4689_v40 = vmul.f32 0.03125, %v4673_v29 }
 0x811   : > { %v4670_v55 = vpop.xlane.xlu0 %4669  ;;  %v4713_v23 = vsel %vm1615_vm0, %v4703_v18, 0.0  ;;  %v4702_v28 = vmul.f32 %v11182_v49, %v11182_v49 }
 0x812   : > { %v11189_v41 = vsub.f32 %v4211_v15, %v4689_v40  ;;  %v4688_v16 = vmul.f32 0.03125, %v4670_v55  ;;  %4714 = vadd.xlane.f32.xlu1 %v4713_v23 }
 0x813   : > { %v4679_v47 = vpop.xlane.xlu1 %4678  ;;  %v4710_v45 = vsel %vm1615_vm0, %v4702_v28, 0.0 }
 0x814   : > { %v11192_v43 = vsub.f32 %v4210_v0, %v4688_v16  ;;  %v4691_v53 = vmul.f32 0.03125, %v4679_v47  ;;  %4711 = vadd.xlane.f32.xlu0 %v4710_v45  ;;  %v4705_v44 = vmul.f32 %v11189_v41, %v11189_v41 }
 0x815   : > { %v4676_v22 = vpop.xlane.xlu0 %4675 }
 0x816   : > { %v11196_v9 = vsub.f32 %v4213_v33, %v4691_v53  ;;  %v4690_v60 = vmul.f32 0.03125, %v4676_v22  ;;  %v4719_v1 = vsel %vm1615_vm0, %v4705_v44, 0.0  ;;  %v4704_v34 = vmul.f32 %v11192_v43, %v11192_v43 }
 0x817   : > { %4720 = vadd.xlane.f32.xlu1 %v4719_v1  ;;  %v4685_v50 = vpop.xlane.xlu1 %4684 }
 0x818   : > { %v11201_v15 = vsub.f32 %v4212_v4, %v4690_v60  ;;  %v4693_v20 = vmul.f32 0.03125, %v4685_v50  ;;  %v4716_v11 = vsel %vm1615_vm0, %v4704_v34, 0.0  ;;  %v4707_v14 = vmul.f32 %v11196_v9, %v11196_v9 }
 0x819   : > { %4717 = vadd.xlane.f32.xlu0 %v4716_v11  ;;  %v4682_v0 = vpop.xlane.xlu0 %4681 }
 0x81a   : > { %v11206_v61 = vsub.f32 %v4215_v59, %v4693_v20  ;;  %v4692_v2 = vmul.f32 0.03125, %v4682_v0  ;;  %v4725_v12 = vsel %vm1615_vm0, %v4707_v14, 0.0  ;;  %v4706_v33 = vmul.f32 %v11201_v15, %v11201_v15 }
 0x81b   : > { %4726 = vadd.xlane.f32.xlu1 %v4725_v12  ;;  %v5045_v12 = vld [vmem:[%s12111_s18 + $0x18] sm:$0xff] }
 0x81c   : > { %v11211_v31 = vsub.f32 %v4214_v46, %v4692_v2  ;;  %v9151_v21 = vpop.f32.mrf.mxu1  ;;  %v4722_v32 = vsel %vm1615_vm0, %v4706_v33, 0.0  ;;  %v4709_v4 = vmul.f32 %v11206_v61, %v11206_v61  ;;  %9193 = vmatprep.subr.mxu1 %v5045_v12 }
 0x81d   : > { %v4625_v48 = vadd.f32 %v9151_v21, %v11029_v10  ;;  %4723 = vadd.xlane.f32.xlu0 %v4722_v32  ;;  %9194 = vmatpush3.msra.mxu1 %v5045_v12 }
 0x81e   : > { %v4731_v58 = vsel %vm1615_vm0, %v4709_v4, 0.0  ;;  %v4545_v59 = vpop.f32.mrf.mxu1  ;;  %v4708_v57 = vmul.f32 %v11211_v31, %v11211_v31  ;;  %v5040_v4 = vld [vmem:[%s12110_s16 + $0x10] sm:$0xff] }
 0x81f   : > { %4732 = vadd.xlane.f32.xlu1 %v4731_v58  ;;  %v4624_v46 = vadd.f32 %v4545_v59, %v11021_v8  ;;  %v11225_v37 = vadd.f32 %v11217_v3, %v4625_v48  ;;  %v5044_v48 = vld [vmem:[%s12111_s18 + $0x10] sm:$0xff] }
 0x820   : > { %v9154_v63 = vpop.f32.mrf.mxu1  ;;  %v4728_v39 = vsel %vm1615_vm0, %v4708_v57, 0.0  ;;  %9195 = vmatprep.subr.mxu1 %v5044_v48 }
 0x821   : > { %v4627_v42 = vadd.f32 %v9154_v63, %v11043_v51  ;;  %4729 = vadd.xlane.f32.xlu0 %v4728_v39  ;;  %v4793_v10 = vsel %vm1615_vm0, %v11225_v37, 0.0  ;;  %v11232_v62 = vadd.f32 %v11217_v3, %v4624_v46  ;;  %v5039_v46 = vld [vmem:[%s12110_s16 + $0x8] sm:$0xff]  ;;  %9196 = vmatpush3.msra.mxu1 %v5044_v48 }
 0x822   : > { %v4555_v29 = vpop.f32.mrf.mxu1  ;;  %v5043_v63 = vld [vmem:[%s12111_s18 + $0x8] sm:$0xff] }
 0x823   : > { %4794 = vadd.xlane.f32.xlu1 %v4793_v10  ;;  %v4626_v18 = vadd.f32 %v4555_v29, %v11033_v17  ;;  %v4790_v8 = vsel %vm1615_vm0, %v11232_v62, 0.0  ;;  %v11238_v40 = vadd.f32 %v11217_v3, %v4627_v42  ;;  %v5038_v29 = vld [vmem:[%s12110_s16] sm:$0xff]  ;;  %9197 = vmatprep.subr.mxu1 %v5043_v63 }
 0x824   : > { %v9157_v55 = vpop.f32.mrf.mxu1  ;;  %9198 = vmatpush3.msra.mxu1 %v5043_v63 }
 0x825   : > { %v4629_v51 = vadd.f32 %v9157_v55, %v11057_v54  ;;  %4791 = vadd.xlane.f32.xlu0 %v4790_v8  ;;  %v4799_v23 = vsel %vm1615_vm0, %v11238_v40, 0.0  ;;  %v11244_v28 = vadd.f32 %v11217_v3, %v4626_v18  ;;  %v5042_v18 = vld [vmem:[%s12111_s18] sm:$0xff] }
 0x826   : > { %v4565_v16 = vpop.f32.mrf.mxu1  ;;  %9199 = vmatprep.subr.mxu1 %v5042_v18 }
 0x827   : > { %4800 = vadd.xlane.f32.xlu1 %v4799_v23  ;;  %v4628_v17 = vadd.f32 %v4565_v16, %v11047_v35  ;;  %v4796_v47 = vsel %vm1615_vm0, %v11244_v28, 0.0  ;;  %v11250_v45 = vadd.f32 %v11217_v3, %v4629_v51  ;;  %9200 = vmatpush3.msra.mxu1 %v5042_v18  ;;  %v11333_v18 = vld [vmem:[%s12102_s0] sm:$0xff]  ;;  %s12118_s0 = sld [smem:[#allocation19_spill]] }
 0x828   : > { %v9160_v53 = vpop.f32.mrf.mxu1 }
 0x829   : > { %v4631_v54 = vadd.f32 %v9160_v53, %v11071_v25  ;;  %4797 = vadd.xlane.f32.xlu0 %v4796_v47  ;;  %v4805_v44 = vsel %vm1615_vm0, %v11250_v45, 0.0  ;;  %v11256_v22 = vadd.f32 %v11217_v3, %v4628_v17 }
 0x82a   : > { %v4575_v60 = vpop.f32.mrf.mxu1 }
 0x82b   : > { %4806 = vadd.xlane.f32.xlu1 %v4805_v44  ;;  %v4630_v35 = vadd.f32 %v4575_v60, %v11061_v13  ;;  %v4802_v1 = vsel %vm1615_vm0, %v11256_v22, 0.0  ;;  %v11262_v34 = vadd.f32 %v11217_v3, %v4631_v54 }
 0x82c   : > { %v9163_v25 = vpop.f32.mrf.mxu1 }
 0x82d   : > { %v4633_v50 = vadd.f32 %v9163_v25, %v11085_v52  ;;  %4803 = vadd.xlane.f32.xlu0 %v4802_v1  ;;  %v4811_v20 = vsel %vm1615_vm0, %v11262_v34, 0.0  ;;  %v11268_v11 = vadd.f32 %v11217_v3, %v4630_v35  ;;  %v5041_v52 = vld [vmem:[%s12110_s16 + $0x18] sm:$0xff] }
 0x82e   : > { %v4585_v14 = vpop.f32.mrf.mxu1  ;;  %9173 = vmatprep.subr.mxu0 %v5041_v52  ;;  %v11328_v1 = vld [vmem:[%s12112_s22 + $0x18] sm:$0xff] }
 0x82f   : > { %4812 = vadd.xlane.f32.xlu1 %v4811_v20  ;;  %v4632_v13 = vadd.f32 %v4585_v14, %v11075_v56  ;;  %v4808_v0 = vsel %vm1615_vm0, %v11268_v11, 0.0  ;;  %v11274_v2 = vadd.f32 %v11217_v3, %v4633_v50  ;;  %9174 = vmatpush3.msra.mxu0 %v5041_v52 }
 0x830   : > { %v9166_v33 = vpop.f32.mrf.mxu1  ;;  %9175 = vmatprep.subr.mxu0 %v5040_v4 }
 0x831   : > { %v4635_v21 = vadd.f32 %v9166_v33, %v11099_v19  ;;  %4809 = vadd.xlane.f32.xlu0 %v4808_v0  ;;  %v4817_v32 = vsel %vm1615_vm0, %v11274_v2, 0.0  ;;  %v11282_v56 = vadd.f32 %v11217_v3, %v4632_v13  ;;  %9176 = vmatpush3.msra.mxu0 %v5040_v4 }
 0x832   : > { %v4595_v58 = vpop.f32.mrf.mxu1  ;;  %9177 = vmatprep.subr.mxu0 %v5039_v46 }
 0x833   : > { %4818 = vadd.xlane.f32.xlu1 %v4817_v32  ;;  %v4634_v59 = vadd.f32 %v4595_v58, %v11089_v24  ;;  %v4814_v19 = vsel %vm1615_vm0, %v11282_v56, 0.0  ;;  %v11290_v57 = vadd.f32 %v11217_v3, %v4635_v21  ;;  %9178 = vmatpush3.msra.mxu0 %v5039_v46 }
 0x834   : > { %v9169_v39 = vpop.f32.mrf.mxu1  ;;  %9179 = vmatprep.subr.mxu0 %v5038_v29 }
 0x835   : > { %v4637_v42 = vadd.f32 %v9169_v39, %v11113_v38  ;;  %4815 = vadd.xlane.f32.xlu0 %v4814_v19  ;;  %v4823_v10 = vsel %vm1615_vm0, %v11290_v57, 0.0  ;;  %v11298_v24 = vadd.f32 %v11217_v3, %v4634_v59  ;;  %9180 = vmatpush3.msra.mxu0 %v5038_v29  ;;  %v4768_v19 = vsub.s32 4, %v10824_v30 }
 0x836   : > { %v4605_v8 = vpop.f32.mrf.mxu1  ;;  %9213 = vmatprep.subr.mxu0 %v11328_v1 }
 0x837   : > { %4824 = vadd.xlane.f32.xlu1 %v4823_v10  ;;  %v4636_v55 = vadd.f32 %v4605_v8, %v11103_v6  ;;  %v4820_v51 = vsel %vm1615_vm0, %v11298_v24, 0.0  ;;  %v11306_v38 = vadd.f32 %v11217_v3, %v4637_v42  ;;  %v11338_v8 = vrot.slane %v11333_v18, %v4768_v19 }
 0x838   : > { %v9172_v23 = vpop.f32.mrf.mxu1 }
 0x839   : > { %v4639_v16 = vadd.f32 %v9172_v23, %v11125_v26  ;;  %4821 = vadd.xlane.f32.xlu0 %v4820_v51  ;;  %v4829_v17 = vsel %vm1615_vm0, %v11306_v38, 0.0  ;;  %v11312_v47 = vadd.f32 %v11217_v3, %v4636_v55  ;;  %v4780_v51 = vsub.s32 5, %v10824_v30 }
 0x83a   : > { %v4615_v6 = vpop.f32.mrf.mxu1 }
 0x83b   : > { %4830 = vadd.xlane.f32.xlu1 %v4829_v17  ;;  %v4638_v53 = vadd.f32 %v4615_v6, %v11117_v5  ;;  %v4826_v54 = vsel %vm1615_vm0, %v11312_v47, 0.0  ;;  %v11318_v44 = vadd.f32 %v11217_v3, %v4639_v16 }
 0x83d   : > { %4827 = vadd.xlane.f32.xlu0 %v4826_v54  ;;  %v4835_v26 = vsel %vm1615_vm0, %v11318_v44, 0.0  ;;  %v11323_v60 = vadd.f32 %v11217_v3, %v4638_v53 }
 0x83f   : > { %4836 = vadd.xlane.f32.xlu1 %v4835_v26  ;;  %v4832_v35 = vsel %vm1615_vm0, %v11323_v60, 0.0 }
 0x841   : > { %4833 = vadd.xlane.f32.xlu0 %v4832_v35 }
 0x89b   : > { %v4715_v5 = vpop.xlane.xlu1 %4714 }
 0x89c   : > { %v4735_v25 = vmul.f32 0.03125, %v4715_v5 }
 0x89d   : > { %v4712_v50 = vpop.xlane.xlu0 %4711 }
 0x89e   : > { %v4743_v20 = vadd.f32 1e-05, %v4735_v25  ;;  %v4734_v14 = vmul.f32 0.03125, %v4712_v50 }
 0x8a0   : > { %9762 = vrsqrt.f32 %v4743_v20  ;;  %v4742_v13 = vadd.f32 1e-05, %v4734_v14  ;;  %v4721_v0 = vpop.xlane.xlu1 %4720  ;;  %v11350_v20 = vrot.slane %v11333_v18, %v4780_v51 }
 0x8a1   : > { %v4737_v52 = vmul.f32 0.03125, %v4721_v0 }
 0x8a2   : > { %9764 = vrsqrt.f32 %v4742_v13  ;;  %v4718_v3 = vpop.xlane.xlu0 %4717 }
 0x8a3   : > { %v4745_v12 = vadd.f32 1e-05, %v4737_v52  ;;  %v4736_v33 = vmul.f32 0.03125, %v4718_v3 }
 0x8a4   : > { %v4727_v21 = vpop.xlane.xlu1 %4726 }
 0x8a5   : > { %9766 = vrsqrt.f32 %v4745_v12  ;;  %v4744_v32 = vadd.f32 1e-05, %v4736_v33  ;;  %v4739_v4 = vmul.f32 0.03125, %v4727_v21 }
 0x8a6   : > { %v4724_v48 = vpop.xlane.xlu0 %4723 }
 0x8a7   : > { %9768 = vrsqrt.f32 %v4744_v32  ;;  %v4747_v58 = vadd.f32 1e-05, %v4739_v4  ;;  %v4738_v59 = vmul.f32 0.03125, %v4724_v48 }
 0x8a8   : > { %v4733_v46 = vpop.xlane.xlu1 %4732 }
 0x8a9   : > { %9770 = vrsqrt.f32 %v4747_v58  ;;  %v4746_v63 = vadd.f32 1e-05, %v4738_v59  ;;  %v4741_v39 = vmul.f32 0.03125, %v4733_v46 }
 0x8aa   : > { %v4730_v42 = vpop.xlane.xlu0 %4729 }
 0x8ab   : > { %9772 = vrsqrt.f32 %v4746_v63  ;;  %v4749_v10 = vadd.f32 1e-05, %v4741_v39  ;;  %v4740_v29 = vmul.f32 0.03125, %v4730_v42 }
 0x8ac   : > { %v4795_v55 = vpop.xlane.xlu1 %4794 }
 0x8ad   : > { %v9763_v23 = vpop.eup %9762  ;;  %9774 = vrsqrt.f32 %v4749_v10  ;;  %v4748_v16 = vadd.f32 1e-05, %v4740_v29  ;;  %v4839_v17 = vmul.f32 0.03125, %v4795_v55 }
 0x8ae   : > { %v4759_v6 = vmul.f32 %v9763_v23, %v11180_v7  ;;  %v4792_v53 = vpop.xlane.xlu0 %4791  ;;  %v5048_v23 = vld [vmem:[%s12112_s22 + $0x10] sm:$0xff] }
 0x8af   : > { %v9765_v54 = vpop.eup %9764  ;;  %9776 = vrsqrt.f32 %v4748_v16  ;;  %v11343_v26 = vsub.f32 %v11225_v37, %v4839_v17  ;;  %v4838_v35 = vmul.f32 0.03125, %v4792_v53 }
 0x8b0   : > { %v4771_v5 = vmul.f32 %v11338_v8, %v4759_v6  ;;  %v4801_v25 = vpop.xlane.xlu1 %4800  ;;  %v4758_v50 = vmul.f32 %v9765_v54, %v11182_v49 }
 0x8b1   : > { %v11353_v14 = vsub.f32 %v11232_v62, %v4838_v35  ;;  %v4841_v7 = vmul.f32 0.03125, %v4801_v25  ;;  %v4871_v13 = vmul.f32 %v11343_v26, %v11343_v26 }
 0x8b2   : > { %v9767_v37 = vpop.eup %9766  ;;  %v4798_v0 = vpop.xlane.xlu0 %4797  ;;  %v4770_v52 = vmul.f32 %v11338_v8, %v4758_v50  ;;  %v11368_v4 = vadd.f32 %v11350_v20, %v4771_v5 }
 0x8b3   : > { %v11359_v3 = vsub.f32 %v11238_v40, %v4841_v7  ;;  %v4840_v49 = vmul.f32 0.03125, %v4798_v0  ;;  %v4889_v12 = vsel %vm1615_vm0, %v4871_v13, 0.0  ;;  %v4870_v33 = vmul.f32 %v11353_v14, %v11353_v14 }
 0x8b4   : > { %v9769_v21 = vpop.eup %9768  ;;  %v4807_v62 = vpop.xlane.xlu1 %4806  ;;  %4890 = vadd.xlane.f32.xlu1 %v4889_v12  ;;  %v11365_v32 = vadd.f32 %v11350_v20, %v4770_v52  ;;  %v4761_v48 = vmul.f32 %v9767_v37, %v11189_v41 }
 0x8b5   : > { %v11372_v40 = vsub.f32 %v11244_v28, %v4840_v49  ;;  %v4843_v58 = vmul.f32 0.03125, %v4807_v62  ;;  %v4886_v59 = vsel %vm1615_vm0, %v4870_v33, 0.0  ;;  %v4873_v46 = vmul.f32 %v11359_v3, %v11359_v3  ;;  %v5047_v33 = vld [vmem:[%s12112_s22 + $0x8] sm:$0xff] }
 0x8b6   : > { %v9771_v63 = vpop.eup %9770  ;;  %4887 = vadd.xlane.f32.xlu0 %v4886_v59  ;;  %v4804_v39 = vpop.xlane.xlu0 %4803  ;;  %9181 = vmatprep.mubr.msk.f32.mxu0 %vm1615_vm0, %v11365_v32  ;;  %v4760_v42 = vmul.f32 %v9769_v21, %v11192_v43  ;;  %v4773_v41 = vmul.f32 %v11338_v8, %v4761_v48 }
 0x8b7   : > { %v11382_v28 = vsub.f32 %v11250_v45, %v4843_v58  ;;  %v4842_v10 = vmul.f32 0.03125, %v4804_v39  ;;  %9201 = vmatprep.mubr.msk.f32.mxu1 %vm1615_vm0, %v11365_v32  ;;  %v4895_v29 = vsel %vm1615_vm0, %v4873_v46, 0.0  ;;  %9182 = vmatmul.mubr.msk.f32.vlgmr.msra.gmra.mxu0 %vm1615_vm0, %v11368_v4  ;;  %v4872_v55 = vmul.f32 %v11372_v40, %v11372_v40 }
 0x8b8   : > { %v9773_v16 = vpop.eup %9772  ;;  %v4813_v43 = vpop.xlane.xlu1 %4812  ;;  %4896 = vadd.xlane.f32.xlu1 %v4895_v29  ;;  %9202 = vmatmul.mubr.msk.f32.vlgmr.msra.gmra.mxu1 %vm1615_vm0, %v11368_v4  ;;  %v4772_v45 = vmul.f32 %v11338_v8, %v4760_v42  ;;  %v11396_v17 = vadd.f32 %v11350_v20, %v4773_v41  ;;  %v4763_v6 = vmul.f32 %v9771_v63, %v11196_v9 }
 0x8b9   : > { %v11400_v53 = vsub.f32 %v11256_v22, %v4842_v10  ;;  %v4845_v54 = vmul.f32 0.03125, %v4813_v43  ;;  %v4892_v35 = vsel %vm1615_vm0, %v4872_v55, 0.0  ;;  %v4875_v5 = vmul.f32 %v11382_v28, %v11382_v28  ;;  %9214 = vmatpush3.msra.mxu0 %v11328_v1 }
 0x8ba   : > { %v9775_v25 = vpop.eup %9774  ;;  %4893 = vadd.xlane.f32.xlu0 %v4892_v35  ;;  %v4810_v50 = vpop.xlane.xlu0 %4809  ;;  %v11407_v7 = vadd.f32 %v11350_v20, %v4772_v45  ;;  %v4762_v9 = vmul.f32 %v9773_v16, %v11201_v15  ;;  %v4775_v22 = vmul.f32 %v11338_v8, %v4763_v6  ;;  %9215 = vmatprep.subr.mxu0 %v5048_v23 }
 0x8bb   : > { %v11412_v13 = vsub.f32 %v11262_v34, %v4845_v54  ;;  %v4844_v37 = vmul.f32 0.03125, %v4810_v50  ;;  %v4901_v0 = vsel %vm1615_vm0, %v4875_v5, 0.0  ;;  %v4874_v1 = vmul.f32 %v11400_v53, %v11400_v53  ;;  %9216 = vmatpush3.msra.mxu0 %v5048_v23  ;;  %v5046_v5 = vld [vmem:[%s12112_s22] sm:$0xff] }
 0x8bc   : > { %v9777_v52 = vpop.eup %9776  ;;  %9184 = vmatprep.mubr.msk.f32.mxu0 %vm1615_vm0, %v11407_v7  ;;  %9204 = vmatprep.mubr.msk.f32.mxu1 %vm1615_vm0, %v11407_v7  ;;  %v4819_v15 = vpop.xlane.xlu1 %4818  ;;  %v4774_v49 = vmul.f32 %v11338_v8, %v4762_v9  ;;  %v11423_v34 = vadd.f32 %v11350_v20, %v4775_v22  ;;  %v4765_v12 = vmul.f32 %v9775_v25, %v11206_v61 }
 0x8bd   : > { %v11428_v21 = vsub.f32 %v11268_v11, %v4844_v37  ;;  %v4847_v62 = vmul.f32 0.03125, %v4819_v15  ;;  %4902 = vadd.xlane.f32.xlu1 %v4901_v0  ;;  %9185 = vmatmul.mubr.msk.f32.gmra.mxu0 %vm1615_vm0, %v11396_v17  ;;  %v4898_v48 = vsel %vm1615_vm0, %v4874_v1, 0.0  ;;  %v4877_v58 = vmul.f32 %v11412_v13, %v11412_v13 }
 0x8be   : > { %9205 = vmatmul.mubr.msk.f32.gmra.mxu1 %vm1615_vm0, %v11396_v17  ;;  %4899 = vadd.xlane.f32.xlu0 %v4898_v48  ;;  %v4816_v59 = vpop.xlane.xlu0 %4815  ;;  %v11438_v61 = vadd.f32 %v11350_v20, %v4774_v49  ;;  %v4764_v11 = vmul.f32 %v9777_v52, %v11211_v31  ;;  %v4777_v46 = vmul.f32 %v11338_v8, %v4765_v12 }
 0x8bf   : > { %v11443_v63 = vsub.f32 %v11274_v2, %v4847_v62  ;;  %v4846_v39 = vmul.f32 0.03125, %v4816_v59  ;;  %v4907_v42 = vsel %vm1615_vm0, %v4877_v58, 0.0  ;;  %v4876_v41 = vmul.f32 %v11428_v21, %v11428_v21  ;;  %9217 = vmatprep.subr.mxu0 %v5047_v33 }
 0x8c0   : > { %9187 = vmatprep.mubr.msk.f32.mxu0 %vm1615_vm0, %v11438_v61  ;;  %9207 = vmatprep.mubr.msk.f32.mxu1 %vm1615_vm0, %v11438_v61  ;;  %v4825_v10 = vpop.xlane.xlu1 %4824  ;;  %v4776_v31 = vmul.f32 %v11338_v8, %v4764_v11 }
 0x8c1   : > { %v11454_v29 = vsub.f32 %v11282_v56, %v4846_v39  ;;  %v4849_v2 = vmul.f32 0.03125, %v4825_v10  ;;  %4908 = vadd.xlane.f32.xlu1 %v4907_v42  ;;  %9188 = vmatmul.mubr.msk.f32.gmra.mxu0 %vm1615_vm0, %v11423_v34  ;;  %v4904_v55 = vsel %vm1615_vm0, %v4876_v41, 0.0  ;;  %v4879_v23 = vmul.f32 %v11443_v63, %v11443_v63  ;;  %v5053_v39 = vld [vmem:[%s12113_s1 + $0x18] sm:$0xff]  ;;  %v5052_v42 = vld [vmem:[%s12113_s1 + $0x10] sm:$0xff]  ;;  %v5051_v41 = vld [vmem:[%s12113_s1 + $0x8] sm:$0xff] }
 0x8c2   : > { %9208 = vmatmul.mubr.msk.f32.gmra.mxu1 %vm1615_vm0, %v11423_v34  ;;  %4905 = vadd.xlane.f32.xlu0 %v4904_v55  ;;  %v4822_v16 = vpop.xlane.xlu0 %4821  ;;  %v11464_v8 = vadd.f32 %v11350_v20, %v4776_v31  ;;  %v11467_v56 = vadd.f32 %v11350_v20, %v4777_v46  ;;  %v9915_v10 = vld [vmem:[%s10327_s23] sm:$0xff] }
 0x8c3   : > { %v11470_v43 = vsub.f32 %v11290_v57, %v4849_v2  ;;  %v4848_v45 = vmul.f32 0.03125, %v4822_v16  ;;  %v4913_v6 = vsel %vm1615_vm0, %v4879_v23, 0.0  ;;  %9218 = vmatpush3.msra.mxu0 %v5047_v33  ;;  %v4878_v54 = vmul.f32 %v11454_v29, %v11454_v29  ;;  %9233 = vmatprep.subr.mxu1 %v5053_v39  ;;  %v5050_v31 = vld [vmem:[%s12113_s1] sm:$0xff]  ;;  %s12123_s1 = sld [smem:[#allocation26_spill]] }
 0x8c4   : > { %9190 = vmatprep.mubr.msk.f32.mxu0 %vm1615_vm0, %v11464_v8  ;;  %9210 = vmatprep.mubr.msk.f32.mxu1 %vm1615_vm0, %v11464_v8  ;;  %v4831_v35 = vpop.xlane.xlu1 %4830 }
 0x8c5   : > { %v11481_v20 = vsub.f32 %v11298_v24, %v4848_v45  ;;  %v4851_v57 = vmul.f32 0.03125, %v4831_v35  ;;  %4914 = vadd.xlane.f32.xlu1 %v4913_v6  ;;  %9191 = vmatmul.mubr.msk.f32.gmra.mxu0 %vm1615_vm0, %v11467_v56  ;;  %v4910_v25 = vsel %vm1615_vm0, %v4878_v54, 0.0  ;;  %v4881_v50 = vmul.f32 %v11470_v43, %v11470_v43 }
 0x8c6   : > { %9211 = vmatmul.mubr.msk.f32.gmra.mxu1 %vm1615_vm0, %v11467_v56  ;;  %9221 = vmatprep.mubr.msk.f32.mxu0 %vm1615_vm0, %v11365_v32  ;;  %v4828_v9 = vpop.xlane.xlu0 %4827 }
 0x8c7   : > { %v11493_v24 = vsub.f32 %v11306_v38, %v4851_v57  ;;  %9219 = vmatprep.subr.mxu0 %v5046_v5  ;;  %4911 = vadd.xlane.f32.xlu0 %v4910_v25  ;;  %v4850_v22 = vmul.f32 0.03125, %v4828_v9  ;;  %v4919_v37 = vsel %vm1615_vm0, %v4881_v50, 0.0  ;;  %v4880_v0 = vmul.f32 %v11481_v20, %v11481_v20 }
 0x8c8   : > { %9220 = vmatpush3.msra.mxu0 %v5046_v5  ;;  %v4837_v1 = vpop.xlane.xlu1 %4836  ;;  %9234 = vmatpush3.msra.mxu1 %v5053_v39 }
 0x8c9   : > { %v11499_v52 = vsub.f32 %v11312_v47, %v4850_v22  ;;  %4920 = vadd.xlane.f32.xlu1 %v4919_v37  ;;  %v4853_v15 = vmul.f32 0.03125, %v4837_v1  ;;  %9222 = vmatmul.mubr.msk.f32.vlgmr.msra.gmra.mxu0 %vm1615_vm0, %v11368_v4  ;;  %v4916_v38 = vsel %vm1615_vm0, %v4880_v0, 0.0  ;;  %v4883_v49 = vmul.f32 %v11493_v24, %v11493_v24 }
 0x8ca   : > { %9224 = vmatprep.mubr.msk.f32.mxu0 %vm1615_vm0, %v11407_v7  ;;  %v4834_v12 = vpop.xlane.xlu0 %4833  ;;  %9235 = vmatprep.subr.mxu1 %v5052_v42 }
 0x8cb   : > { %v11509_v33 = vsub.f32 %v11318_v44, %v4853_v15  ;;  %4917 = vadd.xlane.f32.xlu0 %v4916_v38  ;;  %v4852_v47 = vmul.f32 0.03125, %v4834_v12  ;;  %v4925_v62 = vsel %vm1615_vm0, %v4883_v49, 0.0  ;;  %v4882_v48 = vmul.f32 %v11499_v52, %v11499_v52  ;;  %9236 = vmatpush3.msra.mxu1 %v5052_v42 }
 0x8cc   : > { %9237 = vmatprep.subr.mxu1 %v5051_v41  ;;  %v5000_v49 = vsub.s32 6, %v10824_v30 }
 0x8cd   : > { %v11515_v58 = vsub.f32 %v11323_v60, %v4852_v47  ;;  %4926 = vadd.xlane.f32.xlu1 %v4925_v62  ;;  %9225 = vmatmul.mubr.msk.f32.gmra.mxu0 %vm1615_vm0, %v11396_v17  ;;  %v4922_v59 = vsel %vm1615_vm0, %v4882_v48, 0.0  ;;  %v4885_v44 = vmul.f32 %v11509_v33, %v11509_v33 }
 0x8ce   : > { %9227 = vmatprep.mubr.msk.f32.mxu0 %vm1615_vm0, %v11438_v61  ;;  %9238 = vmatpush3.msra.mxu1 %v5051_v41 }
 0x8cf   : > { %4923 = vadd.xlane.f32.xlu0 %v4922_v59  ;;  %v4931_v11 = vsel %vm1615_vm0, %v4885_v44, 0.0  ;;  %v4884_v60 = vmul.f32 %v11515_v58, %v11515_v58  ;;  %9239 = vmatprep.subr.mxu1 %v5050_v31  ;;  %v5020_v59 = vsub.s32 7, %v10824_v30 }
 0x8d0   : > { %9240 = vmatpush3.msra.mxu1 %v5050_v31 }
 0x8d1   : > { %4932 = vadd.xlane.f32.xlu1 %v4931_v11  ;;  %9228 = vmatmul.mubr.msk.f32.gmra.mxu0 %vm1615_vm0, %v11423_v34  ;;  %v4928_v46 = vsel %vm1615_vm0, %v4884_v60, 0.0 }
 0x8d2   : > { %9230 = vmatprep.mubr.msk.f32.mxu0 %vm1615_vm0, %v11464_v8 }
 0x8d3   : > { %4929 = vadd.xlane.f32.xlu0 %v4928_v46  ;;  %v11543_v46 = vrot.slane %v11333_v18, %v5000_v49 }
 0x8d5   : > { %9231 = vmatmul.mubr.msk.f32.gmra.mxu0 %vm1615_vm0, %v11467_v56 }
 0x8d6   : > { %9281 = vmatprep.mubr.msk.f32.mxu0 %vm2148_vm1, %v9915_v10 }
 0x93d   : > { %v4891_v2 = vpop.xlane.xlu1 %4890 }
 0x93e   : > { %v4935_v55 = vmul.f32 0.03125, %v4891_v2 }
 0x93f   : > { %v4888_v23 = vpop.xlane.xlu0 %4887 }
 0x940   : > { %v4951_v16 = vadd.f32 1e-05, %v4935_v55  ;;  %v4934_v45 = vmul.f32 0.03125, %v4888_v23  ;;  %v11547_v55 = vrot.slane %v11333_v18, %v5020_v59 }
 0x941   : > { %v4897_v6 = vpop.xlane.xlu1 %4896 }
 0x942   : > { %9778 = vrsqrt.f32 %v4951_v16  ;;  %v4950_v54 = vadd.f32 1e-05, %v4934_v45  ;;  %v4937_v35 = vmul.f32 0.03125, %v4897_v6 }
 0x943   : > { %v4894_v5 = vpop.xlane.xlu0 %4893 }
 0x944   : > { %9780 = vrsqrt.f32 %v4950_v54  ;;  %v4953_v57 = vadd.f32 1e-05, %v4937_v35  ;;  %v4936_v25 = vmul.f32 0.03125, %v4894_v5 }
 0x946   : > { %9782 = vrsqrt.f32 %v4953_v57  ;;  %v4952_v50 = vadd.f32 1e-05, %v4936_v25  ;;  %v4903_v9 = vpop.xlane.xlu1 %4902 }
 0x947   : > { %v4939_v22 = vmul.f32 0.03125, %v4903_v9  ;;  %v4900_v37 = vpop.xlane.xlu0 %4899 }
 0x948   : > { %9784 = vrsqrt.f32 %v4952_v50  ;;  %v4938_v0 = vmul.f32 0.03125, %v4900_v37 }
 0x949   : > { %v4955_v1 = vadd.f32 1e-05, %v4939_v22 }
 0x94a   : > { %v4954_v15 = vadd.f32 1e-05, %v4938_v0  ;;  %v4909_v38 = vpop.xlane.xlu1 %4908 }
 0x94b   : > { %9786 = vrsqrt.f32 %v4955_v1  ;;  %v4941_v12 = vmul.f32 0.03125, %v4909_v38  ;;  %v4906_v47 = vpop.xlane.xlu0 %4905 }
 0x94c   : > { %9788 = vrsqrt.f32 %v4954_v15  ;;  %v4940_v62 = vmul.f32 0.03125, %v4906_v47 }
 0x94d   : > { %v4957_v48 = vadd.f32 1e-05, %v4941_v12 }
 0x94e   : > { %v4956_v44 = vadd.f32 1e-05, %v4940_v62  ;;  %v4915_v11 = vpop.xlane.xlu1 %4914 }
 0x94f   : > { %v9779_v60 = vpop.eup %9778  ;;  %9790 = vrsqrt.f32 %v4957_v48  ;;  %v4943_v39 = vmul.f32 0.03125, %v4915_v11 }
 0x950   : > { %v4983_v42 = vmul.f32 %v9779_v60, %v11343_v26  ;;  %9792 = vrsqrt.f32 %v4956_v44  ;;  %v4912_v41 = vpop.xlane.xlu0 %4911 }
 0x951   : > { %v9781_v10 = vpop.eup %9780  ;;  %v4959_v31 = vadd.f32 1e-05, %v4943_v39  ;;  %v4942_v2 = vmul.f32 0.03125, %v4912_v41 }
 0x952   : > { %v4921_v23 = vpop.xlane.xlu1 %4920  ;;  %v4982_v16 = vmul.f32 %v9781_v10, %v11353_v14  ;;  %v5003_v6 = vmul.f32 %v11543_v46, %v4983_v42 }
 0x953   : > { %v9783_v45 = vpop.eup %9782  ;;  %9794 = vrsqrt.f32 %v4959_v31  ;;  %v4958_v54 = vadd.f32 1e-05, %v4942_v2  ;;  %v4945_v35 = vmul.f32 0.03125, %v4921_v23 }
 0x954   : > { %v4918_v5 = vpop.xlane.xlu0 %4917  ;;  %v5002_v26 = vmul.f32 %v11543_v46, %v4982_v16  ;;  %v4985_v57 = vmul.f32 %v9783_v45, %v11359_v3  ;;  %v5023_v15 = vadd.f32 %v11547_v55, %v5003_v6 }
 0x955   : > { %v9785_v25 = vpop.eup %9784  ;;  %9796 = vrsqrt.f32 %v4958_v54  ;;  %v4961_v50 = vadd.f32 1e-05, %v4945_v35  ;;  %v4944_v9 = vmul.f32 0.03125, %v4918_v5 }
 0x956   : > { %v4927_v18 = vpop.xlane.xlu1 %4926  ;;  %v5022_v22 = vadd.f32 %v11547_v55, %v5002_v26  ;;  %v4984_v14 = vmul.f32 %v9785_v25, %v11372_v40  ;;  %v5005_v37 = vmul.f32 %v11543_v46, %v4985_v57 }
 0x957   : > { %9798 = vrsqrt.f32 %v4961_v50  ;;  %v4960_v0 = vadd.f32 1e-05, %v4944_v9  ;;  %v4947_v1 = vmul.f32 0.03125, %v4927_v18 }
 0x958   : > { %v9787_v38 = vpop.eup %9786  ;;  %v4924_v49 = vpop.xlane.xlu0 %4923  ;;  %9241 = vmatprep.mubr.msk.f32.mxu1 %vm1615_vm0, %v5022_v22  ;;  %v5004_v3 = vmul.f32 %v11543_v46, %v4984_v14  ;;  %v5025_v44 = vadd.f32 %v11547_v55, %v5005_v37 }
 0x959   : > { %v9789_v12 = vpop.eup %9788  ;;  %9800 = vrsqrt.f32 %v4960_v0  ;;  %v4963_v47 = vadd.f32 1e-05, %v4947_v1  ;;  %v4946_v62 = vmul.f32 0.03125, %v4924_v49  ;;  %9242 = vmatmul.mubr.msk.f32.vlgmr.msra.gmra.mxu1 %vm1615_vm0, %v5023_v15  ;;  %v4987_v40 = vmul.f32 %v9787_v38, %v11382_v28 }
 0x95a   : > { %v4933_v48 = vpop.xlane.xlu1 %4932  ;;  %v5024_v59 = vadd.f32 %v11547_v55, %v5004_v3  ;;  %v4986_v11 = vmul.f32 %v9789_v12, %v11400_v53 }
 0x95b   : > { %9802 = vrsqrt.f32 %v4963_v47  ;;  %v4962_v60 = vadd.f32 1e-05, %v4946_v62  ;;  %v4949_v39 = vmul.f32 0.03125, %v4933_v48  ;;  %v5007_v42 = vmul.f32 %v11543_v46, %v4987_v40 }
 0x95c   : > { %v9791_v41 = vpop.eup %9790  ;;  %v4930_v10 = vpop.xlane.xlu0 %4929  ;;  %9244 = vmatprep.mubr.msk.f32.mxu1 %vm1615_vm0, %v5024_v59  ;;  %v5006_v31 = vmul.f32 %v11543_v46, %v4986_v11 }
 0x95d   : > { %v9793_v2 = vpop.eup %9792  ;;  %9804 = vrsqrt.f32 %v4962_v60  ;;  %v4965_v28 = vadd.f32 1e-05, %v4949_v39  ;;  %v4948_v23 = vmul.f32 0.03125, %v4930_v10  ;;  %9245 = vmatmul.mubr.msk.f32.gmra.mxu1 %vm1615_vm0, %v5025_v44  ;;  %v4989_v45 = vmul.f32 %v9791_v41, %v11412_v13 }
 0x95e   : > { %v5026_v16 = vadd.f32 %v11547_v55, %v5006_v31  ;;  %v4988_v53 = vmul.f32 %v9793_v2, %v11428_v21  ;;  %v5027_v54 = vadd.f32 %v11547_v55, %v5007_v42 }
 0x95f   : > { %9806 = vrsqrt.f32 %v4965_v28  ;;  %v4964_v6 = vadd.f32 1e-05, %v4948_v23  ;;  %v5009_v26 = vmul.f32 %v11543_v46, %v4989_v45 }
 0x960   : > { %v9795_v35 = vpop.eup %9794  ;;  %9247 = vmatprep.mubr.msk.f32.mxu1 %vm1615_vm0, %v5026_v16  ;;  %v5008_v5 = vmul.f32 %v11543_v46, %v4988_v53 }
 0x961   : > { %v4991_v57 = vmul.f32 %v9795_v35, %v11443_v63  ;;  %9808 = vrsqrt.f32 %v4964_v6  ;;  %9248 = vmatmul.mubr.msk.f32.gmra.mxu1 %vm1615_vm0, %v5027_v54  ;;  %v5029_v13 = vadd.f32 %v11547_v55, %v5009_v26 }
 0x962   : > { %v9797_v25 = vpop.eup %9796  ;;  %v5028_v21 = vadd.f32 %v11547_v55, %v5008_v5 }
 0x963   : > { %v4990_v50 = vmul.f32 %v9797_v25, %v11454_v29  ;;  %v5011_v18 = vmul.f32 %v11543_v46, %v4991_v57 }
 0x964   : > { %v9799_v9 = vpop.eup %9798  ;;  %9250 = vmatprep.mubr.msk.f32.mxu1 %vm1615_vm0, %v5028_v21 }
 0x965   : > { %v4993_v22 = vmul.f32 %v9799_v9, %v11470_v43  ;;  %9251 = vmatmul.mubr.msk.f32.gmra.mxu1 %vm1615_vm0, %v5029_v13  ;;  %v5010_v63 = vmul.f32 %v11543_v46, %v4990_v50  ;;  %v5031_v15 = vadd.f32 %v11547_v55, %v5011_v18  ;;  %v9917_v18 = vld [vmem:[%s10327_s23 + $0x8] sm:$0xff] }
 0x966   : > { %v9801_v14 = vpop.eup %9800 }
 0x967   : > { %v5030_v37 = vadd.f32 %v11547_v55, %v5010_v63  ;;  %v4992_v0 = vmul.f32 %v9801_v14, %v11481_v20  ;;  %v5013_v29 = vmul.f32 %v11543_v46, %v4993_v22  ;;  %v11624_v22 = vld [vmem:[%s10330_s26 + $0x8] sm:$0xff]  ;;  %v9919_v14 = vld [vmem:[%s10327_s23 + $0x10] sm:$0xff] }
 0x968   : > { %v9803_v1 = vpop.eup %9802 }
 0x969   : > { %v4995_v38 = vmul.f32 %v9803_v1, %v11493_v24  ;;  %9253 = vmatprep.mubr.msk.f32.mxu1 %vm1615_vm0, %v5030_v37  ;;  %v5012_v43 = vmul.f32 %v11543_v46, %v4992_v0  ;;  %v5033_v20 = vadd.f32 %v11547_v55, %v5013_v29  ;;  %v11631_v37 = vld [vmem:[%s10330_s26 + $0x10] sm:$0xff]  ;;  %v9921_v0 = vld [vmem:[%s10043_s25 + $0x18] sm:$0xff]  ;;  %v9924_v29 = vld [vmem:[%s10327_s23 + $0x20] sm:$0xff] }
 0x96a   : > { %v9805_v49 = vpop.eup %9804  ;;  %9254 = vmatmul.mubr.msk.f32.gmra.mxu1 %vm1615_vm0, %v5031_v15  ;;  %v9922_v1 = vld [vmem:[%s10327_s23 + $0x18] sm:$0xff] }
 0x96b   : > { %v5032_v3 = vadd.f32 %v11547_v55, %v5012_v43  ;;  %v4994_v12 = vmul.f32 %v9805_v49, %v11499_v52  ;;  %v5015_v62 = vmul.f32 %v11543_v46, %v4995_v38  ;;  %v11639_v15 = vld [vmem:[%s10330_s26 + $0x18] sm:$0xff]  ;;  %v11646_v38 = vld [vmem:[%s10330_s26 + $0x20] sm:$0xff]  ;;  %v11651_v43 = vld [vmem:[%s10330_s26 + $0x28] sm:$0xff] }
 0x96c   : > { %v9807_v47 = vpop.eup %9806  ;;  %v9927_v49 = vld [vmem:[%s10327_s23 + $0x28] sm:$0xff] }
 0x96d   : > { %v4997_v40 = vmul.f32 %v9807_v47, %v11509_v33  ;;  %9256 = vmatprep.mubr.msk.f32.mxu1 %vm1615_vm0, %v5032_v3  ;;  %v5014_v24 = vmul.f32 %v11543_v46, %v4994_v12  ;;  %v5035_v52 = vadd.f32 %v11547_v55, %v5015_v62  ;;  %v9928_v3 = vld [vmem:[%s10327_s23 + $0x30] sm:$0xff]  ;;  %v9930_v47 = vld [vmem:[%s10330_s26 + $0x38] sm:$0xff]  ;;  %v9932_v62 = vld [vmem:[%s10327_s23 + $0x40] sm:$0xff] }
 0x96e   : > { %v9809_v48 = vpop.eup %9808  ;;  %9257 = vmatmul.mubr.msk.f32.gmra.mxu1 %vm1615_vm0, %v5033_v20  ;;  %v9929_v12 = vld [vmem:[%s10330_s26 + $0x30] sm:$0xff]  ;;  %v9931_v20 = vld [vmem:[%s10327_s23 + $0x38] sm:$0xff] }
 0x96f   : > { %v5034_v59 = vadd.f32 %v11547_v55, %v5014_v24  ;;  %v4996_v44 = vmul.f32 %v9809_v48, %v11515_v58  ;;  %v5017_v11 = vmul.f32 %v11543_v46, %v4997_v40  ;;  %v11613_v58 = vld [vmem:[%s10330_s26] sm:$0xff]  ;;  %v9934_v24 = vld [vmem:[%s10330_s26 + $0x48] sm:$0xff] }
 0x970   : > { %v9933_v40 = vld [vmem:[%s10330_s26 + $0x40] sm:$0xff]  ;;  %v9935_v48 = vld [vmem:[%s10327_s23 + $0x48] sm:$0xff] }
 0x971   : > { %9259 = vmatprep.mubr.msk.f32.mxu1 %vm1615_vm0, %v5034_v59  ;;  %v5016_v33 = vmul.f32 %v11543_v46, %v4996_v44  ;;  %v5037_v39 = vadd.f32 %v11547_v55, %v5017_v11  ;;  %v9936_v59 = vld [vmem:[%s10330_s26 + $0x50] sm:$0xff]  ;;  %v9939_v11 = vld [vmem:[%s10330_s26 + $0x58] sm:$0xff] }
 0x972   : > { %9260 = vmatmul.mubr.msk.f32.gmra.mxu1 %vm1615_vm0, %v5035_v52  ;;  %v9937_v44 = vld [vmem:[%s10327_s23 + $0x50] sm:$0xff] }
 0x973   : > { %v5036_v60 = vadd.f32 %v11547_v55, %v5016_v33  ;;  %v9938_v52 = vld [vmem:[%s10043_s25 + $0x10] sm:$0xff]  ;;  %v9940_v33 = vld [vmem:[%s10043_s25 + $0x8] sm:$0xff] }
 0x975   : > { %9262 = vmatprep.mubr.msk.f32.mxu1 %vm1615_vm0, %v5036_v60  ;;  %v9941_v60 = vld [vmem:[%s10327_s23 + $0x58] sm:$0xff] }
 0x976   : > { %9263 = vmatmul.mubr.msk.f32.gmra.mxu1 %vm1615_vm0, %v5037_v39  ;;  %v9942_v39 = vld [vmem:[%s10330_s26 + $0x60] sm:$0xff] }
 0x977   : > { %v9183_v42 = vpop.f32.mrf.mxu0  ;;  %9321 = vmatprep.mubr.msk.f32.mxu1 %vm2148_vm1, %v11613_v58 }
 0x978   : > { %v9203_v41 = vpop.f32.mrf.mxu1 }
 0x979   : > { %v5164_v10 = vpop.f32.mrf.mxu0 }
 0x97a   : > { %v5269_v31 = vpop.f32.mrf.mxu1 }
 0x97d   : > { %v9186_v46 = vpop.f32.mrf.mxu0 }
 0x97e   : > { %v9206_v2 = vpop.f32.mrf.mxu1 }
 0x97f   : > { %v5174_v28 = vpop.f32.mrf.mxu0 }
 0x980   : > { %v5279_v23 = vpop.f32.mrf.mxu1 }
 0x981   : > { %v9189_v16 = vpop.f32.mrf.mxu0 }
 0x982   : > { %v9209_v53 = vpop.f32.mrf.mxu1 }
 0x983   : > { %v5184_v55 = vpop.f32.mrf.mxu0 }
 0x984   : > { %v5289_v45 = vpop.f32.mrf.mxu1 }
 0x985   : > { %v9192_v6 = vpop.f32.mrf.mxu0 }
 0x986   : > { %v9212_v54 = vpop.f32.mrf.mxu1  ;;  %9265 = vmatprep.subr.mxu0 %v9192_v6 }
 0x987   : > { %9305 = vmatprep.subr.mxu1 %v9212_v54  ;;  %v5194_v35 = vpop.f32.mrf.mxu0  ;;  %9266 = vmatpush3.msra.mxu0 %v9192_v6 }
 0x988   : > { %v5299_v5 = vpop.f32.mrf.mxu1  ;;  %9306 = vmatpush3.msra.mxu1 %v9212_v54  ;;  %9267 = vmatprep.subr.mxu0 %v5194_v35 }
 0x989   : > { %9307 = vmatprep.subr.mxu1 %v5299_v5  ;;  %v11617_v26 = vpop.f32.mrf.mxu0  ;;  %9268 = vmatpush3.msra.mxu0 %v5194_v35 }
 0x98a   : > { %9308 = vmatpush3.msra.mxu1 %v5299_v5  ;;  %9269 = vmatprep.subr.mxu0 %v9189_v16 }
 0x98b   : > { %9309 = vmatprep.subr.mxu1 %v9209_v53  ;;  %v11619_v57 = vpop.f32.mrf.mxu0  ;;  %9270 = vmatpush3.msra.mxu0 %v9189_v16 }
 0x98c   : > { %9310 = vmatpush3.msra.mxu1 %v9209_v53  ;;  %9271 = vmatprep.subr.mxu0 %v5184_v55 }
 0x98d   : > { %9311 = vmatprep.subr.mxu1 %v5289_v45  ;;  %v9226_v25 = vpop.f32.mrf.mxu0  ;;  %9272 = vmatpush3.msra.mxu0 %v5184_v55 }
 0x98e   : > { %9312 = vmatpush3.msra.mxu1 %v5289_v45  ;;  %9273 = vmatprep.subr.mxu0 %v9186_v46 }
 0x98f   : > { %9313 = vmatprep.subr.mxu1 %v9206_v2  ;;  %v5384_v21 = vpop.f32.mrf.mxu0  ;;  %9274 = vmatpush3.msra.mxu0 %v9186_v46  ;;  %v9947_v46 = vld [vmem:[%s10330_s26 + $0x70] sm:$0xff] }
 0x990   : > { %9314 = vmatpush3.msra.mxu1 %v9206_v2  ;;  %9275 = vmatprep.subr.mxu0 %v5174_v28  ;;  %v9948_v2 = vld [vmem:[%s10327_s23 + $0x70] sm:$0xff] }
 0x991   : > { %9315 = vmatprep.subr.mxu1 %v5279_v23  ;;  %v9229_v13 = vpop.f32.mrf.mxu0  ;;  %9276 = vmatpush3.msra.mxu0 %v5174_v28  ;;  %v9949_v28 = vld [vmem:[%s10330_s26 + $0x78] sm:$0xff] }
 0x992   : > { %9316 = vmatpush3.msra.mxu1 %v5279_v23  ;;  %9277 = vmatprep.subr.mxu0 %v9183_v42  ;;  %v9950_v23 = vld [vmem:[%s10327_s23 + $0x78] sm:$0xff] }
 0x993   : > { %9317 = vmatprep.subr.mxu1 %v9203_v41  ;;  %v5394_v50 = vpop.f32.mrf.mxu0  ;;  %9278 = vmatpush3.msra.mxu0 %v9183_v42  ;;  %v9943_v42 = vld [vmem:[%s10327_s23 + $0x60] sm:$0xff] }
 0x994   : > { %9318 = vmatpush3.msra.mxu1 %v9203_v41  ;;  %9279 = vmatprep.subr.mxu0 %v5164_v10  ;;  %v9944_v41 = vld [vmem:[%s10043_s25] sm:$0xff] }
 0x995   : > { %9319 = vmatprep.subr.mxu1 %v5269_v31  ;;  %v9232_v9 = vpop.f32.mrf.mxu0  ;;  %9280 = vmatpush3.msra.mxu0 %v5164_v10  ;;  %v9945_v10 = vld [vmem:[%s10330_s26 + $0x68] sm:$0xff]  ;;  %s12115_s26 = sld [smem:[#allocation18_spill]] }
 0x996   : > { %9320 = vmatpush3.msra.mxu1 %v5269_v31  ;;  %9282 = vmatmul.mubr.msk.f32.vlgmr.msra.gmra.mxu0 %vm2148_vm1, %v9917_v18  ;;  %v9946_v31 = vld [vmem:[%s10327_s23 + $0x68] sm:$0xff]  ;;  %s12114_s23 = sld [smem:[#allocation17_spill]] }
 0x997   : > { %9322 = vmatmul.mubr.msk.f32.vlgmr.msra.gmra.mxu1 %vm2148_vm1, %v11624_v22  ;;  %9345 = vmatprep.subr.mxu0 %v9232_v9  ;;  %v5404_v63 = vpop.f32.mrf.mxu0 }
 0x998   : > { %9346 = vmatpush3.msra.mxu0 %v9232_v9  ;;  %9284 = vmatprep.mubr.msk.f32.mxu0 %vm2148_vm1, %v9919_v14 }
 0x999   : > { %9347 = vmatprep.subr.mxu0 %v5404_v63  ;;  %9324 = vmatprep.mubr.msk.f32.mxu1 %vm2148_vm1, %v11631_v37 }
 0x99a   : > { %9348 = vmatpush3.msra.mxu0 %v5404_v63  ;;  %9385 = vmatprep.subr.mxu1 %v9921_v0 }
 0x99b   : > { %9285 = vmatmul.mubr.msk.f32.gmra.mxu0 %vm2148_vm1, %v9922_v1  ;;  %9325 = vmatmul.mubr.msk.f32.gmra.mxu1 %vm2148_vm1, %v11639_v15 }
 0x99c   : > { %9349 = vmatprep.subr.mxu0 %v9229_v13  ;;  %9287 = vmatprep.mubr.msk.f32.mxu0 %vm2148_vm1, %v9924_v29 }
 0x99d   : > { %9350 = vmatpush3.msra.mxu0 %v9229_v13  ;;  %9327 = vmatprep.mubr.msk.f32.mxu1 %vm2148_vm1, %v11646_v38 }
 0x99e   : > { %9351 = vmatprep.subr.mxu0 %v5394_v50  ;;  %9386 = vmatpush3.msra.mxu1 %v9921_v0 }
 0x99f   : > { %9352 = vmatpush3.msra.mxu0 %v5394_v50  ;;  %9328 = vmatmul.mubr.msk.f32.gmra.mxu1 %vm2148_vm1, %v11651_v43 }
 0x9a0   : > { %9288 = vmatmul.mubr.msk.f32.gmra.mxu0 %vm2148_vm1, %v9927_v49  ;;  %9353 = vmatprep.subr.mxu0 %v9226_v25 }
 0x9a1   : > { %9354 = vmatpush3.msra.mxu0 %v9226_v25  ;;  %9290 = vmatprep.mubr.msk.f32.mxu0 %vm2148_vm1, %v9928_v3 }
 0x9a2   : > { %9355 = vmatprep.subr.mxu0 %v5384_v21  ;;  %9330 = vmatprep.mubr.msk.f32.mxu1 %vm2148_vm1, %v9929_v12 }
 0x9a3   : > { %9356 = vmatpush3.msra.mxu0 %v5384_v21  ;;  %9331 = vmatmul.mubr.msk.f32.gmra.mxu1 %vm2148_vm1, %v9930_v47 }
 0x9a4   : > { %9291 = vmatmul.mubr.msk.f32.gmra.mxu0 %vm2148_vm1, %v9931_v20  ;;  %9357 = vmatprep.subr.mxu0 %v11617_v26 }
 0x9a5   : > { %9358 = vmatpush3.msra.mxu0 %v11617_v26  ;;  %9293 = vmatprep.mubr.msk.f32.mxu0 %vm2148_vm1, %v9932_v62 }
 0x9a6   : > { %9359 = vmatprep.subr.mxu0 %v11619_v57  ;;  %9333 = vmatprep.mubr.msk.f32.mxu1 %vm2148_vm1, %v9933_v40 }
 0x9a7   : > { %9360 = vmatpush3.msra.mxu0 %v11619_v57  ;;  %9334 = vmatmul.mubr.msk.f32.gmra.mxu1 %vm2148_vm1, %v9934_v24 }
 0x9a8   : > { %9294 = vmatmul.mubr.msk.f32.gmra.mxu0 %vm2148_vm1, %v9935_v48  ;;  %9336 = vmatprep.mubr.msk.f32.mxu1 %vm2148_vm1, %v9936_v59 }
 0x9a9   : > { %9296 = vmatprep.mubr.msk.f32.mxu0 %vm2148_vm1, %v9937_v44  ;;  %9387 = vmatprep.subr.mxu1 %v9938_v52 }
 0x9aa   : > { %9388 = vmatpush3.msra.mxu1 %v9938_v52 }
 0x9ab   : > { %9337 = vmatmul.mubr.msk.f32.gmra.mxu1 %vm2148_vm1, %v9939_v11  ;;  %9389 = vmatprep.subr.mxu1 %v9940_v33 }
 0x9ac   : > { %9297 = vmatmul.mubr.msk.f32.gmra.mxu0 %vm2148_vm1, %v9941_v60  ;;  %9339 = vmatprep.mubr.msk.f32.mxu1 %vm2148_vm1, %v9942_v39 }
 0x9ad   : > { %9299 = vmatprep.mubr.msk.f32.mxu0 %vm2148_vm1, %v9943_v42  ;;  %9390 = vmatpush3.msra.mxu1 %v9940_v33 }
 0x9ae   : > { %9391 = vmatprep.subr.mxu1 %v9944_v41 }
 0x9af   : > { %9340 = vmatmul.mubr.msk.f32.gmra.mxu1 %vm2148_vm1, %v9945_v10 }
 0x9b0   : > { %9300 = vmatmul.mubr.msk.f32.gmra.mxu0 %vm2148_vm1, %v9946_v31  ;;  %9342 = vmatprep.mubr.msk.f32.mxu1 %vm2148_vm1, %v9947_v46 }
 0x9b1   : > { %9302 = vmatprep.mubr.msk.f32.mxu0 %vm2148_vm1, %v9948_v2  ;;  %9392 = vmatpush3.msra.mxu1 %v9944_v41 }
 0x9b3   : > { %9343 = vmatmul.mubr.msk.f32.gmra.mxu1 %vm2148_vm1, %v9949_v28 }
 0x9b4   : > { %9303 = vmatmul.mubr.msk.f32.gmra.mxu0 %vm2148_vm1, %v9950_v23 }
 0x9b5   : > { %9361 = vmatprep.mubr.msk.f32.mxu0 %vm2148_vm1, %v11613_v58  ;;  %v11727_v58 = vld [vmem:[%s10536_s28] sm:$0xff] }
 0x9b8   : > { %9362 = vmatmul.mubr.msk.f32.vlgmr.msra.gmra.mxu0 %vm2148_vm1, %v11624_v22 }
 0x9b9   : > { %9364 = vmatprep.mubr.msk.f32.mxu0 %vm2148_vm1, %v11631_v37 }
 0x9bc   : > { %9365 = vmatmul.mubr.msk.f32.gmra.mxu0 %vm2148_vm1, %v11639_v15 }
 0x9bd   : > { %9367 = vmatprep.mubr.msk.f32.mxu0 %vm2148_vm1, %v11646_v38 }
 0x9c0   : > { %9368 = vmatmul.mubr.msk.f32.gmra.mxu0 %vm2148_vm1, %v11651_v43 }
 0x9c1   : > { %9370 = vmatprep.mubr.msk.f32.mxu0 %vm2148_vm1, %v9929_v12 }
 0x9c4   : > { %9371 = vmatmul.mubr.msk.f32.gmra.mxu0 %vm2148_vm1, %v9930_v47 }
 0x9c5   : > { %9373 = vmatprep.mubr.msk.f32.mxu0 %vm2148_vm1, %v9933_v40 }
 0x9c8   : > { %9374 = vmatmul.mubr.msk.f32.gmra.mxu0 %vm2148_vm1, %v9934_v24 }
 0x9c9   : > { %9376 = vmatprep.mubr.msk.f32.mxu0 %vm2148_vm1, %v9936_v59 }
 0x9cc   : > { %9377 = vmatmul.mubr.msk.f32.gmra.mxu0 %vm2148_vm1, %v9939_v11 }
 0x9cd   : > { %9379 = vmatprep.mubr.msk.f32.mxu0 %vm2148_vm1, %v9942_v39 }
 0x9d0   : > { %9380 = vmatmul.mubr.msk.f32.gmra.mxu0 %vm2148_vm1, %v9945_v10 }
 0x9d1   : > { %9382 = vmatprep.mubr.msk.f32.mxu0 %vm2148_vm1, %v9947_v46 }
 0x9d4   : > { %9383 = vmatmul.mubr.msk.f32.gmra.mxu0 %vm2148_vm1, %v9949_v28 }
 0x9d5   : > { %9449 = vmatprep.mubr.f32.mxu0 %v11727_v58 }
 0xa19   : > { %v9243_v16 = vpop.f32.mrf.mxu1 }
 0xa1b   : > { %v5527_v53 = vpop.f32.mrf.mxu1 }
 0xa1d   : > { %v9246_v55 = vpop.f32.mrf.mxu1 }
 0xa1f   : > { %v5537_v45 = vpop.f32.mrf.mxu1 }
 0xa21   : > { %v9249_v6 = vpop.f32.mrf.mxu1 }
 0xa23   : > { %v5547_v54 = vpop.f32.mrf.mxu1 }
 0xa25   : > { %v9252_v35 = vpop.f32.mrf.mxu1 }
 0xa27   : > { %v5557_v5 = vpop.f32.mrf.mxu1 }
 0xa2a   : > { %v9255_v26 = vpop.f32.mrf.mxu1 }
 0xa2c   : > { %v5567_v57 = vpop.f32.mrf.mxu1 }
 0xa2e   : > { %v11730_v25 = vpop.f32.mrf.mxu1 }
 0xa30   : > { %v11732_v21 = vpop.f32.mrf.mxu1 }
 0xa32   : > { %v11734_v13 = vpop.f32.mrf.mxu1 }
 0xa34   : > { %v11736_v50 = vpop.f32.mrf.mxu1 }
 0xa36   : > { %v11738_v9 = vpop.f32.mrf.mxu1 }
 0xa38   : > { %v11740_v18 = vpop.f32.mrf.mxu1 }
 0xa56   : > { %v9283_v22 = vpop.f32.mrf.mxu0 }
 0xa57   : > { %v9323_v63 = vpop.f32.mrf.mxu1 }
 0xa58   : > { %v5672_v14 = vpop.f32.mrf.mxu0  ;;  %v6042_v37 = vmul.f32 %v9323_v63, %v9283_v22 }
 0xa59   : > { %v5817_v0 = vpop.f32.mrf.mxu1 }
 0xa5a   : > { %v6041_v1 = vmul.f32 %v5817_v0, %v5672_v14  ;;  %v6058_v43 = vmul.f32 %v9243_v16, %v6042_v37 }
 0xa5b   : > { %v9286_v15 = vpop.f32.mrf.mxu0  ;;  %v9326_v29 = vpop.f32.mrf.mxu1 }
 0xa5c   : > { %v6057_v38 = vmul.f32 %v6041_v1, %v5527_v53  ;;  %v6044_v49 = vmul.f32 %v9326_v29, %v9286_v15 }
 0xa5d   : > { %v5682_v3 = vpop.f32.mrf.mxu0  ;;  %v5827_v12 = vpop.f32.mrf.mxu1 }
 0xa5e   : > { %v6043_v47 = vmul.f32 %v5827_v12, %v5682_v3  ;;  %9393 = vmatprep.mubr.msk.f32.mxu1 %vm1615_vm0, %v6057_v38  ;;  %v6060_v24 = vmul.f32 %v9246_v55, %v6044_v49 }
 0xa5f   : > { %v9329_v20 = vpop.f32.mrf.mxu1  ;;  %9394 = vmatmul.mubr.msk.f32.vlgmr.msra.gmra.mxu1 %vm1615_vm0, %v6058_v43 }
 0xa60   : > { %v6059_v62 = vmul.f32 %v6043_v47, %v5537_v45  ;;  %v9289_v40 = vpop.f32.mrf.mxu0 }
 0xa61   : > { %v5837_v48 = vpop.f32.mrf.mxu1  ;;  %v6046_v59 = vmul.f32 %v9329_v20, %v9289_v40 }
 0xa62   : > { %v5692_v44 = vpop.f32.mrf.mxu0  ;;  %9396 = vmatprep.mubr.msk.f32.mxu1 %vm1615_vm0, %v6059_v62 }
 0xa63   : > { %v6045_v52 = vmul.f32 %v5837_v48, %v5692_v44  ;;  %v9332_v11 = vpop.f32.mrf.mxu1  ;;  %9397 = vmatmul.mubr.msk.f32.gmra.mxu1 %vm1615_vm0, %v6060_v24  ;;  %v6062_v42 = vmul.f32 %v9249_v6, %v6046_v59 }
 0xa64   : > { %v9292_v33 = vpop.f32.mrf.mxu0 }
 0xa65   : > { %v6061_v60 = vmul.f32 %v6045_v52, %v5547_v54  ;;  %v5847_v39 = vpop.f32.mrf.mxu1  ;;  %v6048_v41 = vmul.f32 %v9332_v11, %v9292_v33 }
 0xa66   : > { %v5702_v10 = vpop.f32.mrf.mxu0 }
 0xa67   : > { %v6047_v31 = vmul.f32 %v5847_v39, %v5702_v10  ;;  %9399 = vmatprep.mubr.msk.f32.mxu1 %vm1615_vm0, %v6061_v60  ;;  %v9335_v46 = vpop.f32.mrf.mxu1  ;;  %v6064_v16 = vmul.f32 %v9252_v35, %v6048_v41 }
 0xa68   : > { %v9295_v2 = vpop.f32.mrf.mxu0  ;;  %9400 = vmatmul.mubr.msk.f32.gmra.mxu1 %vm1615_vm0, %v6062_v42 }
 0xa69   : > { %v6063_v28 = vmul.f32 %v6047_v31, %v5557_v5  ;;  %v5857_v23 = vpop.f32.mrf.mxu1  ;;  %v6050_v53 = vmul.f32 %v9335_v46, %v9295_v2 }
 0xa6a   : > { %v5712_v55 = vpop.f32.mrf.mxu0 }
 0xa6b   : > { %v6049_v45 = vmul.f32 %v5857_v23, %v5712_v55  ;;  %9402 = vmatprep.mubr.msk.f32.mxu1 %vm1615_vm0, %v6063_v28  ;;  %v9338_v54 = vpop.f32.mrf.mxu1  ;;  %v6066_v14 = vmul.f32 %v9255_v26, %v6050_v53 }
 0xa6c   : > { %v9298_v22 = vpop.f32.mrf.mxu0  ;;  %9403 = vmatmul.mubr.msk.f32.gmra.mxu1 %vm1615_vm0, %v6064_v16 }
 0xa6d   : > { %v6065_v6 = vmul.f32 %v6049_v45, %v5567_v57  ;;  %v5867_v63 = vpop.f32.mrf.mxu1  ;;  %v6052_v37 = vmul.f32 %v9338_v54, %v9298_v22 }
 0xa6e   : > { %v5722_v0 = vpop.f32.mrf.mxu0 }
 0xa6f   : > { %v6051_v1 = vmul.f32 %v5867_v63, %v5722_v0  ;;  %9405 = vmatprep.mubr.msk.f32.mxu1 %vm1615_vm0, %v6065_v6  ;;  %v9341_v5 = vpop.f32.mrf.mxu1  ;;  %v6068_v38 = vmul.f32 %v11730_v25, %v6052_v37 }
 0xa70   : > { %v9301_v15 = vpop.f32.mrf.mxu0  ;;  %9406 = vmatmul.mubr.msk.f32.gmra.mxu1 %vm1615_vm0, %v6066_v14 }
 0xa71   : > { %v6067_v35 = vmul.f32 %v6051_v1, %v11732_v21  ;;  %v5877_v29 = vpop.f32.mrf.mxu1  ;;  %v6054_v43 = vmul.f32 %v9341_v5, %v9301_v15 }
 0xa72   : > { %v5732_v49 = vpop.f32.mrf.mxu0 }
 0xa73   : > { %v6053_v3 = vmul.f32 %v5877_v29, %v5732_v49  ;;  %9408 = vmatprep.mubr.msk.f32.mxu1 %vm1615_vm0, %v6067_v35  ;;  %v9344_v26 = vpop.f32.mrf.mxu1  ;;  %v6070_v20 = vmul.f32 %v11734_v13, %v6054_v43 }
 0xa74   : > { %v9304_v57 = vpop.f32.mrf.mxu0  ;;  %9409 = vmatmul.mubr.msk.f32.gmra.mxu1 %vm1615_vm0, %v6068_v38 }
 0xa75   : > { %v6069_v12 = vmul.f32 %v6053_v3, %v11736_v50  ;;  %v5887_v47 = vpop.f32.mrf.mxu1  ;;  %v6056_v62 = vmul.f32 %v9344_v26, %v9304_v57 }
 0xa76   : > { %v5742_v40 = vpop.f32.mrf.mxu0 }
 0xa77   : > { %v6055_v21 = vmul.f32 %v5887_v47, %v5742_v40  ;;  %9411 = vmatprep.mubr.msk.f32.mxu1 %vm1615_vm0, %v6069_v12  ;;  %v6072_v24 = vmul.f32 %v11738_v9, %v6056_v62 }
 0xa78   : > { %9412 = vmatmul.mubr.msk.f32.gmra.mxu1 %vm1615_vm0, %v6070_v20  ;;  %v11765_v50 = vpop.f32.mrf.mxu0 }
 0xa79   : > { %v6071_v25 = vmul.f32 %v6055_v21, %v11740_v18 }
 0xa7a   : > { %v11767_v13 = vpop.f32.mrf.mxu0 }
 0xa7b   : > { %9414 = vmatprep.mubr.msk.f32.mxu1 %vm1615_vm0, %v6071_v25 }
 0xa7c   : > { %9415 = vmatmul.mubr.msk.f32.gmra.mxu1 %vm1615_vm0, %v6072_v24  ;;  %v11769_v48 = vpop.f32.mrf.mxu0 }
 0xa7d   : > { %9493 = vmatprep.mubr.f32.mxu1 %v11727_v58 }
 0xa7e   : > { %v11771_v59 = vpop.f32.mrf.mxu0 }
 0xa80   : > { %v11777_v18 = vpop.f32.mrf.mxu0 }
 0xa82   : > { %v11783_v33 = vpop.f32.mrf.mxu0 }
 0xa84   : > { %v11785_v39 = vpop.f32.mrf.mxu0 }
 0xa86   : > { %v11787_v10 = vpop.f32.mrf.mxu0 }
 0xa88   : > { %v11789_v2 = vpop.f32.mrf.mxu0 }
 0xa8a   : > { %v11791_v16 = vpop.f32.mrf.mxu0 }
 0xa8c   : > { %v11793_v54 = vpop.f32.mrf.mxu0 }
 0xa8e   : > { %v11795_v0 = vpop.f32.mrf.mxu0 }
 0xa90   : > { %v9381_v43 = vpop.f32.mrf.mxu0 }
 0xa92   : > { %v6022_v12 = vpop.f32.mrf.mxu0 }
 0xa94   : > { %v9384_v21 = vpop.f32.mrf.mxu0 }
 0xb1f   : > { %v11773_v44 = vpop.f32.mrf.mxu1 }
 0xb21   : > { %v11775_v52 = vpop.f32.mrf.mxu1 }
 0xb23   : > { %v11779_v9 = vpop.f32.mrf.mxu1 }
 0xb25   : > { %v11781_v11 = vpop.f32.mrf.mxu1 }
 0xb28   : > { %v9401_v58 = vpop.f32.mrf.mxu1 }
 0xb29   : > { %v8064_v25 = vclamps-f32 %v9401_v58, 5.0 }
 0xb2a   : > { %v6207_v60 = vpop.f32.mrf.mxu1 }
 0xb2c   : > { %v9404_v42 = vpop.f32.mrf.mxu1 }
 0xb2d   : > { %v8066_v47 = vclamps-f32 %v9404_v42, 5.0 }
 0xb2e   : > { %v6217_v41 = vpop.f32.mrf.mxu1 }
 0xb2f   : > { %v8065_v62 = vclamps-f32 %v6217_v41, 5.0  ;;  %v6312_v24 = vmul.f32 1.442695, %v8066_v47  ;;  %v8061_v41 = vclamps-f32 %v11781_v11, 5.0  ;;  %v8059_v11 = vclamps-f32 %v11775_v52, 5.0 }
 0xb30   : > { %v9407_v31 = vpop.f32.mrf.mxu1 }
 0xb31   : > { %v8068_v49 = vclamps-f32 %v9407_v31, 5.0 }
 0xb32   : > { %v6227_v46 = vpop.f32.mrf.mxu1 }
 0xb33   : > { %v8067_v26 = vclamps-f32 %v6227_v46, 5.0  ;;  %v6316_v20 = vmul.f32 1.442695, %v8068_v49  ;;  %v8062_v46 = vclamps-f32 %v11779_v9, 5.0 }
 0xb34   : > { %v9410_v28 = vpop.f32.mrf.mxu1 }
 0xb35   : > { %v8070_v1 = vclamps-f32 %v9410_v28, 5.0  ;;  %v6314_v40 = vmul.f32 1.442695, %v8067_v26  ;;  %v8063_v28 = vclamps-f32 %v6207_v60, 5.0 }
 0xb36   : > { %v6237_v23 = vpop.f32.mrf.mxu1 }
 0xb37   : > { %v8069_v35 = vclamps-f32 %v6237_v23, 5.0  ;;  %v6320_v3 = vmul.f32 1.442695, %v8070_v1  ;;  %v6310_v23 = vmul.f32 1.442695, %v8065_v62 }
 0xb38   : > { %v9413_v53 = vpop.f32.mrf.mxu1  ;;  %v6302_v1 = vmul.f32 1.442695, %v8061_v41 }
 0xb39   : > { %v8072_v55 = vclamps-f32 %v9413_v53, 5.0  ;;  %v6318_v57 = vmul.f32 1.442695, %v8069_v35  ;;  %v6032_v53 = vpop.f32.mrf.mxu0 }
 0xb3a   : > { %v6247_v45 = vpop.f32.mrf.mxu1 }
 0xb3b   : > { %v8071_v6 = vclamps-f32 %v6247_v45, 5.0  ;;  %v6324_v14 = vmul.f32 1.442695, %v8072_v55  ;;  %v6308_v45 = vmul.f32 1.442695, %v8064_v25  ;;  %v9955_v25 = vld [vmem:[%s10536_s28 + $0x20] sm:$0xff] }
 0xb3c   : > { %v9416_v22 = vpop.f32.mrf.mxu1 }
 0xb3d   : > { %v8074_v63 = vclamps-f32 %v9416_v22, 5.0  ;;  %v6322_v29 = vmul.f32 1.442695, %v8071_v6  ;;  %v6306_v6 = vmul.f32 1.442695, %v8063_v28  ;;  %v9958_v28 = vld [vmem:[%s10536_s28 + $0x38] sm:$0xff] }
 0xb3e   : > { %v6257_v37 = vpop.f32.mrf.mxu1 }
 0xb3f   : > { %v6328_v5 = vmul.f32 1.442695, %v8074_v63  ;;  %v8073_v15 = vclamps-f32 %v6257_v37, 5.0  ;;  %v8060_v63 = vclamps-f32 %v11773_v44, 5.0 }
 0xb41   : > { %9810 = vpow2.f32 %v6328_v5  ;;  %v6326_v38 = vmul.f32 1.442695, %v8073_v15  ;;  %v6300_v35 = vmul.f32 1.442695, %v8060_v63 }
 0xb42   : > { %9812 = vpow2.f32 %v6324_v14  ;;  %v6304_v14 = vmul.f32 1.442695, %v8062_v46 }
 0xb43   : > { %9814 = vpow2.f32 %v6326_v38  ;;  %v6298_v38 = vmul.f32 1.442695, %v8059_v11 }
 0xb44   : > { %9816 = vpow2.f32 %v6322_v29 }
 0xb45   : > { %9818 = vpow2.f32 %v6320_v3 }
 0xb46   : > { %9820 = vpow2.f32 %v6318_v57 }
 0xb47   : > { %9822 = vpow2.f32 %v6316_v20 }
 0xb48   : > { %9824 = vpow2.f32 %v6314_v40 }
 0xb49   : > { %9826 = vpow2.f32 %v6312_v24  ;;  %v9957_v24 = vld [vmem:[%s10536_s28 + $0x30] sm:$0xff] }
 0xb4a   : > { %9828 = vpow2.f32 %v6310_v23  ;;  %v5057_v23 = vld [vmem:[%s12114_s23 + $0x18] sm:$0xff] }
 0xb4b   : > { %9830 = vpow2.f32 %v6308_v45 }
 0xb4c   : > { %9832 = vpow2.f32 %v6306_v6 }
 0xb4d   : > { %9834 = vpow2.f32 %v6304_v14 }
 0xb4e   : > { %v9811_v31 = vpop.eup %9810  ;;  %9836 = vpow2.f32 %v6302_v1 }
 0xb4f   : > { %v9813_v55 = vpop.eup %9812  ;;  %v6345_v42 = vmul.f32 %v9811_v31, %v9384_v21  ;;  %9461 = vmatprep.subr.mxu1 %v9811_v31  ;;  %9838 = vpow2.f32 %v6300_v35  ;;  %v9953_v21 = vld [vmem:[%s10536_s28 + $0x10] sm:$0xff] }
 0xb50   : > { %v9815_v22 = vpop.eup %9814  ;;  %9462 = vmatpush3.msra.mxu1 %v9811_v31  ;;  %v6343_v9 = vmul.f32 %v9813_v55, %v9381_v43  ;;  %9840 = vpow2.f32 %v6298_v38  ;;  %v5056_v31 = vld [vmem:[%s12114_s23 + $0x10] sm:$0xff] }
 0xb51   : > { %v6344_v58 = vmul.f32 %v9815_v22, %v6032_v53  ;;  %9417 = vmatprep.subr.mxu0 %v6345_v42  ;;  %9463 = vmatprep.subr.mxu1 %v9815_v22  ;;  %v9817_v60 = vpop.eup %9816  ;;  %v5055_v53 = vld [vmem:[%s12114_s23 + $0x8] sm:$0xff] }
 0xb52   : > { %9418 = vmatpush3.msra.mxu0 %v6345_v42  ;;  %9464 = vmatpush3.msra.mxu1 %v9815_v22  ;;  %v9819_v37 = vpop.eup %9818  ;;  %v6342_v5 = vmul.f32 %v9817_v60, %v6022_v12 }
 0xb53   : > { %9419 = vmatprep.subr.mxu0 %v6344_v58  ;;  %9465 = vmatprep.subr.mxu1 %v9813_v55  ;;  %v9821_v15 = vpop.eup %9820  ;;  %v6341_v44 = vmul.f32 %v9819_v37, %v11793_v54 }
 0xb54   : > { %9420 = vmatpush3.msra.mxu0 %v6344_v58  ;;  %9466 = vmatpush3.msra.mxu1 %v9813_v55  ;;  %v9823_v29 = vpop.eup %9822  ;;  %v6340_v52 = vmul.f32 %v9821_v15, %v11795_v0  ;;  %v5054_v55 = vld [vmem:[%s12114_s23] sm:$0xff] }
 0xb55   : > { %9421 = vmatprep.subr.mxu0 %v6343_v9  ;;  %9467 = vmatprep.subr.mxu1 %v9817_v60  ;;  %v9825_v43 = vpop.eup %9824  ;;  %v6339_v49 = vmul.f32 %v9823_v29, %v11789_v2 }
 0xb56   : > { %9422 = vmatpush3.msra.mxu0 %v6343_v9  ;;  %9468 = vmatpush3.msra.mxu1 %v9817_v60  ;;  %v9827_v54 = vpop.eup %9826  ;;  %v6338_v3 = vmul.f32 %v9825_v43, %v11791_v16 }
 0xb57   : > { %9423 = vmatprep.subr.mxu0 %v6342_v5  ;;  %9469 = vmatprep.subr.mxu1 %v9819_v37  ;;  %v9829_v26 = vpop.eup %9828  ;;  %v6337_v0 = vmul.f32 %v9827_v54, %v11785_v39 }
 0xb58   : > { %9424 = vmatpush3.msra.mxu0 %v6342_v5  ;;  %9470 = vmatpush3.msra.mxu1 %v9819_v37  ;;  %v9831_v57 = vpop.eup %9830  ;;  %v6336_v2 = vmul.f32 %v9829_v26, %v11787_v10 }
 0xb59   : > { %9425 = vmatprep.subr.mxu0 %v6341_v44  ;;  %9471 = vmatprep.subr.mxu1 %v9821_v15  ;;  %v9833_v12 = vpop.eup %9832  ;;  %v6335_v16 = vmul.f32 %v9831_v57, %v11777_v18 }
 0xb5a   : > { %9426 = vmatpush3.msra.mxu0 %v6341_v44  ;;  %9472 = vmatpush3.msra.mxu1 %v9821_v15  ;;  %v9835_v47 = vpop.eup %9834  ;;  %v6334_v39 = vmul.f32 %v9833_v12, %v11783_v33 }
 0xb5b   : > { %9427 = vmatprep.subr.mxu0 %v6340_v52  ;;  %9473 = vmatprep.subr.mxu1 %v9823_v29  ;;  %v9837_v20 = vpop.eup %9836  ;;  %v6333_v10 = vmul.f32 %v9835_v47, %v11769_v48 }
 0xb5c   : > { %9428 = vmatpush3.msra.mxu0 %v6340_v52  ;;  %9474 = vmatpush3.msra.mxu1 %v9823_v29  ;;  %v9839_v62 = vpop.eup %9838  ;;  %v6332_v18 = vmul.f32 %v9837_v20, %v11771_v59  ;;  %v9952_v59 = vld [vmem:[%s10536_s28 + $0x8] sm:$0xff] }
 0xb5d   : > { %9429 = vmatprep.subr.mxu0 %v6339_v49  ;;  %9475 = vmatprep.subr.mxu1 %v9825_v43  ;;  %v9841_v40 = vpop.eup %9840  ;;  %v6331_v33 = vmul.f32 %v9839_v62, %v11765_v50  ;;  %v9954_v50 = vld [vmem:[%s10536_s28 + $0x18] sm:$0xff] }
 0xb5e   : > { %9430 = vmatpush3.msra.mxu0 %v6339_v49  ;;  %9476 = vmatpush3.msra.mxu1 %v9825_v43  ;;  %v6330_v48 = vmul.f32 %v9841_v40, %v11767_v13  ;;  %v9956_v13 = vld [vmem:[%s10536_s28 + $0x28] sm:$0xff]  ;;  %s12116_s28 = sld [smem:[#allocation20_spill]] }
 0xb5f   : > { %9431 = vmatprep.subr.mxu0 %v6338_v3  ;;  %9477 = vmatprep.subr.mxu1 %v9827_v54 }
 0xb60   : > { %9432 = vmatpush3.msra.mxu0 %v6338_v3  ;;  %9478 = vmatpush3.msra.mxu1 %v9827_v54 }
 0xb61   : > { %9433 = vmatprep.subr.mxu0 %v6337_v0  ;;  %9479 = vmatprep.subr.mxu1 %v9829_v26 }
 0xb62   : > { %9434 = vmatpush3.msra.mxu0 %v6337_v0  ;;  %9480 = vmatpush3.msra.mxu1 %v9829_v26 }
 0xb63   : > { %9435 = vmatprep.subr.mxu0 %v6336_v2  ;;  %9481 = vmatprep.subr.mxu1 %v9831_v57 }
 0xb64   : > { %9436 = vmatpush3.msra.mxu0 %v6336_v2  ;;  %9482 = vmatpush3.msra.mxu1 %v9831_v57 }
 0xb65   : > { %9437 = vmatprep.subr.mxu0 %v6335_v16  ;;  %9483 = vmatprep.subr.mxu1 %v9833_v12 }
 0xb66   : > { %9438 = vmatpush3.msra.mxu0 %v6335_v16  ;;  %9484 = vmatpush3.msra.mxu1 %v9833_v12 }
 0xb67   : > { %9439 = vmatprep.subr.mxu0 %v6334_v39  ;;  %9485 = vmatprep.subr.mxu1 %v9835_v47 }
 0xb68   : > { %9440 = vmatpush3.msra.mxu0 %v6334_v39  ;;  %9486 = vmatpush3.msra.mxu1 %v9835_v47 }
 0xb69   : > { %9441 = vmatprep.subr.mxu0 %v6333_v10  ;;  %9487 = vmatprep.subr.mxu1 %v9837_v20 }
 0xb6a   : > { %9442 = vmatpush3.msra.mxu0 %v6333_v10  ;;  %9488 = vmatpush3.msra.mxu1 %v9837_v20 }
 0xb6b   : > { %9443 = vmatprep.subr.mxu0 %v6332_v18  ;;  %9489 = vmatprep.subr.mxu1 %v9839_v62 }
 0xb6c   : > { %9444 = vmatpush3.msra.mxu0 %v6332_v18  ;;  %9490 = vmatpush3.msra.mxu1 %v9839_v62 }
 0xb6d   : > { %9445 = vmatprep.subr.mxu0 %v6331_v33  ;;  %9491 = vmatprep.subr.mxu1 %v9841_v40 }
 0xb6e   : > { %9446 = vmatpush3.msra.mxu0 %v6331_v33  ;;  %9492 = vmatpush3.msra.mxu1 %v9841_v40 }
 0xb6f   : > { %9447 = vmatprep.subr.mxu0 %v6330_v48  ;;  %9494 = vmatmul.mubr.f32.vlgmr.msra.gmra.mxu1 %v9952_v59 }
 0xb70   : > { %9448 = vmatpush3.msra.mxu0 %v6330_v48  ;;  %9496 = vmatprep.mubr.f32.mxu1 %v9953_v21 }
 0xb71   : > { %9450 = vmatmul.mubr.f32.vlgmr.msra.gmra.mxu0 %v9952_v59  ;;  %9505 = vmatprep.subr.mxu0 %v5057_v23 }
 0xb72   : > { %9452 = vmatprep.mubr.f32.mxu0 %v9953_v21  ;;  %9506 = vmatpush3.msra.mxu0 %v5057_v23  ;;  %v8083_v21 = vld [vmem:[%s12115_s26] ss:$0 sm:$0xff]  ;;  %s12117_s26 = sld [smem:[#allocation22_spill]] }
 0xb73   : > { %9497 = vmatmul.mubr.f32.gmra.mxu1 %v9954_v50  ;;  %9507 = vmatprep.subr.mxu0 %v5056_v31 }
 0xb74   : > { %9499 = vmatprep.mubr.f32.mxu1 %v9955_v25  ;;  %9508 = vmatpush3.msra.mxu0 %v5056_v31 }
 0xb75   : > { %9453 = vmatmul.mubr.f32.gmra.mxu0 %v9954_v50  ;;  %9509 = vmatprep.subr.mxu0 %v5055_v53 }
 0xb76   : > { %9455 = vmatprep.mubr.f32.mxu0 %v9955_v25  ;;  %9510 = vmatpush3.msra.mxu0 %v5055_v53 }
 0xb77   : > { %9500 = vmatmul.mubr.f32.gmra.mxu1 %v9956_v13  ;;  %9511 = vmatprep.subr.mxu0 %v5054_v55 }
 0xb78   : > { %9502 = vmatprep.mubr.f32.mxu1 %v9957_v24  ;;  %9512 = vmatpush3.msra.mxu0 %v5054_v55 }
 0xb79   : > { %9456 = vmatmul.mubr.f32.gmra.mxu0 %v9956_v13 }
 0xb7a   : > { %9458 = vmatprep.mubr.f32.mxu0 %v9957_v24 }
 0xb7b   : > { %9503 = vmatmul.mubr.f32.gmra.mxu1 %v9958_v28 }
 0xb7d   : > { %9459 = vmatmul.mubr.f32.gmra.mxu0 %v9958_v28 }
 0xc2f   : > { %v9495_v46 = vpop.f32.mrf.mxu1 }
 0xc30   : > { %v6523_v45 = vadd.f32 1e-06, %v9495_v46 }
 0xc31   : > { %v6517_v42 = vpop.f32.mrf.mxu1  ;;  %v9451_v22 = vpop.f32.mrf.mxu0 }
 0xc32   : > { %v6518_v41 = vadd.f32 1e-06, %v6517_v42  ;;  %9842 = vrcp.f32 %v6523_v45 }
 0xc33   : > { %v9498_v6 = vpop.f32.mrf.mxu1  ;;  %v6412_v63 = vpop.f32.mrf.mxu0 }
 0xc34   : > { %9844 = vrcp.f32 %v6518_v41  ;;  %v6533_v58 = vadd.f32 1e-06, %v9498_v6 }
 0xc35   : > { %v6527_v60 = vpop.f32.mrf.mxu1  ;;  %v9454_v1 = vpop.f32.mrf.mxu0 }
 0xc36   : > { %v6528_v14 = vadd.f32 1e-06, %v6527_v60  ;;  %9846 = vrcp.f32 %v6533_v58 }
 0xc37   : > { %v9501_v9 = vpop.f32.mrf.mxu1  ;;  %v6422_v29 = vpop.f32.mrf.mxu0 }
 0xc38   : > { %9848 = vrcp.f32 %v6528_v14  ;;  %v6543_v37 = vadd.f32 1e-06, %v9501_v9 }
 0xc39   : > { %v6537_v11 = vpop.f32.mrf.mxu1  ;;  %v9457_v49 = vpop.f32.mrf.mxu0 }
 0xc3a   : > { %v6538_v5 = vadd.f32 1e-06, %v6537_v11  ;;  %9850 = vrcp.f32 %v6543_v37 }
 0xc3b   : > { %v9504_v15 = vpop.f32.mrf.mxu1  ;;  %v6432_v57 = vpop.f32.mrf.mxu0 }
 0xc3c   : > { %9852 = vrcp.f32 %v6538_v5  ;;  %v6553_v35 = vadd.f32 1e-06, %v9504_v15 }
 0xc3d   : > { %v6547_v44 = vpop.f32.mrf.mxu1  ;;  %v9460_v39 = vpop.f32.mrf.mxu0 }
 0xc3e   : > { %v6548_v38 = vadd.f32 1e-06, %v6547_v44  ;;  %9854 = vrcp.f32 %v6553_v35 }
 0xc3f   : > { %v9843_v52 = vpop.eup %9842  ;;  %v6442_v40 = vpop.f32.mrf.mxu0 }
 0xc40   : > { %9856 = vrcp.f32 %v6548_v38  ;;  %v6565_v3 = vmul.f32 %v9843_v52, %v9451_v22 }
 0xc41   : > { %v9845_v43 = vpop.eup %9844 }
 0xc42   : > { %v6564_v54 = vmul.f32 %v9845_v43, %v6412_v63 }
 0xc43   : > { %v9847_v26 = vpop.eup %9846 }
 0xc44   : > { %9513 = vmatprep.mubr.msk.f32.mxu0 %vm1615_vm0, %v6564_v54  ;;  %v6567_v12 = vmul.f32 %v9847_v26, %v9454_v1 }
 0xc45   : > { %v9849_v0 = vpop.eup %9848  ;;  %9514 = vmatmul.mubr.msk.f32.vlgmr.msra.gmra.mxu0 %vm1615_vm0, %v6565_v3 }
 0xc46   : > { %v6566_v2 = vmul.f32 %v9849_v0, %v6422_v29 }
 0xc47   : > { %v9851_v16 = vpop.eup %9850 }
 0xc48   : > { %9516 = vmatprep.mubr.msk.f32.mxu0 %vm1615_vm0, %v6566_v2  ;;  %v6569_v10 = vmul.f32 %v9851_v16, %v9457_v49 }
 0xc49   : > { %v9853_v47 = vpop.eup %9852  ;;  %9517 = vmatmul.mubr.msk.f32.gmra.mxu0 %vm1615_vm0, %v6567_v12 }
 0xc4a   : > { %v6568_v20 = vmul.f32 %v9853_v47, %v6432_v57 }
 0xc4b   : > { %v9855_v62 = vpop.eup %9854 }
 0xc4c   : > { %9519 = vmatprep.mubr.msk.f32.mxu0 %vm1615_vm0, %v6568_v20  ;;  %v6571_v48 = vmul.f32 %v9855_v62, %v9460_v39 }
 0xc4d   : > { %v9857_v18 = vpop.eup %9856  ;;  %9520 = vmatmul.mubr.msk.f32.gmra.mxu0 %vm1615_vm0, %v6569_v10 }
 0xc4e   : > { %v6570_v33 = vmul.f32 %v9857_v18, %v6442_v40 }
 0xc50   : > { %9522 = vmatprep.mubr.msk.f32.mxu0 %vm1615_vm0, %v6570_v33 }
 0xc51   : > { %9523 = vmatmul.mubr.msk.f32.gmra.mxu0 %vm1615_vm0, %v6571_v48 }
 0xd05   : > { %v9515_v59 = vpop.f32.mrf.mxu0 }
 0xd06   : > { %v6702_v50 = vadd.f32 %v9515_v59, %v11368_v4 }
 0xd07   : > { %v6662_v25 = vpop.f32.mrf.mxu0 }
 0xd08   : > { %v6701_v13 = vadd.f32 %v6662_v25, %v11365_v32  ;;  %v6716_v24 = vadd.f32 %v8083_v21, %v6702_v50 }
 0xd09   : > { %v9518_v28 = vpop.f32.mrf.mxu0 }
 0xd0a   : > { %v6704_v23 = vadd.f32 %v9518_v28, %v11396_v17  ;;  %v6726_v31 = vsel %vm1615_vm0, %v6716_v24, 0.0  ;;  %v6715_v53 = vadd.f32 %v8083_v21, %v6701_v13 }
 0xd0b   : > { %6727 = vadd.xlane.f32.xlu1 %v6726_v31  ;;  %v6672_v55 = vpop.f32.mrf.mxu0 }
 0xd0c   : > { %v6718_v46 = vadd.f32 %v8083_v21, %v6704_v23  ;;  %v6703_v45 = vadd.f32 %v6672_v55, %v11407_v7  ;;  %v6723_v42 = vsel %vm1615_vm0, %v6715_v53, 0.0 }
 0xd0d   : > { %6724 = vadd.xlane.f32.xlu0 %v6723_v42  ;;  %v9521_v22 = vpop.f32.mrf.mxu0 }
 0xd0e   : > { %v6717_v4 = vadd.f32 %v8083_v21, %v6703_v45  ;;  %v6706_v41 = vadd.f32 %v9521_v22, %v11423_v34  ;;  %v6732_v32 = vsel %vm1615_vm0, %v6718_v46, 0.0  ;;  %v5063_v22 = vld [vmem:[%s12116_s28 + $0x18] sm:$0xff] }
 0xd0f   : > { %6733 = vadd.xlane.f32.xlu1 %v6732_v32  ;;  %v6682_v6 = vpop.f32.mrf.mxu0  ;;  %9525 = vmatprep.subr.mxu0 %v5063_v22  ;;  %v5060_v32 = vld [vmem:[%s12116_s28] sm:$0xff] }
 0xd10   : > { %v6720_v17 = vadd.f32 %v8083_v21, %v6706_v41  ;;  %v6705_v58 = vadd.f32 %v6682_v6, %v11438_v61  ;;  %v6729_v60 = vsel %vm1615_vm0, %v6717_v4, 0.0  ;;  %9526 = vmatpush3.msra.mxu0 %v5063_v22  ;;  %v5061_v41 = vld [vmem:[%s12116_s28 + $0x8] sm:$0xff]  ;;  %v5072_v6 = vld [vmem:[%s12117_s26 + $0x38] sm:$0xff] }
 0xd11   : > { %6730 = vadd.xlane.f32.xlu0 %v6729_v60  ;;  %v9524_v63 = vpop.f32.mrf.mxu0  ;;  %9545 = vmatprep.subr.mxu1 %v5072_v6  ;;  %v5069_v60 = vld [vmem:[%s12117_s26 + $0x20] sm:$0xff] }
 0xd12   : > { %v6719_v14 = vadd.f32 %v8083_v21, %v6705_v58  ;;  %v6708_v7 = vadd.f32 %v9524_v63, %v11467_v56  ;;  %v6738_v9 = vsel %vm1615_vm0, %v6720_v17, 0.0  ;;  %9546 = vmatpush3.msra.mxu1 %v5072_v6  ;;  %v5070_v58 = vld [vmem:[%s12117_s26 + $0x28] sm:$0xff] }
 0xd13   : > { %6739 = vadd.xlane.f32.xlu1 %v6738_v9  ;;  %v6692_v37 = vpop.f32.mrf.mxu0 }
 0xd14   : > { %v6722_v11 = vadd.f32 %v8083_v21, %v6708_v7  ;;  %v6707_v34 = vadd.f32 %v6692_v37, %v11464_v8  ;;  %v6735_v1 = vsel %vm1615_vm0, %v6719_v14, 0.0 }
 0xd15   : > { %6736 = vadd.xlane.f32.xlu0 %v6735_v1 }
 0xd16   : > { %v6721_v5 = vadd.f32 %v8083_v21, %v6707_v34  ;;  %v6744_v61 = vsel %vm1615_vm0, %v6722_v11, 0.0 }
 0xd17   : > { %6745 = vadd.xlane.f32.xlu1 %v6744_v61 }
 0xd18   : > { %v6741_v15 = vsel %vm1615_vm0, %v6721_v5, 0.0 }
 0xd19   : > { %6742 = vadd.xlane.f32.xlu0 %v6741_v15 }
 0xd94   : > { %v6728_v35 = vpop.xlane.xlu1 %6727 }
 0xd95   : > { %v6748_v44 = vmul.f32 0.03125, %v6728_v35 }
 0xd96   : > { %v6725_v56 = vpop.xlane.xlu0 %6724 }
 0xd97   : > { %v11849_v29 = vsub.f32 %v6716_v24, %v6748_v44  ;;  %v6747_v38 = vmul.f32 0.03125, %v6725_v56 }
 0xd98   : > { %v6734_v52 = vpop.xlane.xlu1 %6733 }
 0xd99   : > { %v11851_v43 = vsub.f32 %v6715_v53, %v6747_v38  ;;  %v6750_v8 = vmul.f32 0.03125, %v6734_v52  ;;  %v6764_v49 = vmul.f32 %v11849_v29, %v11849_v29 }
 0xd9a   : > { %v6731_v54 = vpop.xlane.xlu0 %6730 }
 0xd9b   : > { %v11855_v3 = vsub.f32 %v6718_v46, %v6750_v8  ;;  %v6749_v26 = vmul.f32 0.03125, %v6731_v54  ;;  %v6774_v0 = vsel %vm1615_vm0, %v6764_v49, 0.0  ;;  %v6763_v57 = vmul.f32 %v11851_v43, %v11851_v43 }
 0xd9c   : > { %v6740_v2 = vpop.xlane.xlu1 %6739  ;;  %6775 = vadd.xlane.f32.xlu1 %v6774_v0 }
 0xd9d   : > { %v11860_v12 = vsub.f32 %v6717_v4, %v6749_v26  ;;  %v6752_v16 = vmul.f32 0.03125, %v6740_v2  ;;  %v6771_v47 = vsel %vm1615_vm0, %v6763_v57, 0.0  ;;  %v6766_v39 = vmul.f32 %v11855_v3, %v11855_v3  ;;  %v5062_v4 = vld [vmem:[%s12116_s28 + $0x10] sm:$0xff]  ;;  %v11898_v57 = vld [vmem:[%s12118_s0] sm:$0xff]  ;;  %s12119_s0 = sld [smem:[#allocation21_spill]] }
 0xd9e   : > { %v6737_v20 = vpop.xlane.xlu0 %6736  ;;  %6772 = vadd.xlane.f32.xlu0 %v6771_v47  ;;  %9527 = vmatprep.subr.mxu0 %v5062_v4 }
 0xd9f   : > { %v11865_v10 = vsub.f32 %v6720_v17, %v6752_v16  ;;  %v6751_v62 = vmul.f32 0.03125, %v6737_v20  ;;  %v6780_v18 = vsel %vm1615_vm0, %v6766_v39, 0.0  ;;  %v6765_v40 = vmul.f32 %v11860_v12, %v11860_v12  ;;  %9528 = vmatpush3.msra.mxu0 %v5062_v4  ;;  %v5071_v17 = vld [vmem:[%s12117_s26 + $0x30] sm:$0xff] }
 0xda0   : > { %6781 = vadd.xlane.f32.xlu1 %v6780_v18  ;;  %v6746_v33 = vpop.xlane.xlu1 %6745  ;;  %9529 = vmatprep.subr.mxu0 %v5061_v41  ;;  %v6830_v20 = vrot.slane %v11898_v57, %v3652_v27 }
 0xda1   : > { %v11870_v48 = vsub.f32 %v6719_v14, %v6751_v62  ;;  %v6754_v59 = vmul.f32 0.03125, %v6746_v33  ;;  %v6777_v21 = vsel %vm1615_vm0, %v6765_v40, 0.0  ;;  %v6768_v50 = vmul.f32 %v11865_v10, %v11865_v10  ;;  %9530 = vmatpush3.msra.mxu0 %v5061_v41  ;;  %9547 = vmatprep.subr.mxu1 %v5071_v17 }
 0xda2   : > { %6778 = vadd.xlane.f32.xlu0 %v6777_v21  ;;  %v6743_v25 = vpop.xlane.xlu0 %6742  ;;  %9531 = vmatprep.subr.mxu0 %v5060_v32 }
 0xda3   : > { %v11875_v13 = vsub.f32 %v6722_v11, %v6754_v59  ;;  %v6753_v24 = vmul.f32 0.03125, %v6743_v25  ;;  %v6786_v28 = vsel %vm1615_vm0, %v6768_v50, 0.0  ;;  %v6767_v23 = vmul.f32 %v11870_v48, %v11870_v48  ;;  %9532 = vmatpush3.msra.mxu0 %v5060_v32  ;;  %9548 = vmatpush3.msra.mxu1 %v5071_v17 }
 0xda4   : > { %6787 = vadd.xlane.f32.xlu1 %v6786_v28  ;;  %9549 = vmatprep.subr.mxu1 %v5070_v58  ;;  %v6842_v59 = vrot.slane %v11898_v57, %v3664_v36 }
 0xda5   : > { %v11880_v31 = vsub.f32 %v6721_v5, %v6753_v24  ;;  %v6783_v53 = vsel %vm1615_vm0, %v6767_v23, 0.0  ;;  %v6770_v55 = vmul.f32 %v11875_v13, %v11875_v13  ;;  %9550 = vmatpush3.msra.mxu1 %v5070_v58 }
 0xda6   : > { %6784 = vadd.xlane.f32.xlu0 %v6783_v53  ;;  %9551 = vmatprep.subr.mxu1 %v5069_v60 }
 0xda7   : > { %v6792_v46 = vsel %vm1615_vm0, %v6770_v55, 0.0  ;;  %v6769_v45 = vmul.f32 %v11880_v31, %v11880_v31  ;;  %9552 = vmatpush3.msra.mxu1 %v5069_v60  ;;  %v5068_v60 = vld [vmem:[%s12117_s26 + $0x18] sm:$0xff] }
 0xda8   : > { %6793 = vadd.xlane.f32.xlu1 %v6792_v46  ;;  %9553 = vmatprep.subr.mxu1 %v5068_v60 }
 0xda9   : > { %v6789_v42 = vsel %vm1615_vm0, %v6769_v45, 0.0  ;;  %9554 = vmatpush3.msra.mxu1 %v5068_v60 }
 0xdaa   : > { %6790 = vadd.xlane.f32.xlu0 %v6789_v42 }
 0xe25   : > { %v6776_v63 = vpop.xlane.xlu1 %6775 }
 0xe26   : > { %v6796_v14 = vmul.f32 0.03125, %v6776_v63  ;;  %v5066_v63 = vld [vmem:[%s12117_s26 + $0x8] sm:$0xff] }
 0xe27   : > { %v6773_v7 = vpop.xlane.xlu0 %6772 }
 0xe28   : > { %v6804_v9 = vadd.f32 1e-05, %v6796_v14  ;;  %v6795_v37 = vmul.f32 0.03125, %v6773_v7  ;;  %v5065_v14 = vld [vmem:[%s12117_s26] sm:$0xff] }
 0xe29   : > { %v6782_v11 = vpop.xlane.xlu1 %6781  ;;  %v8084_v7 = vld [vmem:[%s12119_s0] ss:$0 sm:$0xff]  ;;  %s12120_s0 = sld [smem:[#allocation23_spill]] }
 0xe2a   : > { %9858 = vrsqrt.f32 %v6804_v9  ;;  %v6803_v34 = vadd.f32 1e-05, %v6795_v37  ;;  %v6798_v1 = vmul.f32 0.03125, %v6782_v11 }
 0xe2b   : > { %v6779_v5 = vpop.xlane.xlu0 %6778 }
 0xe2c   : > { %9860 = vrsqrt.f32 %v6803_v34  ;;  %v6806_v61 = vadd.f32 1e-05, %v6798_v1  ;;  %v6797_v15 = vmul.f32 0.03125, %v6779_v5 }
 0xe2d   : > { %v6788_v35 = vpop.xlane.xlu1 %6787 }
 0xe2e   : > { %9862 = vrsqrt.f32 %v6806_v61  ;;  %v6805_v44 = vadd.f32 1e-05, %v6797_v15  ;;  %v6800_v56 = vmul.f32 0.03125, %v6788_v35 }
 0xe2f   : > { %v6785_v38 = vpop.xlane.xlu0 %6784 }
 0xe30   : > { %9864 = vrsqrt.f32 %v6805_v44  ;;  %v6808_v52 = vadd.f32 1e-05, %v6800_v56  ;;  %v6799_v8 = vmul.f32 0.03125, %v6785_v38 }
 0xe31   : > { %v6794_v49 = vpop.xlane.xlu1 %6793 }
 0xe32   : > { %9866 = vrsqrt.f32 %v6808_v52  ;;  %v6807_v54 = vadd.f32 1e-05, %v6799_v8  ;;  %v6802_v26 = vmul.f32 0.03125, %v6794_v49 }
 0xe33   : > { %v6791_v0 = vpop.xlane.xlu0 %6790 }
 0xe34   : > { %9868 = vrsqrt.f32 %v6807_v54  ;;  %v6810_v2 = vadd.f32 1e-05, %v6802_v26  ;;  %v6801_v16 = vmul.f32 0.03125, %v6791_v0 }
 0xe36   : > { %9870 = vrsqrt.f32 %v6810_v2  ;;  %v6809_v47 = vadd.f32 1e-05, %v6801_v16 }
 0xe37   : > { %v9859_v39 = vpop.eup %9858 }
 0xe38   : > { %v6820_v62 = vmul.f32 %v9859_v39, %v11849_v29  ;;  %9872 = vrsqrt.f32 %v6809_v47 }
 0xe39   : > { %v9861_v18 = vpop.eup %9860 }
 0xe3a   : > { %v6819_v40 = vmul.f32 %v9861_v18, %v11851_v43  ;;  %v6832_v21 = vmul.f32 %v6830_v20, %v6820_v62 }
 0xe3b   : > { %v9863_v33 = vpop.eup %9862 }
 0xe3c   : > { %v6822_v50 = vmul.f32 %v9863_v33, %v11855_v3  ;;  %v6831_v25 = vmul.f32 %v6830_v20, %v6819_v40  ;;  %v11912_v29 = vadd.f32 %v6842_v59, %v6832_v21 }
 0xe3d   : > { %v9865_v24 = vpop.eup %9864 }
 0xe3e   : > { %v11909_v28 = vadd.f32 %v6842_v59, %v6831_v25  ;;  %v6821_v27 = vmul.f32 %v9865_v24, %v11860_v12  ;;  %v6834_v53 = vmul.f32 %v6830_v20, %v6822_v50 }
 0xe3f   : > { %v9867_v23 = vpop.eup %9866 }
 0xe40   : > { %v6824_v43 = vmul.f32 %v9867_v23, %v11865_v10  ;;  %9533 = vmatprep.mubr.msk.f32.mxu0 %vm1615_vm0, %v11909_v28  ;;  %v6833_v55 = vmul.f32 %v6830_v20, %v6821_v27  ;;  %v11922_v12 = vadd.f32 %v6842_v59, %v6834_v53  ;;  %v8101_v23 = vld [vmem:[%s12120_s0] ss:$0 sm:$0xff]  ;;  %s12121_s0 = sld [smem:[#allocation24_spill]] }
 0xe41   : > { %v9869_v36 = vpop.eup %9868  ;;  %9534 = vmatmul.mubr.msk.f32.vlgmr.msra.gmra.mxu0 %vm1615_vm0, %v11912_v29 }
 0xe42   : > { %v11919_v3 = vadd.f32 %v6842_v59, %v6833_v55  ;;  %v6823_v46 = vmul.f32 %v9869_v36, %v11870_v48  ;;  %v6836_v42 = vmul.f32 %v6830_v20, %v6824_v43 }
 0xe43   : > { %v9871_v45 = vpop.eup %9870 }
 0xe44   : > { %v6826_v22 = vmul.f32 %v9871_v45, %v11875_v13  ;;  %9536 = vmatprep.mubr.msk.f32.mxu0 %vm1615_vm0, %v11919_v3  ;;  %v6835_v10 = vmul.f32 %v6830_v20, %v6823_v46  ;;  %v6848_v32 = vadd.f32 %v6842_v59, %v6836_v42 }
 0xe45   : > { %v9873_v4 = vpop.eup %9872  ;;  %9537 = vmatmul.mubr.msk.f32.gmra.mxu0 %vm1615_vm0, %v11922_v12 }
 0xe46   : > { %v11929_v41 = vadd.f32 %v6842_v59, %v6835_v10  ;;  %v6825_v48 = vmul.f32 %v9873_v4, %v11880_v31  ;;  %v6838_v6 = vmul.f32 %v6830_v20, %v6826_v22  ;;  %v5067_v31 = vld [vmem:[%s12117_s26 + $0x10] sm:$0xff] }
 0xe47   : > { %9555 = vmatprep.subr.mxu1 %v5067_v31 }
 0xe48   : > { %9539 = vmatprep.mubr.msk.f32.mxu0 %vm1615_vm0, %v11929_v41  ;;  %v6837_v13 = vmul.f32 %v6830_v20, %v6825_v48  ;;  %v6850_v58 = vadd.f32 %v6842_v59, %v6838_v6  ;;  %9556 = vmatpush3.msra.mxu1 %v5067_v31 }
 0xe49   : > { %9540 = vmatmul.mubr.msk.f32.gmra.mxu0 %vm1615_vm0, %v6848_v32  ;;  %9557 = vmatprep.subr.mxu1 %v5066_v63 }
 0xe4a   : > { %v6849_v17 = vadd.f32 %v6842_v59, %v6837_v13  ;;  %9558 = vmatpush3.msra.mxu1 %v5066_v63 }
 0xe4b   : > { %9559 = vmatprep.subr.mxu1 %v5065_v14 }
 0xe4c   : > { %9542 = vmatprep.mubr.msk.f32.mxu0 %vm1615_vm0, %v6849_v17  ;;  %9560 = vmatpush3.msra.mxu1 %v5065_v14 }
 0xe4d   : > { %9543 = vmatmul.mubr.msk.f32.gmra.mxu0 %vm1615_vm0, %v6850_v58 }
 0xf01   : > { %v9535_v9 = vpop.f32.mrf.mxu0 }
 0xf02   : > { %v6953_v37 = vadd.f32 %v9535_v9, %v8084_v7 }
 0xf03   : > { %v6947_v11 = vpop.f32.mrf.mxu0 }
 0xf04   : > { %v6948_v34 = vadd.f32 %v8084_v7, %v6947_v11  ;;  %v6987_v61 = vmax.f32 %v6953_v37, 0.0 }
 0xf05   : > { %v9538_v1 = vpop.f32.mrf.mxu0 }
 0xf06   : > { %v6986_v5 = vmax.f32 %v6948_v34, 0.0  ;;  %v6963_v15 = vadd.f32 %v9538_v1, %v8084_v7 }
 0xf07   : > { %v6957_v35 = vpop.f32.mrf.mxu0 }
 0xf08   : > { %v6958_v44 = vadd.f32 %v8084_v7, %v6957_v35  ;;  %9561 = vmatprep.mubr.msk.f32.mxu1 %vm2148_vm1, %v6986_v5  ;;  %v6989_v52 = vmax.f32 %v6963_v15, 0.0 }
 0xf09   : > { %v9541_v56 = vpop.f32.mrf.mxu0  ;;  %9562 = vmatmul.mubr.msk.f32.vlgmr.msra.gmra.mxu1 %vm2148_vm1, %v6987_v61 }
 0xf0a   : > { %v6988_v38 = vmax.f32 %v6958_v44, 0.0  ;;  %v6973_v8 = vadd.f32 %v9541_v56, %v8084_v7 }
 0xf0b   : > { %v6967_v49 = vpop.f32.mrf.mxu0 }
 0xf0c   : > { %v6968_v54 = vadd.f32 %v8084_v7, %v6967_v49  ;;  %9564 = vmatprep.mubr.msk.f32.mxu1 %vm2148_vm1, %v6988_v38  ;;  %v6991_v2 = vmax.f32 %v6973_v8, 0.0 }
 0xf0d   : > { %v9544_v26 = vpop.f32.mrf.mxu0  ;;  %9565 = vmatmul.mubr.msk.f32.gmra.mxu1 %vm2148_vm1, %v6989_v52 }
 0xf0e   : > { %v6990_v0 = vmax.f32 %v6968_v54, 0.0  ;;  %v6983_v16 = vadd.f32 %v9544_v26, %v8084_v7 }
 0xf0f   : > { %v6977_v47 = vpop.f32.mrf.mxu0 }
 0xf10   : > { %v6978_v39 = vadd.f32 %v8084_v7, %v6977_v47  ;;  %9567 = vmatprep.mubr.msk.f32.mxu1 %vm2148_vm1, %v6990_v0  ;;  %v6993_v62 = vmax.f32 %v6983_v16, 0.0 }
 0xf11   : > { %9568 = vmatmul.mubr.msk.f32.gmra.mxu1 %vm2148_vm1, %v6991_v2 }
 0xf12   : > { %v6992_v20 = vmax.f32 %v6978_v39, 0.0 }
 0xf14   : > { %9570 = vmatprep.mubr.msk.f32.mxu1 %vm2148_vm1, %v6992_v20 }
 0xf15   : > { %9571 = vmatmul.mubr.msk.f32.gmra.mxu1 %vm2148_vm1, %v6993_v62 }
 0xfc9   : > { %v9563_v18 = vpop.f32.mrf.mxu1 }
 0xfcb   : > { %v7084_v40 = vpop.f32.mrf.mxu1 }
 0xfcc   : > { %v7123_v13 = vadd.f32 %v7084_v40, %v11909_v28 }
 0xfcd   : > { %v9566_v33 = vpop.f32.mrf.mxu1 }
 0xfce   : > { %v7126_v46 = vadd.f32 %v9566_v33, %v11922_v12 }
 0xfcf   : > { %v7094_v59 = vpop.f32.mrf.mxu1 }
 0xfd0   : > { %v7125_v10 = vadd.f32 %v7094_v59, %v11919_v3  ;;  %v7140_v6 = vadd.f32 %v8101_v23, %v7126_v46  ;;  %v7137_v3 = vadd.f32 %v8101_v23, %v7123_v13  ;;  %v7276_v46 = vld [vmem:[%s12121_s0 + $0x18] sm:$0xff] }
 0xfd1   : > { %v9569_v21 = vpop.f32.mrf.mxu1 }
 0xfd2   : > { %v7128_v24 = vadd.f32 %v9569_v21, %v6848_v32  ;;  %v7124_v32 = vadd.f32 %v9563_v18, %v11912_v29  ;;  %v7139_v12 = vadd.f32 %v8101_v23, %v7125_v10  ;;  %v7154_v60 = vsel %vm1615_vm0, %v7140_v6, 0.0 }
 0xfd3   : > { %v7104_v50 = vpop.f32.mrf.mxu1  ;;  %v7145_v63 = vsel %vm1615_vm0, %v7137_v3, 0.0 }
 0xfd4   : > { %v7127_v43 = vadd.f32 %v7104_v50, %v11929_v41  ;;  %v7142_v45 = vadd.f32 %v8101_v23, %v7128_v24  ;;  %v7151_v31 = vsel %vm1615_vm0, %v7139_v12, 0.0 }
 0xfd5   : > { %v9572_v25 = vpop.f32.mrf.mxu1 }
 0xfd6   : > { %v7130_v27 = vadd.f32 %v9572_v25, %v6850_v58  ;;  %v7141_v4 = vadd.f32 %v8101_v23, %v7127_v43  ;;  %v7160_v41 = vsel %vm1615_vm0, %v7142_v45, 0.0  ;;  %v7138_v58 = vadd.f32 %v8101_v23, %v7124_v32 }
 0xfd7   : > { %v7114_v53 = vpop.f32.mrf.mxu1 }
 0xfd8   : > { %v7144_v55 = vadd.f32 %v8101_v23, %v7130_v27  ;;  %v7129_v36 = vadd.f32 %v7114_v53, %v6849_v17  ;;  %v7157_v17 = vsel %vm1615_vm0, %v7141_v4, 0.0  ;;  %v7148_v29 = vsel %vm1615_vm0, %v7138_v58, 0.0 }
 0xfda   : > { %v7143_v42 = vadd.f32 %v8101_v23, %v7129_v36  ;;  %v7166_v22 = vsel %vm1615_vm0, %v7144_v55, 0.0  ;;  %v10008_v36 = vmov 0.0  }
 0xfdb   : > { %7167 = vadd.xlane.f32.xlu0 %v7166_v22  ;;  %9573 = vmatprep.subr.mxu0 %v10008_v36  ;;  %v7273_v22 = vld [vmem:[%s12121_s0] sm:$0xff] }
 0xfdc   : > { %v7163_v48 = vsel %vm1615_vm0, %v7143_v42, 0.0  ;;  %9592 = vmatprep.subr.mxu1 %v10008_v36  ;;  %9589 = vmatprep.mubr.msk.f32.mxu0 %vm10009_vm2, %v10008_v36 }
 0xfdd   : > { %7164 = vadd.xlane.f32.xlu1 %v7163_v48  ;;  %9600 = vmatprep.mubr.msk.f32.mxu1 %vm10009_vm2, %v10008_v36 }
 0xfde   : > { %9593 = vmatpush3.msra.mxu1 %v7276_v46 }
 0xfdf   : > { %7161 = vadd.xlane.f32.xlu0 %v7160_v41  ;;  %9594 = vmatprep.subr.mxu1 %v10008_v36 }
 0xfe1   : > { %7158 = vadd.xlane.f32.xlu1 %v7157_v17 }
 0xfe3   : > { %7155 = vadd.xlane.f32.xlu0 %v7154_v60 }
 0xfe5   : > { %7152 = vadd.xlane.f32.xlu1 %v7151_v31 }
 0xfe7   : > { %7149 = vadd.xlane.f32.xlu0 %v7148_v29 }
 0xfe9   : > { %7146 = vadd.xlane.f32.xlu1 %v7145_v63 }
0x1064   : > { %v7168_v14 = vpop.xlane.xlu0 %7167 }
0x1065   : > { %v7176_v28 = vmul.f32 0.03125, %v7168_v14 }
0x1066   : > { %v7165_v7 = vpop.xlane.xlu1 %7164 }
0x1067   : > { %v11964_v9 = vsub.f32 %v7144_v55, %v7176_v28  ;;  %v7175_v37 = vmul.f32 0.03125, %v7165_v7 }
0x1068   : > { %v7162_v11 = vpop.xlane.xlu0 %7161 }
0x1069   : > { %v11966_v34 = vsub.f32 %v7143_v42, %v7175_v37  ;;  %v7174_v1 = vmul.f32 0.03125, %v7162_v11  ;;  %v7192_v5 = vmul.f32 %v11964_v9, %v11964_v9  ;;  %v7274_v42 = vld [vmem:[%s12121_s0 + $0x8] sm:$0xff] }
0x106a   : > { %v7159_v61 = vpop.xlane.xlu1 %7158 }
0x106b   : > { %v11970_v15 = vsub.f32 %v7142_v45, %v7174_v1  ;;  %v7173_v35 = vmul.f32 0.03125, %v7159_v61  ;;  %v7214_v44 = vsel %vm1615_vm0, %v7192_v5, 0.0  ;;  %v7191_v56 = vmul.f32 %v11966_v34, %v11966_v34  ;;  %v7275_v45 = vld [vmem:[%s12121_s0 + $0x10] sm:$0xff]  ;;  %s12122_s0 = sld [smem:[#allocation3_spill]] }
0x106c   : > { %7215 = vadd.xlane.f32.xlu0 %v7214_v44  ;;  %v7156_v38 = vpop.xlane.xlu0 %7155  ;;  %9595 = vmatpush3.msra.mxu1 %v7275_v45  ;;  %v7252_v44 = vrot.slane %v11898_v57, %v4768_v19 }
0x106d   : > { %v11975_v52 = vsub.f32 %v7141_v4, %v7173_v35  ;;  %v7172_v8 = vmul.f32 0.03125, %v7156_v38  ;;  %v7211_v49 = vsel %vm1615_vm0, %v7191_v56, 0.0  ;;  %v7190_v54 = vmul.f32 %v11970_v15, %v11970_v15  ;;  %9596 = vmatprep.subr.mxu1 %v10008_v36 }
0x106e   : > { %7212 = vadd.xlane.f32.xlu1 %v7211_v49  ;;  %v7153_v26 = vpop.xlane.xlu1 %7152  ;;  %9597 = vmatpush3.msra.mxu1 %v7274_v42  ;;  %v7279_v42 = vld [vmem:[%s12123_s1 + $0x8] sm:$0xff] }
0x106f   : > { %v11980_v0 = vsub.f32 %v7140_v6, %v7172_v8  ;;  %v7171_v2 = vmul.f32 0.03125, %v7153_v26  ;;  %v7208_v16 = vsel %vm1615_vm0, %v7190_v54, 0.0  ;;  %v7189_v47 = vmul.f32 %v11975_v52, %v11975_v52  ;;  %9598 = vmatprep.subr.mxu1 %v10008_v36 }
0x1070   : > { %7209 = vadd.xlane.f32.xlu0 %v7208_v16  ;;  %v7150_v39 = vpop.xlane.xlu0 %7149  ;;  %9599 = vmatpush3.msra.mxu1 %v7273_v22  ;;  %v7264_v8 = vrot.slane %v11898_v57, %v4780_v51  ;;  %v7278_v22 = vld [vmem:[%s12123_s1] sm:$0xff] }
0x1071   : > { %v11985_v20 = vsub.f32 %v7139_v12, %v7171_v2  ;;  %v7170_v62 = vmul.f32 0.03125, %v7150_v39  ;;  %v7205_v18 = vsel %vm1615_vm0, %v7189_v47, 0.0  ;;  %v7188_v40 = vmul.f32 %v11980_v0, %v11980_v0  ;;  %9610 = vmatprep.subr.mxu1 %v10008_v36 }
0x1072   : > { %7206 = vadd.xlane.f32.xlu1 %v7205_v18  ;;  %v7147_v33 = vpop.xlane.xlu1 %7146 }
0x1073   : > { %v11990_v59 = vsub.f32 %v7138_v58, %v7170_v62  ;;  %v7169_v21 = vmul.f32 0.03125, %v7147_v33  ;;  %v7202_v50 = vsel %vm1615_vm0, %v7188_v40, 0.0  ;;  %v7187_v25 = vmul.f32 %v11985_v20, %v11985_v20 }
0x1074   : > { %7203 = vadd.xlane.f32.xlu0 %v7202_v50 }
0x1075   : > { %v11995_v24 = vsub.f32 %v7137_v3, %v7169_v21  ;;  %v7199_v27 = vsel %vm1615_vm0, %v7187_v25, 0.0  ;;  %v7186_v23 = vmul.f32 %v11990_v59, %v11990_v59 }
0x1076   : > { %7200 = vadd.xlane.f32.xlu1 %v7199_v27 }
0x1077   : > { %v7196_v53 = vsel %vm1615_vm0, %v7186_v23, 0.0  ;;  %v7185_v43 = vmul.f32 %v11995_v24, %v11995_v24 }
0x1078   : > { %7197 = vadd.xlane.f32.xlu0 %v7196_v53 }
0x1079   : > { %v7193_v55 = vsel %vm1615_vm0, %v7185_v43, 0.0 }
0x107a   : > { %7194 = vadd.xlane.f32.xlu1 %v7193_v55 }
0x10f5   : > { %v7216_v10 = vpop.xlane.xlu0 %7215 }
0x10f6   : > { %v7224_v4 = vmul.f32 0.03125, %v7216_v10  ;;  %v8103_v10 = vld [vmem:[%s12124_s2] ss:$0 sm:$0xff] }
0x10f7   : > { %v7213_v48 = vpop.xlane.xlu1 %7212 }
0x10f8   : > { %v7232_v32 = vadd.f32 1e-05, %v7224_v4  ;;  %v7223_v6 = vmul.f32 0.03125, %v7213_v48 }
0x10f9   : > { %v7210_v41 = vpop.xlane.xlu0 %7209 }
0x10fa   : > { %9874 = vrsqrt.f32 %v7232_v32  ;;  %v7231_v13 = vadd.f32 1e-05, %v7223_v6  ;;  %v7222_v12 = vmul.f32 0.03125, %v7210_v41  ;;  %v7281_v41 = vld [vmem:[%s10213_s20] sm:$0xff] }
0x10fb   : > { %v7207_v17 = vpop.xlane.xlu1 %7206 }
0x10fc   : > { %9876 = vrsqrt.f32 %v7231_v13  ;;  %v7230_v58 = vadd.f32 1e-05, %v7222_v12  ;;  %v7221_v60 = vmul.f32 0.03125, %v7207_v17  ;;  %v8105_v13 = vld [vmem:[%s10208_s29] ss:$0 sm:$0xff] }
0x10fd   : > { %v7204_v3 = vpop.xlane.xlu0 %7203 }
0x10fe   : > { %9878 = vrsqrt.f32 %v7230_v58  ;;  %v7229_v31 = vadd.f32 1e-05, %v7221_v60  ;;  %v7220_v29 = vmul.f32 0.03125, %v7204_v3 }
0x10ff   : > { %v7201_v63 = vpop.xlane.xlu1 %7200 }
0x1100   : > { %9880 = vrsqrt.f32 %v7229_v31  ;;  %v7228_v14 = vadd.f32 1e-05, %v7220_v29  ;;  %v7219_v28 = vmul.f32 0.03125, %v7201_v63 }
0x1101   : > { %v7198_v7 = vpop.xlane.xlu0 %7197 }
0x1102   : > { %9882 = vrsqrt.f32 %v7228_v14  ;;  %v7227_v37 = vadd.f32 1e-05, %v7219_v28  ;;  %v7218_v11 = vmul.f32 0.03125, %v7198_v7 }
0x1103   : > { %v7195_v1 = vpop.xlane.xlu1 %7194 }
0x1104   : > { %9884 = vrsqrt.f32 %v7227_v37  ;;  %v7226_v5 = vadd.f32 1e-05, %v7218_v11  ;;  %v7217_v61 = vmul.f32 0.03125, %v7195_v1 }
0x1106   : > { %9886 = vrsqrt.f32 %v7226_v5  ;;  %v7225_v35 = vadd.f32 1e-05, %v7217_v61 }
0x1107   : > { %v9875_v56 = vpop.eup %9874 }
0x1108   : > { %9888 = vrsqrt.f32 %v7225_v35  ;;  %v7248_v38 = vmul.f32 %v9875_v56, %v11964_v9 }
0x1109   : > { %v9877_v49 = vpop.eup %9876 }
0x110a   : > { %v7260_v54 = vmul.f32 %v7252_v44, %v7248_v38  ;;  %v7247_v26 = vmul.f32 %v9877_v49, %v11966_v34 }
0x110b   : > { %v9879_v2 = vpop.eup %9878 }
0x110c   : > { %v7272_v16 = vadd.f32 %v7264_v8, %v7260_v54  ;;  %v7259_v47 = vmul.f32 %v7252_v44, %v7247_v26  ;;  %v7246_v39 = vmul.f32 %v9879_v2, %v11970_v15 }
0x110d   : > { %v9881_v62 = vpop.eup %9880 }
0x110e   : > { %9574 = vmatpush3.msra.mxu0 %v7272_v16  ;;  %v7271_v19 = vadd.f32 %v7264_v8, %v7259_v47  ;;  %v7258_v18 = vmul.f32 %v7252_v44, %v7246_v39  ;;  %v7245_v40 = vmul.f32 %v9881_v62, %v11975_v52 }
0x110f   : > { %v9883_v9 = vpop.eup %9882  ;;  %9575 = vmatprep.subr.mxu0 %v10008_v36 }
0x1110   : > { %9576 = vmatpush3.msra.mxu0 %v7271_v19  ;;  %v7270_v30 = vadd.f32 %v7264_v8, %v7258_v18  ;;  %v7257_v51 = vmul.f32 %v7252_v44, %v7245_v40  ;;  %v7244_v57 = vmul.f32 %v9883_v9, %v11980_v0 }
0x1111   : > { %v9885_v34 = vpop.eup %9884  ;;  %9577 = vmatprep.subr.mxu0 %v10008_v36 }
0x1112   : > { %9578 = vmatpush3.msra.mxu0 %v7270_v30  ;;  %v7269_v33 = vadd.f32 %v7264_v8, %v7257_v51  ;;  %v7256_v15 = vmul.f32 %v7252_v44, %v7244_v57  ;;  %v7243_v21 = vmul.f32 %v9885_v34, %v11985_v20 }
0x1113   : > { %v9887_v50 = vpop.eup %9886  ;;  %9579 = vmatprep.subr.mxu0 %v10008_v36 }
0x1114   : > { %9580 = vmatpush3.msra.mxu0 %v7269_v33  ;;  %v7268_v52 = vadd.f32 %v7264_v8, %v7256_v15  ;;  %v7255_v25 = vmul.f32 %v7252_v44, %v7243_v21  ;;  %v7242_v27 = vmul.f32 %v9887_v50, %v11990_v59  ;;  %v1559_v59 = vld [vmem:[%s12122_s0] sm:$0xf]  ;;  %s7756_s0 = sshll.u32 %s12130_s10, 2 }
0x1115   : > { %v9889_v23 = vpop.eup %9888  ;;  %9581 = vmatprep.subr.mxu0 %v10008_v36  ;;  %s1490_s2 = scalar_lea.vmem %s10221_s4, %s7756_s0 }
0x1116   : > { %9582 = vmatpush3.msra.mxu0 %v7268_v52  ;;  %v7267_v0 = vadd.f32 %v7264_v8, %v7255_v25  ;;  %v7254_v53 = vmul.f32 %v7252_v44, %v7242_v27  ;;  %v7241_v43 = vmul.f32 %v9889_v23, %v11995_v24 }
0x1117   : > { %9583 = vmatprep.subr.mxu0 %v10008_v36 }
0x1118   : > { %9584 = vmatpush3.msra.mxu0 %v7267_v0  ;;  %v7266_v20 = vadd.f32 %v7264_v8, %v7254_v53  ;;  %v7253_v55 = vmul.f32 %v7252_v44, %v7241_v43 }
0x1119   : > { %9585 = vmatprep.subr.mxu0 %v10008_v36 }
0x111a   : > { %9586 = vmatpush3.msra.mxu0 %v7266_v20  ;;  %v7265_v46 = vadd.f32 %v7264_v8, %v7253_v55 }
0x111b   : > { %9587 = vmatprep.subr.mxu0 %v10008_v36 }
0x111c   : > { %9588 = vmatpush3.msra.mxu0 %v7265_v46 }
0x111d   : > { %9590 = vmatmul.mubr.msk.f32.vlgmr.msra.gmra.mxu0 %vm2148_vm1, %v1559_v59  ;;  %9603 = vmatprep.subr.mxu0 %v10008_v36 }
0x111e   : > { %9607 = vmatprep.mubr.msk.f32.mxu0 %vm10009_vm2, %v10008_v36  ;;  %9604 = vmatpush3.msra.mxu0 %v7279_v42 }
0x111f   : > { %9605 = vmatprep.subr.mxu0 %v10008_v36 }
0x1120   : > { %9606 = vmatpush3.msra.mxu0 %v7278_v22 }
0x11dd   : > { %v7352_v24 = vpop.f32.mrf.mxu0 }
0x11de   : > { %9601 = vmatmul.mubr.msk.f32.vlgmr.msra.gmra.mxu1 %vm1615_vm0, %v7352_v24 }
0x11df   : > { %v9591_v45 = vpop.f32.mrf.mxu0  ;;  %9612 = vmatprep.mubr.msk.f32.mxu1 %vm10009_vm2, %v10008_v36  ;;  %9611 = vmatpush3.msra.mxu1 %v7281_v41  ;;  %v8107_v36 = vld [vmem:[#allocation2] ss:$0 sm:$0xff] }
0x129e   : > { %v7431_v4 = vpop.f32.mrf.mxu1 }
0x129f   : > { %v7432_v48 = vadd.f32 %v8103_v10, %v7431_v4 }
0x12a0   : > { %v9602_v32 = vpop.f32.mrf.mxu1 }
0x12a1   : > { %v7435_v6 = vmax.f32 %v7432_v48, 0.0 }
0x12a3   : > { %9608 = vmatmul.mubr.msk.f32.vlgmr.msra.gmra.mxu0 %vm7442_vm3, %v7435_v6 }
0x1363   : > { %v7512_v12 = vpop.f32.mrf.mxu0 }
0x1364   : > { %v7513_v17 = vadd.f32 %v8105_v13, %v7512_v12 }
0x1365   : > { %v9609_v58 = vpop.f32.mrf.mxu0 }
0x1366   : > { %v7516_v60 = vmax.f32 %v7513_v17, 0.0 }
0x1368   : > { %9613 = vmatmul.mubr.msk.f32.vlgmr.msra.gmra.mxu1 %vm7523_vm4, %v7516_v60 }
0x1428   : > { %v7593_v3 = vpop.f32.mrf.mxu1 }
0x1429   : > { %v7594_v31 = vadd.f32 %v8107_v36, %v7593_v3 }
0x142a   : > { %v9614_v29 = vpop.f32.mrf.mxu1 }
0x142b   : > { %7598 = vst.msk [vmem:[%s1490_s2] sm:$0xf] %vm7597_vm5, %v7594_v31 }
0x142c PF: > { %s107_s7 = sadd.s32 1, %s9965_s7  }
0x142d   : > { %p104_p6 = scmp.ge.s32.totalorder %s107_s7, 4  }
0x142f   :  { %106 = sbr.rel (!%p104_p6) target bundleno = 85 (0x55), region = 297 }

</bundles_post_ra>
